<compile_context>
chip_gen: v7x
topology: tpu7x:2x2x1
jax: 0.10.0
libtpu: 0.0.40
codegen_flags: <defaults>
</compile_context>

<pallas_src>
import jax
import jax.numpy as jnp
from jax.experimental import pallas as pl
from jax.experimental.pallas import tpu as pltpu

K_PAD = 128       # raw feature dims zero-padded to a full lane tile
NEG_INF = -1e30   # additive attention mask value


# ---------------------------------------------------------------------------
# The single fused kernel body.
# ---------------------------------------------------------------------------
def make_fused_kernel(num_blocks, num_mlp_layers, hidden):
    H = hidden

    def kernel(xg_ref, xd_ref, bias_gd_ref, bias_dg_ref, selg_ref, seld_ref,
               wsrc_ref, wdst_ref, small_ref, wmlp_ref, bmlp_ref, out_ref):
        xg = xg_ref[...]                         # (Ng, K) bf16
        xd = xd_ref[...]                         # (Nd, K) bf16
        bias_gd = bias_gd_ref[...]               # (Nd, Ng) f32: 0 on edge, -1e30 off
        bias_dg = bias_dg_ref[...]               # (Ng, Nd) f32

        def attn(hl_src, hr_dst, att_row, bias):
            """GATv2 (heads=1) as dense masked attention (f32 VPU, bf16 MXU).

            hl_src : (Ns, H) f32 source projections (messages)
            hr_dst : (Nd, H) f32 destination projections
            att_row: (1, H)  f32
            bias   : (Nd, Ns) f32 additive mask
            """
            # TODO(synk): for large graphs this (Nd, Ns, H) slab must be tiled
            # with a grid + online softmax (size it against v7x's 64 MiB VMEM).
            s = hr_dst[:, None, :] + hl_src[None, :, :]        # (Nd, Ns, H)
            s = jnp.maximum(s, 0.2 * s)                        # LeakyReLU(0.2)
            e = jnp.sum(s * att_row[None, :, :], axis=-1) + bias   # (Nd, Ns)
            m = jnp.max(e, axis=-1, keepdims=True)             # (Nd, 1)
            p = jnp.exp(e - m)                                 # masked -> ~0
            denom = jnp.sum(p, axis=-1, keepdims=True)         # >= 1 always
            alpha = p * pl.reciprocal(denom, approx=True)
            # Destinations with no incoming edge: zero aggregation (matches
            # scatter-softmax over an empty neighborhood).
            rowmask = jnp.where(m > jnp.float32(-1e20), 1.0, 0.0)
            out = jnp.dot(alpha.astype(jnp.bfloat16),
                          hl_src.astype(jnp.bfloat16),
                          preferred_element_type=jnp.float32)  # (Nd, H)
            return out * rowmask

        for blk in range(num_blocks):
            # One N=2H projection matmul per source node type.
            pg = jnp.dot(xg, wsrc_ref[blk], preferred_element_type=jnp.float32)
            pd = jnp.dot(xd, wdst_ref[blk], preferred_element_type=jnp.float32)
            hl_gd, hr_dg = pg[:, :H], pg[:, H:]   # gene: src of g2d, dst of d2g
            hr_gd, hl_dg = pd[:, :H], pd[:, H:]   # disease: dst of g2d, src of d2g

            r = 6 * blk
            att_gd = small_ref[pl.ds(r + 0, 1), :]
            att_dg = small_ref[pl.ds(r + 1, 1), :]
            scale_d = small_ref[pl.ds(r + 2, 1), :]
            shift_d = small_ref[pl.ds(r + 3, 1), :]
            scale_g = small_ref[pl.ds(r + 4, 1), :]
            shift_g = small_ref[pl.ds(r + 5, 1), :]

            new_d = attn(hl_gd, hr_gd, att_gd, bias_gd)        # (Nd, H)
            new_g = attn(hl_dg, hr_dg, att_dg, bias_dg)        # (Ng, H)

            # Folded BatchNorm (eval) + conv bias + ReLU: one FMA + max.
            xd = jnp.maximum(new_d * scale_d + shift_d, 0.0).astype(jnp.bfloat16)
            xg = jnp.maximum(new_g * scale_g + shift_g, 0.0).astype(jnp.bfloat16)
            # Dropout: eval mode -> identity.

        # Gather by edge_label_index as one-hot matmuls (embeddings stay in
        # VMEM; exact in bf16 since one-hot rows are 0/1).
        # TODO(synk): for large E/N switch to a scalar-prefetch index gather.
        gene_embs = jnp.dot(selg_ref[...], xg, preferred_element_type=jnp.float32)
        dis_embs = jnp.dot(seld_ref[...], xd, preferred_element_type=jnp.float32)
        h = jnp.concatenate([gene_embs, dis_embs], axis=-1)    # (E_PAD, 2H) f32

        for li in range(num_mlp_layers):
            w = wmlp_ref[li]                                   # (2H, 2H) bf16
            b = bmlp_ref[pl.ds(li, 1), :]                      # (1, 2H) f32
            h = jnp.dot(h.astype(jnp.bfloat16), w,
                        preferred_element_type=jnp.float32) + b
            if li < num_mlp_layers - 1:
                h = jnp.maximum(h, 0.0)

        out_ref[...] = h                                        # lane-dense store

    return kernel


# ---------------------------------------------------------------------------
# Parameter init (deterministic, synthetic, "PyTorch-like" layout).
# ---------------------------------------------------------------------------
def _glorot(key, shape):
    fan_in, fan_out = shape
    limit = (6.0 / (fan_in + fan_out)) ** 0.5
    return jax.random.uniform(key, shape, jnp.float32, -limit, limit)


def init_gatv2(key, in_src, in_dst, out):
    k1, k2, k3 = jax.random.split(key, 3)
    return dict(
        wl=_glorot(k1, (in_src, out)),        # source projection (messages)
        wr=_glorot(k2, (in_dst, out)),        # destination projection
        att=_glorot(k3, (1, out)),
        b=jnp.zeros((1, out), jnp.float32),
    )


def init_bn(out):
    return dict(
        gamma=jnp.ones((1, out), jnp.float32),
        beta=jnp.zeros((1, out), jnp.float32),
        mean=jnp.zeros((1, out), jnp.float32),
        var=jnp.ones((1, out), jnp.float32),
    )


def init_linear(key, fin, fout):
    kw, kb = jax.random.split(key)
    bound = 1.0 / (fin ** 0.5)
    w = jax.random.uniform(kw, (fin, fout), jnp.float32, -bound, bound)
    b = jax.random.uniform(kb, (1, fout), jnp.float32, -bound, bound)
    return (w, b)


def init_params(key, gene_dim, disease_dim, hidden, num_blocks, num_hidden_layers):
    keys = jax.random.split(key, 2 * num_blocks + num_hidden_layers + 2)
    ki = iter(keys)
    encoder = []
    fg, fd = gene_dim, disease_dim
    for _ in range(num_blocks):
        encoder.append(dict(
            conv_g2d=init_gatv2(next(ki), fg, fd, hidden),   # gene -> disease
            conv_d2g=init_gatv2(next(ki), fd, fg, hidden),   # disease -> gene
            bn_disease=init_bn(hidden),
            bn_gene=init_bn(hidden),
        ))
        fg, fd = hidden, hidden
    ff_in = 2 * hidden
    ff = [init_linear(next(ki), ff_in, ff_in)]
    for _ in range(num_hidden_layers):
        ff.append(init_linear(next(ki), ff_in, ff_in))
    ff.append(init_linear(next(ki), ff_in, 1))
    return dict(encoder=encoder, feedforward=ff)


# ---------------------------------------------------------------------------
# Host-side glue: one-time layout/fold prep + a single pallas_call.
# ---------------------------------------------------------------------------
def dense_adj(src, dst, n_src, n_dst, add_self_loops=True):
    adj = jnp.zeros((n_dst, n_src), jnp.int8).at[dst, src].set(1)
    if add_self_loops:
        # TODO(synk): GATv2Conv default add_self_loops=True (modeled as i<->i up
        # to min(Ns, Nd)); flip to False if the reference hetero config disables it.
        m = min(n_src, n_dst)
        idx = jnp.arange(m)
        adj = adj.at[idx, idx].set(1)
    return adj


def _pad_rows(w, rows):
    return jnp.pad(w, ((0, rows - w.shape[0]), (0, 0)))


def _fold_bn(bn, conv_bias, eps=1e-5):
    scale = bn["gamma"] * jax.lax.rsqrt(bn["var"] + eps)
    shift = bn["beta"] + (conv_bias - bn["mean"]) * scale
    return scale, shift


def gnn_feedforward_forward(params, x_gene, x_disease, adj_g2d, adj_d2g,
                            edge_label_index):
    num_gene, gene_dim = x_gene.shape
    num_disease, disease_dim = x_disease.shape
    num_edges = edge_label_index.shape[1]
    hidden = params["encoder"][0]["conv_g2d"]["wl"].shape[1]
    num_blocks = len(params["encoder"])
    num_mlp_layers = len(params["feedforward"])
    ff_dim = 2 * hidden
    assert hidden == K_PAD, "fused kernel assumes hidden == K_PAD (128)"

    # ---- one-time host-side layout prep (cheap, outside the kernel) --------
    xg = jnp.pad(x_gene, ((0, 0), (0, K_PAD - gene_dim))).astype(jnp.bfloat16)
    xd = jnp.pad(x_disease, ((0, 0), (0, K_PAD - disease_dim))).astype(jnp.bfloat16)

    # Adjacency -> additive attention bias (0 on edges, -1e30 elsewhere).
    bias_g2d = jnp.where(adj_g2d > 0, 0.0, NEG_INF).astype(jnp.float32)
    bias_d2g = jnp.where(adj_d2g > 0, 0.0, NEG_INF).astype(jnp.float32)

    # Edge batch padded to a full bf16 sublane tile; pad indices -> zero rows.
    e_pad = max(16, -(-num_edges // 16) * 16)
    pad_n = e_pad - num_edges
    gene_idx = jnp.pad(edge_label_index[1], (0, pad_n), constant_values=-1)
    dis_idx = jnp.pad(edge_label_index[0], (0, pad_n), constant_values=-1)
    sel_g = jax.nn.one_hot(gene_idx, num_gene, dtype=jnp.bfloat16)
    sel_d = jax.nn.one_hot(dis_idx, num_disease, dtype=jnp.bfloat16)

    # Stacked projection weights (one K x 2H matmul per source type per block)
    # and consolidated small-parameter stack (att vectors + folded BN).
    wsrc, wdst, small = [], [], []
    for blk in params["encoder"]:
        g2d, d2g = blk["conv_g2d"], blk["conv_d2g"]
        wl_gd = _pad_rows(g2d["wl"], K_PAD)   # gene as source   (g2d)
        wr_dg = _pad_rows(d2g["wr"], K_PAD)   # gene as dest     (d2g)
        wr_gd = _pad_rows(g2d["wr"], K_PAD)   # disease as dest  (g2d)
        wl_dg = _pad_rows(d2g["wl"], K_PAD)   # disease as source(d2g)
        wsrc.append(jnp.concatenate([wl_gd, wr_dg], axis=1))   # (K, 2H)
        wdst.append(jnp.concatenate([wr_gd, wl_dg], axis=1))   # (K, 2H)
        scale_d, shift_d = _fold_bn(blk["bn_disease"], g2d["b"])
        scale_g, shift_g = _fold_bn(blk["bn_gene"], d2g["b"])
        small += [g2d["att"], d2g["att"], scale_d, shift_d, scale_g, shift_g]
    wsrc = jnp.stack(wsrc).astype(jnp.bfloat16)               # (B, K, 2H)
    wdst = jnp.stack(wdst).astype(jnp.bfloat16)               # (B, K, 2H)
    small = jnp.concatenate(small, axis=0)                     # (6B, H) f32

    # MLP weights/biases stacked; final (2H,1) layer zero-padded to 2H lanes.
    wmlp, bmlp = [], []
    for w, b in params["feedforward"]:
        wmlp.append(jnp.pad(w, ((0, 0), (0, ff_dim - w.shape[1]))))
        bmlp.append(jnp.pad(b, ((0, 0), (0, ff_dim - b.shape[1]))))
    wmlp = jnp.stack(wmlp).astype(jnp.bfloat16)               # (L, 2H, 2H)
    bmlp = jnp.concatenate(bmlp, axis=0)                       # (L, 2H) f32

    flat = [xg, xd, bias_g2d, bias_d2g, sel_g, sel_d,
            wsrc, wdst, small, wmlp, bmlp]

    # Advisory cost estimate for the XLA scheduler.
    H = hidden
    flops = 0
    for _ in range(num_blocks):
        flops += 2 * (num_gene + num_disease) * K_PAD * ff_dim     # projections
        flops += 2 * 2 * num_disease * num_gene * H                # alpha @ hl
        flops += 10 * num_disease * num_gene * H                   # attn elementwise
    flops += 2 * e_pad * (num_gene + num_disease) * H              # one-hot gathers
    flops += 2 * e_pad * ff_dim * ff_dim * num_mlp_layers          # MLP
    transcendentals = num_blocks * 2 * num_disease * num_gene
    bytes_accessed = sum(int(a.size) * a.dtype.itemsize for a in flat) \
        + e_pad * ff_dim * 4

    kernel = make_fused_kernel(num_blocks, num_mlp_layers, hidden)
    out = pl.pallas_call(
        kernel,
        out_shape=jax.ShapeDtypeStruct((e_pad, ff_dim), jnp.float32),
        in_specs=[pl.BlockSpec(memory_space=pltpu.MemorySpace.VMEM)] * len(flat),
        out_specs=pl.BlockSpec(memory_space=pltpu.MemorySpace.VMEM),
        cost_estimate=pl.CostEstimate(flops=int(flops),
                                      transcendentals=int(transcendentals),
                                      bytes_accessed=int(bytes_accessed)),
    )(*flat)
    return out[:num_edges, 0]
    # TODO(synk): training-mode BatchNorm batch statistics and stochastic
    # Dropout are not reproduced (eval semantics); to_hetero metadata is
    # hard-coded to the gene/disease bipartite case.


if __name__ == "__main__":
    key = jax.random.PRNGKey(0)
    keys = jax.random.split(key, 8)

    # Small synthetic heterogeneous graph: 16 genes (dim 32), 8 diseases (dim 48).
    num_gene, num_disease = 16, 8
    gene_dim, disease_dim = 32, 48
    hidden = 128
    num_blocks = 2
    num_hidden_layers = 3

    x_gene = jax.random.normal(keys[0], (num_gene, gene_dim), jnp.float32)
    x_disease = jax.random.normal(keys[1], (num_disease, disease_dim), jnp.float32)

    num_edges = 24
    src_gene = jax.random.randint(keys[2], (num_edges,), 0, num_gene)
    dst_disease = jax.random.randint(keys[3], (num_edges,), 0, num_disease)
    adj_g2d = dense_adj(src_gene, dst_disease, num_gene, num_disease)
    adj_d2g = dense_adj(dst_disease, src_gene, num_disease, num_gene)

    num_label_edges = 8
    edge_label_index = jnp.stack([
        jax.random.randint(keys[4], (num_label_edges,), 0, num_disease),  # row 0: disease
        jax.random.randint(keys[5], (num_label_edges,), 0, num_gene),     # row 1: gene
    ])

    params = init_params(keys[6], gene_dim, disease_dim, hidden,
                         num_blocks, num_hidden_layers)

    out = gnn_feedforward_forward(params, x_gene, x_disease, adj_g2d, adj_d2g,
                                  edge_label_index)
    out = jax.block_until_ready(out)
    assert out.shape == (num_label_edges,)
    assert bool(jnp.all(jnp.isfinite(out)))
    print("KERNEL_OK")
</pallas_src>

<mosaic_0001>
module attributes {stable_mosaic.version = 11 : i64} {
  func.func @kernel(%arg0: memref<16x128xbf16, #tpu.memory_space<vmem>>, %arg1: memref<8x128xbf16, #tpu.memory_space<vmem>>, %arg2: memref<8x16xf32, #tpu.memory_space<vmem>>, %arg3: memref<16x8xf32, #tpu.memory_space<vmem>>, %arg4: memref<16x16xbf16, #tpu.memory_space<vmem>>, %arg5: memref<16x8xbf16, #tpu.memory_space<vmem>>, %arg6: memref<2x128x256xbf16, #tpu.memory_space<vmem>>, %arg7: memref<2x128x256xbf16, #tpu.memory_space<vmem>>, %arg8: memref<12x128xf32, #tpu.memory_space<vmem>>, %arg9: memref<5x256x256xbf16, #tpu.memory_space<vmem>>, %arg10: memref<5x256xf32, #tpu.memory_space<vmem>>, %arg11: memref<16x256xf32, #tpu.memory_space<vmem>>) attributes {dimension_semantics = [], scalar_prefetch = 0 : i64, scratch_operands = 0 : i64, tpu.core_type = #tpu.core_type<tc>} {
    %c0 = arith.constant 0 : index
    %c0_0 = arith.constant 0 : index
    %0 = vector.load %arg0[%c0, %c0_0] : memref<16x128xbf16, #tpu.memory_space<vmem>>, vector<16x128xbf16>
    %c0_1 = arith.constant 0 : index
    %c0_2 = arith.constant 0 : index
    %1 = vector.load %arg1[%c0_1, %c0_2] : memref<8x128xbf16, #tpu.memory_space<vmem>>, vector<8x128xbf16>
    %c0_3 = arith.constant 0 : index
    %c0_4 = arith.constant 0 : index
    %2 = vector.load %arg2[%c0_3, %c0_4] : memref<8x16xf32, #tpu.memory_space<vmem>>, vector<8x16xf32>
    %c0_5 = arith.constant 0 : index
    %c0_6 = arith.constant 0 : index
    %3 = vector.load %arg3[%c0_5, %c0_6] : memref<16x8xf32, #tpu.memory_space<vmem>>, vector<16x8xf32>
    %c0_7 = arith.constant 0 : index
    %c0_8 = arith.constant 0 : index
    %c0_9 = arith.constant 0 : index
    %4 = vector.load %arg6[%c0_7, %c0_8, %c0_9] : memref<2x128x256xbf16, #tpu.memory_space<vmem>>, vector<1x128x256xbf16>
    %5 = vector.shape_cast %4 : vector<1x128x256xbf16> to vector<128x256xbf16>
    %cst = arith.constant dense<0.000000e+00> : vector<16x256xf32>
    %6 = tpu.matmul %0, %5, %cst {dimension_numbers = #tpu.dot_dimension_numbers<[1], [0], [0], [1], [0, 0, 1, 1], [], []>} : vector<16x128xbf16>, vector<128x256xbf16>, vector<16x256xf32> -> vector<16x256xf32>
    %c0_10 = arith.constant 0 : index
    %c0_11 = arith.constant 0 : index
    %c0_12 = arith.constant 0 : index
    %7 = vector.load %arg7[%c0_10, %c0_11, %c0_12] : memref<2x128x256xbf16, #tpu.memory_space<vmem>>, vector<1x128x256xbf16>
    %8 = vector.shape_cast %7 : vector<1x128x256xbf16> to vector<128x256xbf16>
    %cst_13 = arith.constant dense<0.000000e+00> : vector<8x256xf32>
    %9 = tpu.matmul %1, %8, %cst_13 {dimension_numbers = #tpu.dot_dimension_numbers<[1], [0], [0], [1], [0, 0, 1, 1], [], []>} : vector<8x128xbf16>, vector<128x256xbf16>, vector<8x256xf32> -> vector<8x256xf32>
    %10 = vector.extract_strided_slice %6 {offsets = [0, 0], sizes = [16, 128], strides = [1, 1]} : vector<16x256xf32> to vector<16x128xf32>
    %11 = vector.extract_strided_slice %6 {offsets = [0, 128], sizes = [16, 128], strides = [1, 1]} : vector<16x256xf32> to vector<16x128xf32>
    %12 = vector.extract_strided_slice %9 {offsets = [0, 0], sizes = [8, 128], strides = [1, 1]} : vector<8x256xf32> to vector<8x128xf32>
    %13 = vector.extract_strided_slice %9 {offsets = [0, 128], sizes = [8, 128], strides = [1, 1]} : vector<8x256xf32> to vector<8x128xf32>
    %c0_14 = arith.constant 0 : index
    %c0_15 = arith.constant 0 : index
    %14 = vector.load %arg8[%c0_14, %c0_15] : memref<12x128xf32, #tpu.memory_space<vmem>>, vector<1x128xf32>
    %c1 = arith.constant 1 : index
    %c0_16 = arith.constant 0 : index
    %15 = vector.load %arg8[%c1, %c0_16] : memref<12x128xf32, #tpu.memory_space<vmem>>, vector<1x128xf32>
    %c2 = arith.constant 2 : index
    %c0_17 = arith.constant 0 : index
    %16 = vector.load %arg8[%c2, %c0_17] : memref<12x128xf32, #tpu.memory_space<vmem>>, vector<1x128xf32>
    %c3 = arith.constant 3 : index
    %c0_18 = arith.constant 0 : index
    %17 = vector.load %arg8[%c3, %c0_18] : memref<12x128xf32, #tpu.memory_space<vmem>>, vector<1x128xf32>
    %c4 = arith.constant 4 : index
    %c0_19 = arith.constant 0 : index
    %18 = vector.load %arg8[%c4, %c0_19] : memref<12x128xf32, #tpu.memory_space<vmem>>, vector<1x128xf32>
    %c5 = arith.constant 5 : index
    %c0_20 = arith.constant 0 : index
    %19 = vector.load %arg8[%c5, %c0_20] : memref<12x128xf32, #tpu.memory_space<vmem>>, vector<1x128xf32>
    %20 = vector.shape_cast %12 : vector<8x128xf32> to vector<8x1x128xf32>
    %21 = vector.shape_cast %10 : vector<16x128xf32> to vector<1x16x128xf32>
    %22 = vector.broadcast %20 : vector<8x1x128xf32> to vector<8x16x128xf32>
    %23 = vector.broadcast %21 : vector<1x16x128xf32> to vector<8x16x128xf32>
    %24 = arith.addf %22, %23 : vector<8x16x128xf32>
    %cst_21 = arith.constant 2.000000e-01 : f32
    %25 = vector.broadcast %cst_21 : f32 to vector<8x16x128xf32>
    %26 = arith.mulf %25, %24 : vector<8x16x128xf32>
    %27 = arith.maximumf %24, %26 : vector<8x16x128xf32>
    %28 = vector.shape_cast %14 : vector<1x128xf32> to vector<1x1x128xf32>
    %29 = vector.broadcast %28 : vector<1x1x128xf32> to vector<8x16x128xf32>
    %30 = arith.mulf %27, %29 : vector<8x16x128xf32>
    %cst_22 = arith.constant dense<0.000000e+00> : vector<8x16xf32>
    %31 = vector.multi_reduction <add>, %30, %cst_22 [2] : vector<8x16x128xf32> to vector<8x16xf32>
    %32 = arith.addf %31, %2 : vector<8x16xf32>
    %cst_23 = arith.constant dense<0xFF800000> : vector<8xf32>
    %33 = vector.multi_reduction <maximumf>, %32, %cst_23 [1] : vector<8x16xf32> to vector<8xf32>
    %34 = vector.shape_cast %33 : vector<8xf32> to vector<8x1xf32>
    %35 = vector.broadcast %34 : vector<8x1xf32> to vector<8x16xf32>
    %36 = arith.subf %32, %35 : vector<8x16xf32>
    %37 = math.exp %36 : vector<8x16xf32>
    %cst_24 = arith.constant dense<0.000000e+00> : vector<8xf32>
    %38 = vector.multi_reduction <add>, %37, %cst_24 [1] : vector<8x16xf32> to vector<8xf32>
    %39 = vector.shape_cast %38 : vector<8xf32> to vector<8x1xf32>
    %40 = tpu.reciprocal %39 {approx = true} : vector<8x1xf32> -> vector<8x1xf32>
    %41 = vector.broadcast %40 : vector<8x1xf32> to vector<8x16xf32>
    %42 = arith.mulf %37, %41 : vector<8x16xf32>
    %cst_25 = arith.constant -1.000000e+20 : f32
    %43 = vector.broadcast %cst_25 : f32 to vector<8x1xf32>
    %44 = arith.cmpf ogt, %34, %43 : vector<8x1xf32>
    %cst_26 = arith.constant 1.000000e+00 : f32
    %cst_27 = arith.constant 0.000000e+00 : f32
    %45 = vector.broadcast %cst_26 : f32 to vector<8x1xf32>
    %46 = vector.broadcast %cst_27 : f32 to vector<8x1xf32>
    %47 = arith.select %44, %45, %46 : vector<8x1xi1>, vector<8x1xf32>
    %48 = arith.truncf %42 : vector<8x16xf32> to vector<8x16xbf16>
    %49 = arith.truncf %10 : vector<16x128xf32> to vector<16x128xbf16>
    %cst_28 = arith.constant dense<0.000000e+00> : vector<8x128xf32>
    %50 = tpu.matmul %48, %49, %cst_28 {dimension_numbers = #tpu.dot_dimension_numbers<[1], [0], [0], [1], [0, 0, 1, 1], [], []>} : vector<8x16xbf16>, vector<16x128xbf16>, vector<8x128xf32> -> vector<8x128xf32>
    %51 = vector.broadcast %47 : vector<8x1xf32> to vector<8x128xf32>
    %52 = arith.mulf %50, %51 : vector<8x128xf32>
    %53 = vector.shape_cast %11 : vector<16x128xf32> to vector<16x1x128xf32>
    %54 = vector.shape_cast %13 : vector<8x128xf32> to vector<1x8x128xf32>
    %55 = vector.broadcast %53 : vector<16x1x128xf32> to vector<16x8x128xf32>
    %56 = vector.broadcast %54 : vector<1x8x128xf32> to vector<16x8x128xf32>
    %57 = arith.addf %55, %56 : vector<16x8x128xf32>
    %cst_29 = arith.constant 2.000000e-01 : f32
    %58 = vector.broadcast %cst_29 : f32 to vector<16x8x128xf32>
    %59 = arith.mulf %58, %57 : vector<16x8x128xf32>
    %60 = arith.maximumf %57, %59 : vector<16x8x128xf32>
    %61 = vector.shape_cast %15 : vector<1x128xf32> to vector<1x1x128xf32>
    %62 = vector.broadcast %61 : vector<1x1x128xf32> to vector<16x8x128xf32>
    %63 = arith.mulf %60, %62 : vector<16x8x128xf32>
    %cst_30 = arith.constant dense<0.000000e+00> : vector<16x8xf32>
    %64 = vector.multi_reduction <add>, %63, %cst_30 [2] : vector<16x8x128xf32> to vector<16x8xf32>
    %65 = arith.addf %64, %3 : vector<16x8xf32>
    %cst_31 = arith.constant dense<0xFF800000> : vector<16xf32>
    %66 = vector.multi_reduction <maximumf>, %65, %cst_31 [1] : vector<16x8xf32> to vector<16xf32>
    %67 = vector.shape_cast %66 : vector<16xf32> to vector<16x1xf32>
    %68 = vector.broadcast %67 : vector<16x1xf32> to vector<16x8xf32>
    %69 = arith.subf %65, %68 : vector<16x8xf32>
    %70 = math.exp %69 : vector<16x8xf32>
    %cst_32 = arith.constant dense<0.000000e+00> : vector<16xf32>
    %71 = vector.multi_reduction <add>, %70, %cst_32 [1] : vector<16x8xf32> to vector<16xf32>
    %72 = vector.shape_cast %71 : vector<16xf32> to vector<16x1xf32>
    %73 = tpu.reciprocal %72 {approx = true} : vector<16x1xf32> -> vector<16x1xf32>
    %74 = vector.broadcast %73 : vector<16x1xf32> to vector<16x8xf32>
    %75 = arith.mulf %70, %74 : vector<16x8xf32>
    %cst_33 = arith.constant -1.000000e+20 : f32
    %76 = vector.broadcast %cst_33 : f32 to vector<16x1xf32>
    %77 = arith.cmpf ogt, %67, %76 : vector<16x1xf32>
    %cst_34 = arith.constant 1.000000e+00 : f32
    %cst_35 = arith.constant 0.000000e+00 : f32
    %78 = vector.broadcast %cst_34 : f32 to vector<16x1xf32>
    %79 = vector.broadcast %cst_35 : f32 to vector<16x1xf32>
    %80 = arith.select %77, %78, %79 : vector<16x1xi1>, vector<16x1xf32>
    %81 = arith.truncf %75 : vector<16x8xf32> to vector<16x8xbf16>
    %82 = arith.truncf %13 : vector<8x128xf32> to vector<8x128xbf16>
    %cst_36 = arith.constant dense<0.000000e+00> : vector<16x128xf32>
    %83 = tpu.matmul %81, %82, %cst_36 {dimension_numbers = #tpu.dot_dimension_numbers<[1], [0], [0], [1], [0, 0, 1, 1], [], []>} : vector<16x8xbf16>, vector<8x128xbf16>, vector<16x128xf32> -> vector<16x128xf32>
    %84 = vector.broadcast %80 : vector<16x1xf32> to vector<16x128xf32>
    %85 = arith.mulf %83, %84 : vector<16x128xf32>
    %86 = vector.broadcast %16 : vector<1x128xf32> to vector<8x128xf32>
    %87 = arith.mulf %52, %86 : vector<8x128xf32>
    %88 = vector.broadcast %17 : vector<1x128xf32> to vector<8x128xf32>
    %89 = arith.addf %87, %88 : vector<8x128xf32>
    %cst_37 = arith.constant 0.000000e+00 : f32
    %90 = vector.broadcast %cst_37 : f32 to vector<8x128xf32>
    %91 = arith.maximumf %89, %90 : vector<8x128xf32>
    %92 = arith.truncf %91 : vector<8x128xf32> to vector<8x128xbf16>
    %93 = vector.broadcast %18 : vector<1x128xf32> to vector<16x128xf32>
    %94 = arith.mulf %85, %93 : vector<16x128xf32>
    %95 = vector.broadcast %19 : vector<1x128xf32> to vector<16x128xf32>
    %96 = arith.addf %94, %95 : vector<16x128xf32>
    %cst_38 = arith.constant 0.000000e+00 : f32
    %97 = vector.broadcast %cst_38 : f32 to vector<16x128xf32>
    %98 = arith.maximumf %96, %97 : vector<16x128xf32>
    %99 = arith.truncf %98 : vector<16x128xf32> to vector<16x128xbf16>
    %c1_39 = arith.constant 1 : index
    %c0_40 = arith.constant 0 : index
    %c0_41 = arith.constant 0 : index
    %100 = vector.load %arg6[%c1_39, %c0_40, %c0_41] : memref<2x128x256xbf16, #tpu.memory_space<vmem>>, vector<1x128x256xbf16>
    %101 = vector.shape_cast %100 : vector<1x128x256xbf16> to vector<128x256xbf16>
    %cst_42 = arith.constant dense<0.000000e+00> : vector<16x256xf32>
    %102 = tpu.matmul %99, %101, %cst_42 {dimension_numbers = #tpu.dot_dimension_numbers<[1], [0], [0], [1], [0, 0, 1, 1], [], []>} : vector<16x128xbf16>, vector<128x256xbf16>, vector<16x256xf32> -> vector<16x256xf32>
    %c1_43 = arith.constant 1 : index
    %c0_44 = arith.constant 0 : index
    %c0_45 = arith.constant 0 : index
    %103 = vector.load %arg7[%c1_43, %c0_44, %c0_45] : memref<2x128x256xbf16, #tpu.memory_space<vmem>>, vector<1x128x256xbf16>
    %104 = vector.shape_cast %103 : vector<1x128x256xbf16> to vector<128x256xbf16>
    %cst_46 = arith.constant dense<0.000000e+00> : vector<8x256xf32>
    %105 = tpu.matmul %92, %104, %cst_46 {dimension_numbers = #tpu.dot_dimension_numbers<[1], [0], [0], [1], [0, 0, 1, 1], [], []>} : vector<8x128xbf16>, vector<128x256xbf16>, vector<8x256xf32> -> vector<8x256xf32>
    %106 = vector.extract_strided_slice %102 {offsets = [0, 0], sizes = [16, 128], strides = [1, 1]} : vector<16x256xf32> to vector<16x128xf32>
    %107 = vector.extract_strided_slice %102 {offsets = [0, 128], sizes = [16, 128], strides = [1, 1]} : vector<16x256xf32> to vector<16x128xf32>
    %108 = vector.extract_strided_slice %105 {offsets = [0, 0], sizes = [8, 128], strides = [1, 1]} : vector<8x256xf32> to vector<8x128xf32>
    %109 = vector.extract_strided_slice %105 {offsets = [0, 128], sizes = [8, 128], strides = [1, 1]} : vector<8x256xf32> to vector<8x128xf32>
    %c6 = arith.constant 6 : index
    %c0_47 = arith.constant 0 : index
    %110 = vector.load %arg8[%c6, %c0_47] : memref<12x128xf32, #tpu.memory_space<vmem>>, vector<1x128xf32>
    %c7 = arith.constant 7 : index
    %c0_48 = arith.constant 0 : index
    %111 = vector.load %arg8[%c7, %c0_48] : memref<12x128xf32, #tpu.memory_space<vmem>>, vector<1x128xf32>
    %c8 = arith.constant 8 : index
    %c0_49 = arith.constant 0 : index
    %112 = vector.load %arg8[%c8, %c0_49] : memref<12x128xf32, #tpu.memory_space<vmem>>, vector<1x128xf32>
    %c9 = arith.constant 9 : index
    %c0_50 = arith.constant 0 : index
    %113 = vector.load %arg8[%c9, %c0_50] : memref<12x128xf32, #tpu.memory_space<vmem>>, vector<1x128xf32>
    %c10 = arith.constant 10 : index
    %c0_51 = arith.constant 0 : index
    %114 = vector.load %arg8[%c10, %c0_51] : memref<12x128xf32, #tpu.memory_space<vmem>>, vector<1x128xf32>
    %c11 = arith.constant 11 : index
    %c0_52 = arith.constant 0 : index
    %115 = vector.load %arg8[%c11, %c0_52] : memref<12x128xf32, #tpu.memory_space<vmem>>, vector<1x128xf32>
    %116 = vector.shape_cast %108 : vector<8x128xf32> to vector<8x1x128xf32>
    %117 = vector.shape_cast %106 : vector<16x128xf32> to vector<1x16x128xf32>
    %118 = vector.broadcast %116 : vector<8x1x128xf32> to vector<8x16x128xf32>
    %119 = vector.broadcast %117 : vector<1x16x128xf32> to vector<8x16x128xf32>
    %120 = arith.addf %118, %119 : vector<8x16x128xf32>
    %cst_53 = arith.constant 2.000000e-01 : f32
    %121 = vector.broadcast %cst_53 : f32 to vector<8x16x128xf32>
    %122 = arith.mulf %121, %120 : vector<8x16x128xf32>
    %123 = arith.maximumf %120, %122 : vector<8x16x128xf32>
    %124 = vector.shape_cast %110 : vector<1x128xf32> to vector<1x1x128xf32>
    %125 = vector.broadcast %124 : vector<1x1x128xf32> to vector<8x16x128xf32>
    %126 = arith.mulf %123, %125 : vector<8x16x128xf32>
    %cst_54 = arith.constant dense<0.000000e+00> : vector<8x16xf32>
    %127 = vector.multi_reduction <add>, %126, %cst_54 [2] : vector<8x16x128xf32> to vector<8x16xf32>
    %128 = arith.addf %127, %2 : vector<8x16xf32>
    %cst_55 = arith.constant dense<0xFF800000> : vector<8xf32>
    %129 = vector.multi_reduction <maximumf>, %128, %cst_55 [1] : vector<8x16xf32> to vector<8xf32>
    %130 = vector.shape_cast %129 : vector<8xf32> to vector<8x1xf32>
    %131 = vector.broadcast %130 : vector<8x1xf32> to vector<8x16xf32>
    %132 = arith.subf %128, %131 : vector<8x16xf32>
    %133 = math.exp %132 : vector<8x16xf32>
    %cst_56 = arith.constant dense<0.000000e+00> : vector<8xf32>
    %134 = vector.multi_reduction <add>, %133, %cst_56 [1] : vector<8x16xf32> to vector<8xf32>
    %135 = vector.shape_cast %134 : vector<8xf32> to vector<8x1xf32>
    %136 = tpu.reciprocal %135 {approx = true} : vector<8x1xf32> -> vector<8x1xf32>
    %137 = vector.broadcast %136 : vector<8x1xf32> to vector<8x16xf32>
    %138 = arith.mulf %133, %137 : vector<8x16xf32>
    %cst_57 = arith.constant -1.000000e+20 : f32
    %139 = vector.broadcast %cst_57 : f32 to vector<8x1xf32>
    %140 = arith.cmpf ogt, %130, %139 : vector<8x1xf32>
    %cst_58 = arith.constant 1.000000e+00 : f32
    %cst_59 = arith.constant 0.000000e+00 : f32
    %141 = vector.broadcast %cst_58 : f32 to vector<8x1xf32>
    %142 = vector.broadcast %cst_59 : f32 to vector<8x1xf32>
    %143 = arith.select %140, %141, %142 : vector<8x1xi1>, vector<8x1xf32>
    %144 = arith.truncf %138 : vector<8x16xf32> to vector<8x16xbf16>
    %145 = arith.truncf %106 : vector<16x128xf32> to vector<16x128xbf16>
    %cst_60 = arith.constant dense<0.000000e+00> : vector<8x128xf32>
    %146 = tpu.matmul %144, %145, %cst_60 {dimension_numbers = #tpu.dot_dimension_numbers<[1], [0], [0], [1], [0, 0, 1, 1], [], []>} : vector<8x16xbf16>, vector<16x128xbf16>, vector<8x128xf32> -> vector<8x128xf32>
    %147 = vector.broadcast %143 : vector<8x1xf32> to vector<8x128xf32>
    %148 = arith.mulf %146, %147 : vector<8x128xf32>
    %149 = vector.shape_cast %107 : vector<16x128xf32> to vector<16x1x128xf32>
    %150 = vector.shape_cast %109 : vector<8x128xf32> to vector<1x8x128xf32>
    %151 = vector.broadcast %149 : vector<16x1x128xf32> to vector<16x8x128xf32>
    %152 = vector.broadcast %150 : vector<1x8x128xf32> to vector<16x8x128xf32>
    %153 = arith.addf %151, %152 : vector<16x8x128xf32>
    %cst_61 = arith.constant 2.000000e-01 : f32
    %154 = vector.broadcast %cst_61 : f32 to vector<16x8x128xf32>
    %155 = arith.mulf %154, %153 : vector<16x8x128xf32>
    %156 = arith.maximumf %153, %155 : vector<16x8x128xf32>
    %157 = vector.shape_cast %111 : vector<1x128xf32> to vector<1x1x128xf32>
    %158 = vector.broadcast %157 : vector<1x1x128xf32> to vector<16x8x128xf32>
    %159 = arith.mulf %156, %158 : vector<16x8x128xf32>
    %cst_62 = arith.constant dense<0.000000e+00> : vector<16x8xf32>
    %160 = vector.multi_reduction <add>, %159, %cst_62 [2] : vector<16x8x128xf32> to vector<16x8xf32>
    %161 = arith.addf %160, %3 : vector<16x8xf32>
    %cst_63 = arith.constant dense<0xFF800000> : vector<16xf32>
    %162 = vector.multi_reduction <maximumf>, %161, %cst_63 [1] : vector<16x8xf32> to vector<16xf32>
    %163 = vector.shape_cast %162 : vector<16xf32> to vector<16x1xf32>
    %164 = vector.broadcast %163 : vector<16x1xf32> to vector<16x8xf32>
    %165 = arith.subf %161, %164 : vector<16x8xf32>
    %166 = math.exp %165 : vector<16x8xf32>
    %cst_64 = arith.constant dense<0.000000e+00> : vector<16xf32>
    %167 = vector.multi_reduction <add>, %166, %cst_64 [1] : vector<16x8xf32> to vector<16xf32>
    %168 = vector.shape_cast %167 : vector<16xf32> to vector<16x1xf32>
    %169 = tpu.reciprocal %168 {approx = true} : vector<16x1xf32> -> vector<16x1xf32>
    %170 = vector.broadcast %169 : vector<16x1xf32> to vector<16x8xf32>
    %171 = arith.mulf %166, %170 : vector<16x8xf32>
    %cst_65 = arith.constant -1.000000e+20 : f32
    %172 = vector.broadcast %cst_65 : f32 to vector<16x1xf32>
    %173 = arith.cmpf ogt, %163, %172 : vector<16x1xf32>
    %cst_66 = arith.constant 1.000000e+00 : f32
    %cst_67 = arith.constant 0.000000e+00 : f32
    %174 = vector.broadcast %cst_66 : f32 to vector<16x1xf32>
    %175 = vector.broadcast %cst_67 : f32 to vector<16x1xf32>
    %176 = arith.select %173, %174, %175 : vector<16x1xi1>, vector<16x1xf32>
    %177 = arith.truncf %171 : vector<16x8xf32> to vector<16x8xbf16>
    %178 = arith.truncf %109 : vector<8x128xf32> to vector<8x128xbf16>
    %cst_68 = arith.constant dense<0.000000e+00> : vector<16x128xf32>
    %179 = tpu.matmul %177, %178, %cst_68 {dimension_numbers = #tpu.dot_dimension_numbers<[1], [0], [0], [1], [0, 0, 1, 1], [], []>} : vector<16x8xbf16>, vector<8x128xbf16>, vector<16x128xf32> -> vector<16x128xf32>
    %180 = vector.broadcast %176 : vector<16x1xf32> to vector<16x128xf32>
    %181 = arith.mulf %179, %180 : vector<16x128xf32>
    %182 = vector.broadcast %112 : vector<1x128xf32> to vector<8x128xf32>
    %183 = arith.mulf %148, %182 : vector<8x128xf32>
    %184 = vector.broadcast %113 : vector<1x128xf32> to vector<8x128xf32>
    %185 = arith.addf %183, %184 : vector<8x128xf32>
    %cst_69 = arith.constant 0.000000e+00 : f32
    %186 = vector.broadcast %cst_69 : f32 to vector<8x128xf32>
    %187 = arith.maximumf %185, %186 : vector<8x128xf32>
    %188 = arith.truncf %187 : vector<8x128xf32> to vector<8x128xbf16>
    %189 = vector.broadcast %114 : vector<1x128xf32> to vector<16x128xf32>
    %190 = arith.mulf %181, %189 : vector<16x128xf32>
    %191 = vector.broadcast %115 : vector<1x128xf32> to vector<16x128xf32>
    %192 = arith.addf %190, %191 : vector<16x128xf32>
    %cst_70 = arith.constant 0.000000e+00 : f32
    %193 = vector.broadcast %cst_70 : f32 to vector<16x128xf32>
    %194 = arith.maximumf %192, %193 : vector<16x128xf32>
    %195 = arith.truncf %194 : vector<16x128xf32> to vector<16x128xbf16>
    %c0_71 = arith.constant 0 : index
    %c0_72 = arith.constant 0 : index
    %196 = vector.load %arg4[%c0_71, %c0_72] : memref<16x16xbf16, #tpu.memory_space<vmem>>, vector<16x16xbf16>
    %cst_73 = arith.constant dense<0.000000e+00> : vector<16x128xf32>
    %197 = tpu.matmul %196, %195, %cst_73 {dimension_numbers = #tpu.dot_dimension_numbers<[1], [0], [0], [1], [0, 0, 1, 1], [], []>} : vector<16x16xbf16>, vector<16x128xbf16>, vector<16x128xf32> -> vector<16x128xf32>
    %c0_74 = arith.constant 0 : index
    %c0_75 = arith.constant 0 : index
    %198 = vector.load %arg5[%c0_74, %c0_75] : memref<16x8xbf16, #tpu.memory_space<vmem>>, vector<16x8xbf16>
    %cst_76 = arith.constant dense<0.000000e+00> : vector<16x128xf32>
    %199 = tpu.matmul %198, %188, %cst_76 {dimension_numbers = #tpu.dot_dimension_numbers<[1], [0], [0], [1], [0, 0, 1, 1], [], []>} : vector<16x8xbf16>, vector<8x128xbf16>, vector<16x128xf32> -> vector<16x128xf32>
    %200 = tpu.concatenate %197, %199 in 1 : vector<16x128xf32>, vector<16x128xf32> -> vector<16x256xf32>
    %c0_77 = arith.constant 0 : index
    %c0_78 = arith.constant 0 : index
    %c0_79 = arith.constant 0 : index
    %201 = vector.load %arg9[%c0_77, %c0_78, %c0_79] : memref<5x256x256xbf16, #tpu.memory_space<vmem>>, vector<1x256x256xbf16>
    %202 = vector.shape_cast %201 : vector<1x256x256xbf16> to vector<256x256xbf16>
    %c0_80 = arith.constant 0 : index
    %c0_81 = arith.constant 0 : index
    %203 = vector.load %arg10[%c0_80, %c0_81] : memref<5x256xf32, #tpu.memory_space<vmem>>, vector<1x256xf32>
    %204 = arith.truncf %200 : vector<16x256xf32> to vector<16x256xbf16>
    %cst_82 = arith.constant dense<0.000000e+00> : vector<16x256xf32>
    %205 = tpu.matmul %204, %202, %cst_82 {dimension_numbers = #tpu.dot_dimension_numbers<[1], [0], [0], [1], [0, 0, 1, 1], [], []>} : vector<16x256xbf16>, vector<256x256xbf16>, vector<16x256xf32> -> vector<16x256xf32>
    %206 = vector.broadcast %203 : vector<1x256xf32> to vector<16x256xf32>
    %207 = arith.addf %205, %206 : vector<16x256xf32>
    %cst_83 = arith.constant 0.000000e+00 : f32
    %208 = vector.broadcast %cst_83 : f32 to vector<16x256xf32>
    %209 = arith.maximumf %207, %208 : vector<16x256xf32>
    %c1_84 = arith.constant 1 : index
    %c0_85 = arith.constant 0 : index
    %c0_86 = arith.constant 0 : index
    %210 = vector.load %arg9[%c1_84, %c0_85, %c0_86] : memref<5x256x256xbf16, #tpu.memory_space<vmem>>, vector<1x256x256xbf16>
    %211 = vector.shape_cast %210 : vector<1x256x256xbf16> to vector<256x256xbf16>
    %c1_87 = arith.constant 1 : index
    %c0_88 = arith.constant 0 : index
    %212 = vector.load %arg10[%c1_87, %c0_88] : memref<5x256xf32, #tpu.memory_space<vmem>>, vector<1x256xf32>
    %213 = arith.truncf %209 : vector<16x256xf32> to vector<16x256xbf16>
    %cst_89 = arith.constant dense<0.000000e+00> : vector<16x256xf32>
    %214 = tpu.matmul %213, %211, %cst_89 {dimension_numbers = #tpu.dot_dimension_numbers<[1], [0], [0], [1], [0, 0, 1, 1], [], []>} : vector<16x256xbf16>, vector<256x256xbf16>, vector<16x256xf32> -> vector<16x256xf32>
    %215 = vector.broadcast %212 : vector<1x256xf32> to vector<16x256xf32>
    %216 = arith.addf %214, %215 : vector<16x256xf32>
    %cst_90 = arith.constant 0.000000e+00 : f32
    %217 = vector.broadcast %cst_90 : f32 to vector<16x256xf32>
    %218 = arith.maximumf %216, %217 : vector<16x256xf32>
    %c2_91 = arith.constant 2 : index
    %c0_92 = arith.constant 0 : index
    %c0_93 = arith.constant 0 : index
    %219 = vector.load %arg9[%c2_91, %c0_92, %c0_93] : memref<5x256x256xbf16, #tpu.memory_space<vmem>>, vector<1x256x256xbf16>
    %220 = vector.shape_cast %219 : vector<1x256x256xbf16> to vector<256x256xbf16>
    %c2_94 = arith.constant 2 : index
    %c0_95 = arith.constant 0 : index
    %221 = vector.load %arg10[%c2_94, %c0_95] : memref<5x256xf32, #tpu.memory_space<vmem>>, vector<1x256xf32>
    %222 = arith.truncf %218 : vector<16x256xf32> to vector<16x256xbf16>
    %cst_96 = arith.constant dense<0.000000e+00> : vector<16x256xf32>
    %223 = tpu.matmul %222, %220, %cst_96 {dimension_numbers = #tpu.dot_dimension_numbers<[1], [0], [0], [1], [0, 0, 1, 1], [], []>} : vector<16x256xbf16>, vector<256x256xbf16>, vector<16x256xf32> -> vector<16x256xf32>
    %224 = vector.broadcast %221 : vector<1x256xf32> to vector<16x256xf32>
    %225 = arith.addf %223, %224 : vector<16x256xf32>
    %cst_97 = arith.constant 0.000000e+00 : f32
    %226 = vector.broadcast %cst_97 : f32 to vector<16x256xf32>
    %227 = arith.maximumf %225, %226 : vector<16x256xf32>
    %c3_98 = arith.constant 3 : index
    %c0_99 = arith.constant 0 : index
    %c0_100 = arith.constant 0 : index
    %228 = vector.load %arg9[%c3_98, %c0_99, %c0_100] : memref<5x256x256xbf16, #tpu.memory_space<vmem>>, vector<1x256x256xbf16>
    %229 = vector.shape_cast %228 : vector<1x256x256xbf16> to vector<256x256xbf16>
    %c3_101 = arith.constant 3 : index
    %c0_102 = arith.constant 0 : index
    %230 = vector.load %arg10[%c3_101, %c0_102] : memref<5x256xf32, #tpu.memory_space<vmem>>, vector<1x256xf32>
    %231 = arith.truncf %227 : vector<16x256xf32> to vector<16x256xbf16>
    %cst_103 = arith.constant dense<0.000000e+00> : vector<16x256xf32>
    %232 = tpu.matmul %231, %229, %cst_103 {dimension_numbers = #tpu.dot_dimension_numbers<[1], [0], [0], [1], [0, 0, 1, 1], [], []>} : vector<16x256xbf16>, vector<256x256xbf16>, vector<16x256xf32> -> vector<16x256xf32>
    %233 = vector.broadcast %230 : vector<1x256xf32> to vector<16x256xf32>
    %234 = arith.addf %232, %233 : vector<16x256xf32>
    %cst_104 = arith.constant 0.000000e+00 : f32
    %235 = vector.broadcast %cst_104 : f32 to vector<16x256xf32>
    %236 = arith.maximumf %234, %235 : vector<16x256xf32>
    %c4_105 = arith.constant 4 : index
    %c0_106 = arith.constant 0 : index
    %c0_107 = arith.constant 0 : index
    %237 = vector.load %arg9[%c4_105, %c0_106, %c0_107] : memref<5x256x256xbf16, #tpu.memory_space<vmem>>, vector<1x256x256xbf16>
    %238 = vector.shape_cast %237 : vector<1x256x256xbf16> to vector<256x256xbf16>
    %c4_108 = arith.constant 4 : index
    %c0_109 = arith.constant 0 : index
    %239 = vector.load %arg10[%c4_108, %c0_109] : memref<5x256xf32, #tpu.memory_space<vmem>>, vector<1x256xf32>
    %240 = arith.truncf %236 : vector<16x256xf32> to vector<16x256xbf16>
    %cst_110 = arith.constant dense<0.000000e+00> : vector<16x256xf32>
    %241 = tpu.matmul %240, %238, %cst_110 {dimension_numbers = #tpu.dot_dimension_numbers<[1], [0], [0], [1], [0, 0, 1, 1], [], []>} : vector<16x256xbf16>, vector<256x256xbf16>, vector<16x256xf32> -> vector<16x256xf32>
    %242 = vector.broadcast %239 : vector<1x256xf32> to vector<16x256xf32>
    %243 = arith.addf %241, %242 : vector<16x256xf32>
    %c0_111 = arith.constant 0 : index
    %c0_112 = arith.constant 0 : index
    %244 = vector.load %arg11[%c0_111, %c0_112] : memref<16x256xf32, #tpu.memory_space<vmem>>, vector<16x256xf32>
    tpu.vector_store %arg11[%c0_111, %c0_112], %243 {strides = array<i32>} : memref<16x256xf32, #tpu.memory_space<vmem>>, vector<16x256xf32>,
    return
  }
}

</mosaic_0001>

<bundles_post_ra>
// kernel: tpu_custom_call.1
= control target key start
LH: loop header
LB: loop body
LE: loop exit
PB: predicated region body
PF: predicated region fallthrough
CT: control target
= control target key end

     0   :  { %16 = vsyncpa [#allocation3], 0  ;;  %s9262_s0 = inlined_call_operand.hbm [shape: bf16[16,128], index: 0, kind: input, shape index: {}]   ;;  %s9263_s1 = inlined_call_operand.hbm [shape: bf16[8,128], index: 1, kind: input, shape index: {}]   ;;  %s9264_s2 = inlined_call_operand.vmem [shape: f32[8,16], index: 2, kind: input, shape index: {}]   ;;  %s9265_s3 = inlined_call_operand.vmem [shape: f32[16,8], index: 3, kind: input, shape index: {}]   ;;  %s9266_s4 = inlined_call_operand.vmem [shape: bf16[16,16], index: 4, kind: input, shape index: {}]   ;;  %s9267_s5 = inlined_call_operand.vmem [shape: bf16[16,8], index: 5, kind: input, shape index: {}]   ;;  %s9268_s6 = inlined_call_operand.hbm [shape: bf16[2,128,256], index: 6, kind: input, shape index: {}]   ;;  %s9269_s7 = inlined_call_operand.hbm [shape: bf16[2,128,256], index: 7, kind: input, shape index: {}]   ;;  %s9270_s8 = inlined_call_operand.vmem [shape: f32[12,128], index: 8, kind: input, shape index: {}]   ;;  %s9271_s9 = inlined_call_operand.hbm [shape: bf16[5,256,256], index: 9, kind: input, shape index: {}]   ;;  %s9272_s10 = inlined_call_operand.vmem [shape: f32[5,256], index: 10, kind: input, shape index: {}]   ;;  %s9273_s11 = inlined_call_operand.hbm [shape: f32[16,256], index: 11, kind: output, shape index: {}]  }
   0x1   :  { %17 = vsyncpa [#allocation6], 0 }
   0x2   :  { %18 = vsyncpa [#allocation9], 0 }
   0x3   :  { %19 = vsyncpa [#allocation4], 0  ;;  %s7136_s17 = smov [#allocation5]   ;;  %s6996_s21 = scalar_lea.hbm %s9263_s1, 64 }
   0x4   :  { %s38_s18 = sshll.u32 %s7136_s17, 4  ;;  %p6997_p0 = scmp.ne.s32.totalorder %s9263_s1, %s6996_s21  ;;  %s39_s18 = int_to_ptr.vmem [resolvable:$true] %s38_s18 }
   0x5   :  { %p7000_p1 = scmp.lt.u32.totalorder %s6996_s21, %s9263_s1 }
   0x7   :  { %p7002_p2 = pnand %p7000_p1, %p6997_p0 }
   0x9   :  { %7005 = shalt.err (!%p7002_p2)
}
   0xa   :  { %s7006_s26 = scalar_lea.vmem %s39_s18, 64  ;;  %p7011_p4 = scmp.lt.s32.totalorder %s39_s18, %s39_s18 }
   0xb   :  { %p7007_p3 = scmp.ne.s32.totalorder %s39_s18, %s7006_s26  ;;  %p7012_p5 = scmp.lt.s32.totalorder %s7006_s26, %s7006_s26 }
   0xd   :  { %p7013_p6 = por %p7012_p5, %p7011_p4 }
   0xf   :  { %p7014_p7 = pnand %p7013_p6, %p7007_p3 }
  0x11   :  { %7017 = shalt.err (!%p7014_p7)
}
  0x12   :  { %41 = dma.hbm_to_vmem [thread:$0]  %s9263_s1, 64, %s39_s18, [#allocation6]  }
  0x13   :  { %s7137_s29 = smov [#allocation8]   ;;  %s7138_s12 = smov [#allocation2]  }
  0x14   :  { %s67_s30 = sshll.u32 %s7137_s29, 4  ;;  %s25_s13 = sshll.u32 %s7138_s12, 4  ;;  %s68_s30 = int_to_ptr.vmem [resolvable:$true] %s67_s30  ;;  %s26_s13 = int_to_ptr.vmem [resolvable:$true] %s25_s13 }
  0x15   :  { %s7018_s16 = scalar_lea.hbm %s9269_s7, 4096 }
  0x16   :  { %p7019_p8 = scmp.ne.s32.totalorder %s9269_s7, %s7018_s16  ;;  %p7022_p9 = scmp.lt.u32.totalorder %s7018_s16, %s9269_s7 }
  0x18   :  { %p7024_p10 = pnand %p7022_p9, %p7019_p8 }
  0x1a   :  { %7027 = shalt.err (!%p7024_p10)
}
  0x1b   :  { %s7028_s1 = scalar_lea.vmem %s68_s30, 4096  ;;  %p7033_p12 = scmp.lt.s32.totalorder %s68_s30, %s68_s30 }
  0x1c   :  { %p7029_p11 = scmp.ne.s32.totalorder %s68_s30, %s7028_s1  ;;  %p7034_p13 = scmp.lt.s32.totalorder %s7028_s1, %s7028_s1 }
  0x1e   :  { %p7035_p0 = por %p7034_p13, %p7033_p12 }
  0x20   :  { %p7036_p1 = pnand %p7035_p0, %p7029_p11 }
  0x22   :  { %7039 = shalt.err (!%p7036_p1)
}
  0x23   :  { %s7139_s18 = smov 128   ;;  %s7140_s22 = smov 8  }
  0x24   :  { %73 = dma.hbm_to_vmem [thread:$0]  %s9269_s7, 4096, %s68_s30, [#allocation9], %s7139_s18, %s7139_s18, %s7140_s22  }
  0x25   :  { %s7040_s27 = scalar_lea.hbm %s9262_s0, 128 }
  0x26   :  { %p7041_p2 = scmp.ne.s32.totalorder %s9262_s0, %s7040_s27  ;;  %p7044_p3 = scmp.lt.u32.totalorder %s7040_s27, %s9262_s0 }
  0x28   :  { %p7046_p4 = pnand %p7044_p3, %p7041_p2 }
  0x2a   :  { %7049 = shalt.err (!%p7046_p4)
}
  0x2b   :  { %s7050_s15 = scalar_lea.vmem %s26_s13, 128  ;;  %p7055_p6 = scmp.lt.s32.totalorder %s26_s13, %s26_s13 }
  0x2c   :  { %p7051_p5 = scmp.ne.s32.totalorder %s26_s13, %s7050_s15  ;;  %p7056_p7 = scmp.lt.s32.totalorder %s7050_s15, %s7050_s15 }
  0x2e   :  { %p7057_p8 = por %p7056_p7, %p7055_p6 }
  0x30   :  { %p7058_p9 = pnand %p7057_p8, %p7051_p5 }
  0x32   :  { %7061 = shalt.err (!%p7058_p9)
}
  0x33   :  { %s7141_s7 = smov 64   ;;  %s7142_s30 = smov 4  }
  0x34   :  { %31 = dma.hbm_to_vmem [thread:$0]  %s9262_s0, 128, %s26_s13, [#allocation3], %s7141_s7, %s7141_s7, %s7142_s30  }
  0x35   :  { %s7143_s19 = smov [#allocation7]   ;;  %s7144_s21 = smov [#allocation10]  }
  0x36   :  { %s55_s20 = sshll.u32 %s7143_s19, 4  ;;  %s81_s1 = sshll.u32 %s7144_s21, 4  ;;  %s56_s20 = int_to_ptr.vmem [resolvable:$true] %s55_s20  ;;  %s82_s1 = int_to_ptr.vmem [resolvable:$true] %s81_s1 }
  0x37   :  { %s7062_s25 = scalar_lea.hbm %s9268_s6, 4096 }
  0x38   :  { %p7063_p10 = scmp.ne.s32.totalorder %s9268_s6, %s7062_s25  ;;  %p7066_p11 = scmp.lt.u32.totalorder %s7062_s25, %s9268_s6 }
  0x3a   :  { %p7068_p12 = pnand %p7066_p11, %p7063_p10 }
  0x3c   :  { %7071 = shalt.err (!%p7068_p12)
}
  0x3d   :  { %s7072_s0 = scalar_lea.vmem %s56_s20, 4096  ;;  %p7077_p0 = scmp.lt.s32.totalorder %s56_s20, %s56_s20 }
  0x3e   :  { %p7073_p13 = scmp.ne.s32.totalorder %s56_s20, %s7072_s0  ;;  %p7078_p1 = scmp.lt.s32.totalorder %s7072_s0, %s7072_s0 }
  0x40   :  { %p7079_p2 = por %p7078_p1, %p7077_p0 }
  0x42   :  { %p7080_p3 = pnand %p7079_p2, %p7073_p13 }
  0x44   :  { %7083 = shalt.err (!%p7080_p3)
}
  0x45   :  { %61 = dma.hbm_to_vmem [thread:$0]  %s9268_s6, 4096, %s56_s20, [#allocation6], %s7139_s18, %s7139_s18, %s7140_s22  }
  0x46   :  { %s7084_s7 = scalar_lea.hbm %s9271_s9, 20480 }
  0x47   :  { %p7085_p4 = scmp.ne.s32.totalorder %s9271_s9, %s7084_s7  ;;  %p7088_p5 = scmp.lt.u32.totalorder %s7084_s7, %s9271_s9 }
  0x49   :  { %p7090_p6 = pnand %p7088_p5, %p7085_p4 }
  0x4b   :  { %7093 = shalt.err (!%p7090_p6)
}
  0x4c   :  { %s7094_s21 = scalar_lea.vmem %s82_s1, 20480  ;;  %p7099_p8 = scmp.lt.s32.totalorder %s82_s1, %s82_s1 }
  0x4d   :  { %p7095_p7 = scmp.ne.s32.totalorder %s82_s1, %s7094_s21  ;;  %p7100_p9 = scmp.lt.s32.totalorder %s7094_s21, %s7094_s21 }
  0x4f   :  { %p7101_p10 = por %p7100_p9, %p7099_p8 }
  0x51   :  { %p7102_p11 = pnand %p7101_p10, %p7095_p7 }
  0x53   :  { %7105 = shalt.err (!%p7102_p11)
}
  0x54   :  { %87 = dma.hbm_to_vmem [thread:$0]  %s9271_s9, 20480, %s82_s1, [#allocation9], %s7139_s18, %s7139_s18, %s7140_s22  }
  0x55   :  { %7128 = dma.done.wait [#allocation3], 128  }
  0x56   :  { %7129 = vsyncadd [#allocation3], 4294967168 }
  0x57   :  { %7130 = dma.done.wait [#allocation6], 4160  }
  0x58   :  { %7131 = vsyncadd [#allocation6], 4294963136 }
  0x59   :  { %7132 = dma.done.wait [#allocation9], 24576  }
  0x5a   :  { %7133 = vsyncadd [#allocation9], 4294942720  ;;  %v9274_v0 = vmov 0   ;;  %v6517_v1 = vld [vmem:[#allocation7 + $0x4] ss:$8 sps:$4 sm:$0xff]   ;;  %v9278_v9 = vlaneseq  ;;  %v7296_v18 = vld [vmem:[%s9264_s2] sm:$0xff] }
  0x5b   :  { %246 = vmatprep.mubr.bf16.mxu1 %v9274_v0  ;;  %6516 = vset.pattern.permute.xlu0 %v9274_v0  ;;  %v6519_v2 = vld [vmem:[#allocation7] ss:$8 sps:$4 sm:$0xff]   ;;  %v6520_v3 = vld [vmem:[#allocation7 + $0x14] ss:$8 sps:$4 sm:$0xff]   ;;  %v6522_v4 = vld [vmem:[#allocation7 + $0x10] ss:$8 sps:$4 sm:$0xff]  }
  0x5c   :  { %6515 = vset.pattern.permute.xlu1 %v9274_v0  ;;  %214 = vmatprep.subr.bf16.mxu1 %v6517_v1  ;;  %v6523_v5 = vld [vmem:[#allocation7 + $0x24] ss:$8 sps:$4 sm:$0xff]   ;;  %v6525_v6 = vld [vmem:[#allocation7 + $0x20] ss:$8 sps:$4 sm:$0xff]   ;;  %v6526_v7 = vld [vmem:[#allocation7 + $0x34] ss:$8 sps:$4 sm:$0xff]  }
  0x5d   :  { %215 = vmatpush1.bf16.msra.mxu1 %v6519_v2  ;;  %v6528_v8 = vld [vmem:[#allocation7 + $0x30] ss:$8 sps:$4 sm:$0xff]   ;;  %v6529_v10 = vld [vmem:[#allocation7 + $0x44] ss:$8 sps:$4 sm:$0xff]   ;;  %v6531_v11 = vld [vmem:[#allocation7 + $0x40] ss:$8 sps:$4 sm:$0xff]  }
  0x5e   :  { %216 = vmatprep.subr.bf16.mxu1 %v6520_v3  ;;  %v7285_v12 = vshrl.u32 %v9278_v9, 7  ;;  %v6532_v13 = vld [vmem:[#allocation7 + $0x54] ss:$8 sps:$4 sm:$0xff]   ;;  %v6534_v14 = vld [vmem:[#allocation7 + $0x50] ss:$8 sps:$4 sm:$0xff]   ;;  %vm2511_vm0 = vcmask 1043456  }
  0x5f   :  { %v6535_v16 = vld [vmem:[#allocation7 + $0x64] ss:$8 sps:$4 sm:$0xff]   ;;  %v6537_v19 = vld [vmem:[#allocation7 + $0x60] ss:$8 sps:$4 sm:$0xff]   ;;  %v6538_v20 = vld [vmem:[#allocation7 + $0x74] ss:$8 sps:$4 sm:$0xff]  }
  0x60   :  { %v7288_v15 = vsub.s32 0, %v7285_v12  ;;  %v7291_v17 = vsub.s32 1, %v7285_v12  ;;  %v7301_v22 = vsub.s32 2, %v7285_v12  ;;  %v6540_v23 = vld [vmem:[#allocation7 + $0x70] ss:$8 sps:$4 sm:$0xff]   ;;  %v7317_v32 = vld [vmem:[%s9265_s3 + $0x8] sm:$0xff] }
  0x61   :  { %217 = vmatpush1.bf16.msra.mxu1 %v6522_v4  ;;  %v6544_v25 = vld [vmem:[#allocation8 + $0x4] ss:$8 sps:$4 sm:$0xff]   ;;  %v7308_v26 = vld [vmem:[%s9265_s3] sm:$0xff]  ;;  %v6542_v29 = vld [vmem:[#allocation8] ss:$8 sps:$4 sm:$0xff]   ;;  %v7323_v36 = vsub.s32 3, %v7285_v12 }
  0x62   :  { %218 = vmatprep.subr.bf16.mxu1 %v6523_v5  ;;  %v594_v21 = vrot.slane %v7296_v18, %v7288_v15  ;;  %v605_v24 = vrot.slane %v7296_v18, %v7291_v17  ;;  %v616_v27 = vrot.slane %v7296_v18, %v7301_v22  ;;  %v6541_v28 = vld [vmem:[#allocation2] sm:$0xff]   ;;  %v1656_v30 = vrot.slane %v7308_v26, %v7288_v15  ;;  %v6550_v35 = vld [vmem:[#allocation8 + $0x24] ss:$8 sps:$4 sm:$0xff]   ;;  %v6548_v37 = vld [vmem:[#allocation8 + $0x20] ss:$8 sps:$4 sm:$0xff]   ;;  %s7149_s12 = smov [#allocation11]  }
  0x63   :  { %v6547_v31 = vld [vmem:[#allocation8 + $0x14] ss:$8 sps:$4 sm:$0xff]   ;;  %v6545_v33 = vld [vmem:[#allocation8 + $0x10] ss:$8 sps:$4 sm:$0xff]   ;;  %v1712_v34 = vrot.slane %v7317_v32, %v7288_v15  ;;  %v1663_v38 = vrot.slane %v7308_v26, %v7291_v17  ;;  %v627_v40 = vrot.slane %v7296_v18, %v7323_v36  ;;  %v1719_v42 = vrot.slane %v7317_v32, %v7291_v17  ;;  %v6556_v44 = vld [vmem:[#allocation8 + $0x44] ss:$8 sps:$4 sm:$0xff]  }
  0x64   :  { %600 = vbcast.lane.b32.xlu1 %v594_v21, 264  ;;  %596 = vbcast.lane.b32.xlu0 %v594_v21, 256  ;;  %v6553_v39 = vld [vmem:[#allocation8 + $0x34] ss:$8 sps:$4 sm:$0xff]   ;;  %v6551_v41 = vld [vmem:[#allocation8 + $0x30] ss:$8 sps:$4 sm:$0xff]   ;;  %v1670_v43 = vrot.slane %v7308_v26, %v7301_v22  ;;  %v1726_v50 = vrot.slane %v7317_v32, %v7301_v22  ;;  %v1677_v51 = vrot.slane %v7308_v26, %v7323_v36 }
  0x65   :  { %219 = vmatpush1.bf16.msra.mxu1 %v6525_v6  ;;  %v7334_v45 = vsub.s32 4, %v7285_v12  ;;  %v6554_v46 = vld [vmem:[#allocation8 + $0x40] ss:$8 sps:$4 sm:$0xff]   ;;  %v6559_v47 = vld [vmem:[#allocation8 + $0x54] ss:$8 sps:$4 sm:$0xff]   ;;  %v7343_v53 = vsub.s32 5, %v7285_v12  ;;  %v1733_v58 = vrot.slane %v7317_v32, %v7323_v36 }
  0x66   :  { %220 = vmatprep.subr.bf16.mxu1 %v6526_v7  ;;  %v6557_v49 = vld [vmem:[#allocation8 + $0x50] ss:$8 sps:$4 sm:$0xff]   ;;  %v6562_v52 = vld [vmem:[#allocation8 + $0x64] ss:$8 sps:$4 sm:$0xff]   ;;  %v6560_v54 = vld [vmem:[#allocation8 + $0x60] ss:$8 sps:$4 sm:$0xff]  }
  0x67   :  { %v638_v48 = vrot.slane %v7296_v18, %v7334_v45  ;;  %v6565_v55 = vld [vmem:[#allocation8 + $0x74] ss:$8 sps:$4 sm:$0xff]   ;;  %v649_v56 = vrot.slane %v7296_v18, %v7343_v53  ;;  %v6563_v57 = vld [vmem:[#allocation8 + $0x70] ss:$8 sps:$4 sm:$0xff]   ;;  %v1684_v59 = vrot.slane %v7308_v26, %v7334_v45  ;;  %v7352_v60 = vsub.s32 6, %v7285_v12  ;;  %s6188_s14 = sshll.u32 %s7149_s12, 4  ;;  %s6189_s14 = int_to_ptr.vmem [resolvable:$true] %s6188_s14 }
  0x68   :  { %607 = vbcast.lane.b32.xlu1 %v605_v24, 256  ;;  %618 = vbcast.lane.b32.xlu0 %v616_v27, 256  ;;  %v108_v61 = vld [vmem:[#allocation5] sm:$0xf]  ;;  %v1740_v63 = vrot.slane %v7317_v32, %v7334_v45  ;;  %v1691_v1 = vrot.slane %v7308_v26, %v7343_v53  ;;  %v7361_v2 = vsub.s32 7, %v7285_v12  ;;  %v1747_v4 = vrot.slane %v7317_v32, %v7343_v53  ;;  %p7111_p13 = scmp.lt.s32.totalorder %s6189_s14, %s6189_s14 }
  0x69   :  { %221 = vmatpush1.bf16.msra.mxu1 %v6528_v8  ;;  %v660_v62 = vrot.slane %v7296_v18, %v7352_v60  ;;  %v1754_v5 = vrot.slane %v7317_v32, %v7352_v60  ;;  %v9276_v6 = vmov 0.0   ;;  %v1698_v8 = vrot.slane %v7308_v26, %v7352_v60 }
  0x6a   :  { %222 = vmatprep.subr.bf16.mxu1 %v6529_v10  ;;  %9377 = vst [vmem:[#allocation16_spill] sm:$0xff] %v7361_v2  ;;  %v671_v3 = vrot.slane %v7296_v18, %v7361_v2  ;;  %6463 = vmatprep.subr.bf16.mxu0 %v9276_v6  ;;  %v1761_v7 = vrot.slane %v7317_v32, %v7361_v2  ;;  %vm851_vm1 = vcmask 1041409   ;;  %vm853_vm2 = vcmask 1042434  }
  0x6b   :  { %v1705_v10 = vrot.slane %v7308_v26, %v7361_v2  ;;  %vm855_vm3 = vcmask 1043459   ;;  %vm857_vm4 = vcmask 1044484   ;;  %vm786_vm5 = vcmask 130112  }
  0x6c   :  { %611 = vbcast.lane.b32.xlu1 %v605_v24, 264  ;;  %1658 = vbcast.lane.b32.xlu0 %v1656_v30, 256  ;;  %vm859_vm6 = vcmask 1045509   ;;  %vm861_vm7 = vcmask 1046534   ;;  %vm863_vm8 = vcmask 1047559   ;;  %vm866_vm9 = vcmask 130048  }
  0x6d   :  { %223 = vmatpush1.bf16.msra.mxu1 %v6531_v11  ;;  %vm1941_vm10 = vcmask 64512   ;;  %vm7148_vm11 = vmmov 0  }
  0x6e   :  { %224 = vmatprep.subr.bf16.mxu1 %v6532_v13 }
  0x70   :  { %622 = vbcast.lane.b32.xlu1 %v616_v27, 264  ;;  %1714 = vbcast.lane.b32.xlu0 %v1712_v34, 256 }
  0x71   :  { %225 = vmatpush1.bf16.msra.mxu1 %v6534_v14 }
  0x72   :  { %226 = vmatprep.subr.bf16.mxu1 %v6535_v16 }
  0x74   :  { %1665 = vbcast.lane.b32.xlu1 %v1663_v38, 256  ;;  %629 = vbcast.lane.b32.xlu0 %v627_v40, 256 }
  0x75   :  { %227 = vmatpush1.bf16.msra.mxu1 %v6537_v19  ;;  %v7147_v19 = vmov 1966171168  }
  0x76   :  { %228 = vmatprep.subr.bf16.mxu1 %v6538_v20  ;;  %v403_v20 = vunpack.c.l.s4 %v7147_v19  ;;  %v7429_v19 = vld [vmem:[%s9270_s8 + $0x1] ss:$0 sm:$0xff] }
  0x78   :  { %1721 = vbcast.lane.b32.xlu1 %v1719_v42, 256  ;;  %1672 = vbcast.lane.b32.xlu0 %v1670_v43, 256  ;;  %v404_v21 = vunpack.c.0.s8 %v403_v20 }
  0x79   :  { %229 = vmatpush1.bf16.msra.mxu1 %v6540_v23 }
  0x7a   :  { %353 = vmatprep.subr.bf16.mxu1 %v6544_v25  ;;  %v7384_v23 = vsub.s32 %v404_v21, %v7285_v12 }
  0x7c   :  { %247 = vmatmul.mubr.bf16.vlgmr.msra.gmra.mrb[0].mxu1 %v6541_v28  ;;  %633 = vbcast.lane.b32.xlu1 %v627_v40, 264  ;;  %9378 = vst [vmem:[#allocation17_spill] sm:$0xff] %v7384_v23 }
  0x7d   :  { %354 = vmatpush1.bf16.msra.mxu1 %v6542_v29  ;;  %385 = vmatprep.mubr.bf16.mxu1 %v9274_v0 }
  0x7e   :  { %355 = vmatprep.subr.bf16.mxu1 %v6547_v31  ;;  %640 = vbcast.lane.b32.xlu0 %v638_v48, 256 }
  0x80   :  { %1728 = vbcast.lane.b32.xlu1 %v1726_v50, 256 }
  0x81   :  { %356 = vmatpush1.bf16.msra.mxu1 %v6545_v33 }
  0x82   :  { %357 = vmatprep.subr.bf16.mxu1 %v6550_v35  ;;  %1679 = vbcast.lane.b32.xlu0 %v1677_v51, 256 }
  0x84   :  { %644 = vbcast.lane.b32.xlu1 %v638_v48, 264 }
  0x85   :  { %358 = vmatpush1.bf16.msra.mxu1 %v6548_v37 }
  0x86   :  { %359 = vmatprep.subr.bf16.mxu1 %v6553_v39  ;;  %651 = vbcast.lane.b32.xlu0 %v649_v56, 256 }
  0x88   :  { %1735 = vbcast.lane.b32.xlu1 %v1733_v58, 256 }
  0x89   :  { %360 = vmatpush1.bf16.msra.mxu1 %v6551_v41 }
  0x8a   :  { %361 = vmatprep.subr.bf16.mxu1 %v6556_v44  ;;  %1686 = vbcast.lane.b32.xlu0 %v1684_v59, 256 }
  0x8c   :  { %655 = vbcast.lane.b32.xlu1 %v649_v56, 264 }
  0x8d   :  { %362 = vmatpush1.bf16.msra.mxu1 %v6554_v46 }
  0x8e   :  { %363 = vmatprep.subr.bf16.mxu1 %v6559_v47  ;;  %662 = vbcast.lane.b32.xlu0 %v660_v62, 256 }
  0x90   :  { %1742 = vbcast.lane.b32.xlu1 %v1740_v63, 256 }
  0x91   :  { %364 = vmatpush1.bf16.msra.mxu1 %v6557_v49 }
  0x92   :  { %365 = vmatprep.subr.bf16.mxu1 %v6562_v52  ;;  %1693 = vbcast.lane.b32.xlu0 %v1691_v1, 256 }
  0x94   :  { %666 = vbcast.lane.b32.xlu1 %v660_v62, 264 }
  0x95   :  { %366 = vmatpush1.bf16.msra.mxu1 %v6560_v54 }
  0x96   :  { %367 = vmatprep.subr.bf16.mxu1 %v6565_v55  ;;  %673 = vbcast.lane.b32.xlu0 %v671_v3, 256 }
  0x98   :  { %1749 = vbcast.lane.b32.xlu1 %v1747_v4, 256 }
  0x99   :  { %368 = vmatpush1.bf16.msra.mxu1 %v6563_v57 }
  0x9a   :  { %6469 = vmatprep.subr.bf16.mxu1 %v9276_v6  ;;  %1700 = vbcast.lane.b32.xlu0 %v1698_v8, 256 }
  0x9c   :  { %386 = vmatmul.mubr.bf16.vlgmr.msra.gmra.mrb[4].mxu1 %v108_v61  ;;  %677 = vbcast.lane.b32.xlu1 %v671_v3, 264 }
  0x9e   :  { %1707 = vbcast.lane.b32.xlu0 %v1705_v10, 256 }
  0xa0   :  { %1756 = vbcast.lane.b32.xlu1 %v1754_v5, 256 }
  0xa4   :  { %1763 = vbcast.lane.b32.xlu1 %v1761_v7, 256 }
 0x14f   :  { %v7377_v11 = vpop.f32.mrb[0].mxu1 }
 0x150   :  { %v250_v13 = vpop.f32.mrb[1].mxu1 }
 0x151   :  { %v7379_v14 = vpop.f32.mrb[2].mxu1  ;;  %v1373_v24 = vcombine.high %v250_v13, %v250_v13  ;;  %v1380_v25 = vrot.slane %v250_v13, %v7384_v23 }
 0x152   :  { %v254_v16 = vpop.f32.mrb[3].mxu1  ;;  %v1174_v18 = vpack.c.bf16 %v7379_v14, %v7377_v11 }
 0x153   :  { %v1429_v26 = vrot.slane %v254_v16, %v7384_v23  ;;  %v1422_v27 = vcombine.high %v254_v16, %v254_v16  ;;  %v1387_v28 = vrot.slane %v1373_v24, %v7384_v23  ;;  %v1388_v29 = vcombine.high %v1380_v25, %v1380_v25 }
 0x154   :  { %6464 = vmatpush3.bf16.msra.mxu0 %v1174_v18  ;;  %v1396_v30 = vrot.slane %v1380_v25, %v7384_v23 }
 0x155   :  { %v1437_v31 = vcombine.high %v1429_v26, %v1429_v26  ;;  %v1436_v32 = vrot.slane %v1422_v27, %v7384_v23  ;;  %v1445_v33 = vrot.slane %v1429_v26, %v7384_v23  ;;  %v1389_v34 = vcombine.high %v1387_v28, %v1387_v28 }
 0x156   :  { %v7393_v35 = vrot.slane %v1387_v28, %v7384_v23  ;;  %v1410_v37 = vrot.slane %v1388_v29, %v7384_v23  ;;  %v1418_v38 = vcombine.high %v1396_v30, %v1396_v30  ;;  %v1474_v47 = vrot.slane %v1396_v30, %v7288_v15 }
 0x157   :  { %v1459_v39 = vrot.slane %v1437_v31, %v7384_v23  ;;  %v1438_v40 = vcombine.high %v1436_v32, %v1436_v32  ;;  %v1452_v41 = vrot.slane %v1436_v32, %v7384_v23  ;;  %v1467_v42 = vcombine.high %v1445_v33, %v1445_v33 }
 0x158   :  { %v7399_v43 = vrot.slane %v1389_v34, %v7384_v23  ;;  %v1419_v44 = vcombine.high %v7393_v35, %v7393_v35  ;;  %v1420_v46 = vcombine.high %v1410_v37, %v1410_v37  ;;  %v1506_v48 = vrot.slane %v1445_v33, %v7288_v15 }
 0x159   :  { %v1478_v50 = vrot.slane %v1410_v37, %v7288_v15  ;;  %v1510_v51 = vrot.slane %v1459_v39, %v7288_v15  ;;  %v1482_v52 = vrot.slane %v1418_v38, %v7288_v15  ;;  %v1466_v54 = vrot.slane %v1438_v40, %v7384_v23 }
 0x15a   :  { %v1468_v55 = vcombine.high %v1452_v41, %v1452_v41  ;;  %v1469_v56 = vcombine.high %v1459_v39, %v1459_v39  ;;  %v1514_v58 = vrot.slane %v1467_v42, %v7288_v15  ;;  %v1486_v5 = vrot.slane %v1420_v46, %v7288_v15 }
 0x15b   :  { %v1522_v7 = vrot.slane %v1452_v41, %v7288_v15  ;;  %v1490_v8 = vrot.slane %v7393_v35, %v7288_v15  ;;  %v1526_v21 = vrot.slane %v1466_v54, %v7288_v15  ;;  %v1494_v24 = vrot.slane %v7399_v43, %v7288_v15 }
 0x15c   :  { %v1518_v20 = vrot.slane %v1469_v56, %v7288_v15  ;;  %v1530_v25 = vrot.slane %v1468_v55, %v7288_v15  ;;  %v1470_v32 = vcombine.high %v1466_v54, %v1466_v54  ;;  %v1421_v33 = vcombine.high %v7399_v43, %v7399_v43 }
 0x16f   :  { %v7405_v49 = vpop.f32.mrb[4].mxu1 }
 0x170   :  { %v7411_v57 = vpop.f32.mrb[5].mxu1  ;;  %v408_v26 = vrot.slane %v7405_v49, %v7384_v23  ;;  %v401_v30 = vcombine.high %v7405_v49, %v7405_v49 }
 0x171   :  { %v391_v59 = vpop.f32.mrb[6].mxu1  ;;  %v2348_v61 = vpack.c.bf16 %v7411_v57, %v7411_v57  ;;  %v1552_v62 = vadd.f32 %v1478_v50, %v7411_v57  ;;  %v1551_v63 = vadd.f32 %v1474_v47, %v7411_v57  ;;  %v1560_v1 = vadd.f32 %v1510_v51, %v7411_v57 }
 0x172   :  { %v392_v3 = vpop.f32.mrb[7].mxu1  ;;  %v1559_v4 = vadd.f32 %v1506_v48, %v7411_v57  ;;  %v1561_v18 = vadd.f32 %v1514_v58, %v7411_v57  ;;  %v1553_v41 = vadd.f32 %v1482_v52, %v7411_v57  ;;  %v1562_v42 = vadd.f32 %v1518_v20, %v7411_v57 }
 0x173   :  { %v2513_v10 = vsel %vm2511_vm0, %v2348_v61, 0  ;;  %v1568_v13 = vmul.f32 0.2, %v1552_v62  ;;  %v1567_v16 = vmul.f32 0.2, %v1551_v63  ;;  %v1554_v46 = vadd.f32 %v1486_v5, %v7411_v57 }
 0x174   :  { %6470 = vmatpush3.bf16.msra.mxu1 %v2513_v10  ;;  %v1576_v29 = vmul.f32 0.2, %v1560_v1  ;;  %v1575_v31 = vmul.f32 0.2, %v1559_v4  ;;  %v1577_v39 = vmul.f32 0.2, %v1561_v18  ;;  %v416_v47 = vcombine.high %v408_v26, %v408_v26 }
 0x175   :  { %v1584_v27 = vmax.f32 %v1552_v62, %v1568_v13  ;;  %v1583_v28 = vmax.f32 %v1551_v63, %v1567_v16  ;;  %v424_v48 = vrot.slane %v408_v26, %v7384_v23  ;;  %v1563_v43 = vadd.f32 %v1522_v7, %v7411_v57 }
 0x176   :  { %v1592_v38 = vmax.f32 %v1560_v1, %v1576_v29  ;;  %v1591_v40 = vmax.f32 %v1559_v4, %v1575_v31  ;;  %v1569_v50 = vmul.f32 0.2, %v1553_v41  ;;  %v1578_v51 = vmul.f32 0.2, %v1562_v42 }
 0x177   :  { %v1604_v34 = vmul.f32 %v7429_v19, %v1584_v27  ;;  %v1603_v37 = vmul.f32 %v7429_v19, %v1583_v28  ;;  %v1570_v54 = vmul.f32 0.2, %v1554_v46  ;;  %v1593_v56 = vmax.f32 %v1561_v18, %v1577_v39 }
 0x178   :  { %v1612_v49 = vmul.f32 %v7429_v19, %v1592_v38  ;;  %v1611_v55 = vmul.f32 %v7429_v19, %v1591_v40  ;;  %v1555_v52 = vadd.f32 %v1490_v8, %v7411_v57  ;;  %v1564_v58 = vadd.f32 %v1526_v21, %v7411_v57 }
 0x179   :  { %1621 = vadd.xlane.f32.xlu1 %v1604_v34  ;;  %1619 = vadd.xlane.f32.xlu0 %v1603_v37  ;;  %v1585_v59 = vmax.f32 %v1553_v41, %v1569_v50  ;;  %v1556_v61 = vadd.f32 %v1494_v24, %v7411_v57  ;;  %v1498_v62 = vrot.slane %v1419_v44, %v7288_v15  ;;  %v1579_v63 = vmul.f32 0.2, %v1563_v43 }
 0x17a   :  { %v1565_v1 = vadd.f32 %v1530_v25, %v7411_v57  ;;  %v1534_v3 = vrot.slane %v1470_v32, %v7288_v15  ;;  %v1502_v4 = vrot.slane %v1421_v33, %v7288_v15  ;;  %v415_v5 = vrot.slane %v401_v30, %v7384_v23 }
 0x17b   :  { %v438_v7 = vrot.slane %v416_v47, %v7384_v23  ;;  %v1594_v8 = vmax.f32 %v1562_v42, %v1578_v51  ;;  %v1586_v10 = vmax.f32 %v1554_v46, %v1570_v54  ;;  %v453_v13 = vrot.slane %v424_v48, %v7288_v15 }
 0x17c   :  { %v1613_v35 = vmul.f32 %v7429_v19, %v1593_v56  ;;  %v1605_v44 = vmul.f32 %v7429_v19, %v1585_v59  ;;  %v1571_v16 = vmul.f32 0.2, %v1555_v52  ;;  %v446_v18 = vcombine.high %v424_v48, %v424_v48 }
 0x17d   :  { %1637 = vadd.xlane.f32.xlu1 %v1612_v49  ;;  %1635 = vadd.xlane.f32.xlu0 %v1611_v55  ;;  %v1557_v20 = vadd.f32 %v1498_v62, %v7411_v57  ;;  %v7468_v21 = vadd.f32 %v1534_v3, %v7411_v57  ;;  %v7471_v24 = vadd.f32 %v1502_v4, %v7411_v57  ;;  %v1580_v28 = vmul.f32 0.2, %v1564_v58 }
 0x17e   :  { %v1595_v25 = vmax.f32 %v1563_v43, %v1579_v63  ;;  %v1614_v26 = vmul.f32 %v7429_v19, %v1594_v8  ;;  %v1606_v27 = vmul.f32 %v7429_v19, %v1586_v10  ;;  %v1572_v29 = vmul.f32 0.2, %v1556_v61 }
 0x17f   :  { %v1587_v30 = vmax.f32 %v1555_v52, %v1571_v16  ;;  %v457_v31 = vrot.slane %v438_v7, %v7288_v15  ;;  %v7477_v32 = vadd.f32 %v453_v13, %v7377_v11  ;;  %v7480_v33 = vadd.f32 %v453_v13, %v7379_v14 }
 0x180   :  { %v431_v57 = vrot.slane %v415_v5, %v7384_v23  ;;  %v448_v34 = vcombine.high %v438_v7, %v438_v7  ;;  %v461_v37 = vrot.slane %v446_v18, %v7288_v15  ;;  %v417_v38 = vcombine.high %v415_v5, %v415_v5 }
 0x181   :  { %1639 = vadd.xlane.f32.xlu1 %v1613_v35  ;;  %1623 = vadd.xlane.f32.xlu0 %v1605_v44  ;;  %v1581_v39 = vmul.f32 0.2, %v1565_v1  ;;  %v492_v40 = vadd.f32 %v457_v31, %v7377_v11  ;;  %v7486_v41 = vadd.f32 %v457_v31, %v7379_v14  ;;  %v1596_v42 = vmax.f32 %v1564_v58, %v1580_v28 }
 0x182   :  { %v7489_v46 = vadd.f32 %v461_v37, %v7379_v14  ;;  %v1615_v47 = vmul.f32 %v7429_v19, %v1595_v25  ;;  %v1607_v48 = vmul.f32 %v7429_v19, %v1587_v30  ;;  %v1588_v43 = vmax.f32 %v1556_v61, %v1572_v29 }
 0x183   :  { %v1573_v49 = vmul.f32 0.2, %v1557_v20  ;;  %v7494_v50 = vadd.f32 %v461_v37, %v7377_v11  ;;  %v469_v51 = vrot.slane %v431_v57, %v7288_v15  ;;  %v465_v54 = vrot.slane %v448_v34, %v7288_v15  ;;  %v7539_v37 = vld [vmem:[%s9270_s8] ss:$0 sm:$0xff] }
 0x184   :  { %v445_v55 = vrot.slane %v417_v38, %v7384_v23  ;;  %v447_v56 = vcombine.high %v431_v57, %v431_v57  ;;  %v1597_v52 = vmax.f32 %v1565_v1, %v1581_v39  ;;  %v1616_v58 = vmul.f32 %v7429_v19, %v1596_v42 }
 0x185   :  { %1641 = vadd.xlane.f32.xlu1 %v1614_v26  ;;  %1625 = vadd.xlane.f32.xlu0 %v1606_v27  ;;  %v1582_v59 = vmul.f32 0.2, %v7468_v21  ;;  %v1574_v61 = vmul.f32 0.2, %v7471_v24  ;;  %v499_v62 = vadd.f32 %v469_v51, %v7379_v14  ;;  %v1608_v63 = vmul.f32 %v7429_v19, %v1588_v43 }
 0x186   :  { %v1589_v3 = vmax.f32 %v1557_v20, %v1573_v49  ;;  %v498_v4 = vadd.f32 %v469_v51, %v7377_v11  ;;  %v7506_v5 = vadd.f32 %v465_v54, %v7379_v14  ;;  %v7509_v7 = vadd.f32 %v465_v54, %v7377_v11 }
 0x187   :  { %v1617_v1 = vmul.f32 %v7429_v19, %v1597_v52  ;;  %v473_v8 = vrot.slane %v445_v55, %v7288_v15  ;;  %v477_v10 = vrot.slane %v447_v56, %v7288_v15  ;;  %v1598_v13 = vmax.f32 %v7468_v21, %v1582_v59  ;;  %v7561_v59 = vpop.permute.xlu1 %600 }
 0x188   :  { %v1590_v35 = vmax.f32 %v7471_v24, %v1574_v61  ;;  %v506_v44 = vmul.f32 0.2, %v7477_v32  ;;  %v449_v16 = vcombine.high %v445_v55, %v445_v55  ;;  %v1609_v18 = vmul.f32 %v7429_v19, %v1589_v3  ;;  %9379 = vst [vmem:[#allocation18_spill] sm:$0xff] %v7561_v59 }
 0x189   :  { %1643 = vadd.xlane.f32.xlu1 %v1615_v47  ;;  %1627 = vadd.xlane.f32.xlu0 %v1607_v48  ;;  %v508_v20 = vmul.f32 0.2, %v492_v40  ;;  %v7519_v25 = vadd.f32 %v473_v8, %v7379_v14  ;;  %v7522_v26 = vadd.f32 %v473_v8, %v7377_v11  ;;  %v7525_v27 = vadd.f32 %v477_v10, %v7379_v14 }
 0x18a   :  { %v7528_v28 = vadd.f32 %v477_v10, %v7377_v11  ;;  %v1618_v21 = vmul.f32 %v7429_v19, %v1598_v13  ;;  %v507_v24 = vmul.f32 0.2, %v7480_v33  ;;  %v481_v29 = vrot.slane %v449_v16, %v7288_v15 }
 0x18b   :  { %v1610_v30 = vmul.f32 %v7429_v19, %v1590_v35  ;;  %v524_v31 = vmax.f32 %v492_v40, %v508_v20  ;;  %v522_v57 = vmax.f32 %v7477_v32, %v506_v44  ;;  %v509_v34 = vmul.f32 0.2, %v7486_v41  ;;  %v7575_v35 = vpop.permute.xlu1 %607 }
 0x18c   :  { %v7542_v38 = vadd.f32 %v481_v29, %v7379_v14  ;;  %v7545_v39 = vadd.f32 %v481_v29, %v7377_v11  ;;  %v523_v19 = vmax.f32 %v7480_v33, %v507_v24  ;;  %v511_v40 = vmul.f32 0.2, %v7489_v46  ;;  %9380 = vst [vmem:[#allocation19_spill] sm:$0xff] %v7575_v35 }
 0x18d   :  { %1645 = vadd.xlane.f32.xlu1 %v1616_v58  ;;  %1629 = vadd.xlane.f32.xlu0 %v1608_v63  ;;  %v544_v32 = vmul.f32 %v7539_v37, %v524_v31  ;;  %v542_v42 = vmul.f32 %v7539_v37, %v522_v57  ;;  %v525_v47 = vmax.f32 %v7486_v41, %v509_v34  ;;  %v510_v48 = vmul.f32 0.2, %v7494_v50 }
 0x18e   :  { %v543_v14 = vmul.f32 %v7539_v37, %v523_v19  ;;  %v515_v11 = vmul.f32 0.2, %v499_v62  ;;  %v527_v49 = vmax.f32 %v7489_v46, %v511_v40  ;;  %v514_v51 = vmul.f32 0.2, %v498_v4 }
 0x18f   :  { %v545_v43 = vmul.f32 %v7539_v37, %v525_v47  ;;  %v526_v33 = vmax.f32 %v7494_v50, %v510_v48  ;;  %v513_v55 = vmul.f32 0.2, %v7506_v5  ;;  %v512_v58 = vmul.f32 0.2, %v7509_v7 }
 0x190   :  { %v531_v54 = vmax.f32 %v499_v62, %v515_v11  ;;  %v547_v41 = vmul.f32 %v7539_v37, %v527_v49  ;;  %v530_v52 = vmax.f32 %v498_v4, %v514_v51  ;;  %v517_v63 = vmul.f32 0.2, %v7519_v25 }
 0x191   :  { %1647 = vadd.xlane.f32.xlu1 %v1617_v1  ;;  %1631 = vadd.xlane.f32.xlu0 %v1609_v18  ;;  %v546_v56 = vmul.f32 %v7539_v37, %v526_v33  ;;  %v529_v50 = vmax.f32 %v7506_v5, %v513_v55  ;;  %v528_v62 = vmax.f32 %v7509_v7, %v512_v58  ;;  %v516_v3 = vmul.f32 0.2, %v7522_v26 }
 0x192   :  { %v551_v46 = vmul.f32 %v7539_v37, %v531_v54  ;;  %v550_v61 = vmul.f32 %v7539_v37, %v530_v52  ;;  %v519_v4 = vmul.f32 0.2, %v7525_v27  ;;  %v518_v1 = vmul.f32 0.2, %v7528_v28 }
 0x193   :  { %v549_v8 = vmul.f32 %v7539_v37, %v529_v50  ;;  %v548_v10 = vmul.f32 %v7539_v37, %v528_v62  ;;  %v533_v5 = vmax.f32 %v7519_v25, %v517_v63  ;;  %v532_v13 = vmax.f32 %v7522_v26, %v516_v3  ;;  %v7583_v25 = vpop.permute.xlu0 %596  ;;  %v7585_v26 = vpop.permute.xlu1 %611 }
 0x194   :  { %v535_v7 = vmax.f32 %v7525_v27, %v519_v4  ;;  %v534_v44 = vmax.f32 %v7528_v28, %v518_v1  ;;  %v521_v20 = vmul.f32 0.2, %v7542_v38  ;;  %9381 = vst [vmem:[#allocation20_spill] sm:$0xff] %v7583_v25  ;;  %9382 = vst [vmem:[#allocation21_spill] sm:$0xff] %v7585_v26 }
 0x195   :  { %1649 = vadd.xlane.f32.xlu1 %v1618_v21  ;;  %1633 = vadd.xlane.f32.xlu0 %v1610_v30  ;;  %v553_v16 = vmul.f32 %v7539_v37, %v533_v5  ;;  %v552_v18 = vmul.f32 %v7539_v37, %v532_v13  ;;  %v520_v21 = vmul.f32 0.2, %v7545_v39 }
 0x196   :  { %v555_v24 = vmul.f32 %v7539_v37, %v535_v7  ;;  %v554_v27 = vmul.f32 %v7539_v37, %v534_v44  ;;  %v537_v28 = vmax.f32 %v7542_v38, %v521_v20 }
 0x197   :  { %v536_v29 = vmax.f32 %v7545_v39, %v520_v21  ;;  %v7593_v57 = vpop.permute.xlu0 %618  ;;  %v7595_v34 = vpop.permute.xlu1 %622 }
 0x198   :  { %v557_v30 = vmul.f32 %v7539_v37, %v537_v28  ;;  %9383 = vst [vmem:[#allocation22_spill] sm:$0xff] %v7593_v57  ;;  %9384 = vst [vmem:[#allocation23_spill] sm:$0xff] %v7595_v34 }
 0x199   :  { %562 = vadd.xlane.f32.xlu1 %v544_v32  ;;  %558 = vadd.xlane.f32.xlu0 %v542_v42  ;;  %v556_v31 = vmul.f32 %v7539_v37, %v536_v29 }
 0x19b   :  { %v7597_v19 = vpop.permute.xlu0 %1658  ;;  %v7599_v40 = vpop.permute.xlu1 %1665 }
 0x19c   :  { %9385 = vst [vmem:[#allocation24_spill] sm:$0xff] %v7597_v19  ;;  %9386 = vst [vmem:[#allocation25_spill] sm:$0xff] %v7599_v40 }
 0x19d   :  { %564 = vadd.xlane.f32.xlu1 %v545_v43  ;;  %560 = vadd.xlane.f32.xlu0 %v543_v14 }
 0x19f   :  { %v7601_v32 = vpop.permute.xlu0 %1714  ;;  %v7603_v38 = vpop.permute.xlu1 %1721 }
 0x1a0   :  { %9387 = vst [vmem:[#allocation26_spill] sm:$0xff] %v7601_v32  ;;  %9388 = vst [vmem:[#allocation27_spill] sm:$0xff] %v7603_v38 }
 0x1a1   :  { %568 = vadd.xlane.f32.xlu1 %v547_v41  ;;  %566 = vadd.xlane.f32.xlu0 %v546_v56 }
 0x1a3   :  { %v7605_v39 = vpop.permute.xlu0 %629  ;;  %v7607_v42 = vpop.permute.xlu1 %633 }
 0x1a4   :  { %9389 = vst [vmem:[#allocation28_spill] sm:$0xff] %v7605_v39  ;;  %9390 = vst [vmem:[#allocation29_spill] sm:$0xff] %v7607_v42 }
 0x1a5   :  { %576 = vadd.xlane.f32.xlu1 %v551_v46  ;;  %574 = vadd.xlane.f32.xlu0 %v550_v61 }
 0x1a7   :  { %v7609_v47 = vpop.permute.xlu0 %1672  ;;  %v7611_v37 = vpop.permute.xlu1 %1728 }
 0x1a8   :  { %9391 = vst [vmem:[#allocation30_spill] sm:$0xff] %v7609_v47  ;;  %9392 = vst [vmem:[#allocation31_spill] sm:$0xff] %v7611_v37 }
 0x1a9   :  { %572 = vadd.xlane.f32.xlu1 %v549_v8  ;;  %570 = vadd.xlane.f32.xlu0 %v548_v10 }
 0x1ab   :  { %v7613_v48 = vpop.permute.xlu0 %640  ;;  %v7615_v14 = vpop.permute.xlu1 %644 }
 0x1ac   :  { %9393 = vst [vmem:[#allocation32_spill] sm:$0xff] %v7613_v48  ;;  %9394 = vst [vmem:[#allocation33_spill] sm:$0xff] %v7615_v14 }
 0x1ad   :  { %580 = vadd.xlane.f32.xlu1 %v553_v16  ;;  %578 = vadd.xlane.f32.xlu0 %v552_v18 }
 0x1af   :  { %v7617_v11 = vpop.permute.xlu0 %1679  ;;  %v7619_v43 = vpop.permute.xlu1 %1735 }
 0x1b0   :  { %9395 = vst [vmem:[#allocation34_spill] sm:$0xff] %v7617_v11  ;;  %9396 = vst [vmem:[#allocation35_spill] sm:$0xff] %v7619_v43 }
 0x1b1   :  { %584 = vadd.xlane.f32.xlu1 %v555_v24  ;;  %582 = vadd.xlane.f32.xlu0 %v554_v27 }
 0x1b3   :  { %v7621_v49 = vpop.permute.xlu0 %651  ;;  %v7623_v33 = vpop.permute.xlu1 %655 }
 0x1b4   :  { %9397 = vst [vmem:[#allocation36_spill] sm:$0xff] %v7621_v49  ;;  %9398 = vst [vmem:[#allocation37_spill] sm:$0xff] %v7623_v33 }
 0x1b5   :  { %588 = vadd.xlane.f32.xlu1 %v557_v30  ;;  %586 = vadd.xlane.f32.xlu0 %v556_v31 }
 0x1b7   :  { %v7625_v51 = vpop.permute.xlu0 %1686  ;;  %v7627_v54 = vpop.permute.xlu1 %1742 }
 0x1b8   :  { %9399 = vst [vmem:[#allocation38_spill] sm:$0xff] %v7625_v51  ;;  %9400 = vst [vmem:[#allocation39_spill] sm:$0xff] %v7627_v54 }
 0x1bb   :  { %v7629_v55 = vpop.permute.xlu0 %662  ;;  %v7631_v41 = vpop.permute.xlu1 %666 }
 0x1bc   :  { %9401 = vst [vmem:[#allocation40_spill] sm:$0xff] %v7629_v55  ;;  %9402 = vst [vmem:[#allocation41_spill] sm:$0xff] %v7631_v41 }
 0x1bf   :  { %v7633_v56 = vpop.permute.xlu0 %1693  ;;  %v7635_v52 = vpop.permute.xlu1 %1749 }
 0x1c0   :  { %9403 = vst [vmem:[#allocation42_spill] sm:$0xff] %v7633_v56  ;;  %9404 = vst [vmem:[#allocation43_spill] sm:$0xff] %v7635_v52 }
 0x1c3   :  { %v7637_v58 = vpop.permute.xlu0 %673  ;;  %v7639_v46 = vpop.permute.xlu1 %677 }
 0x1c4   :  { %9405 = vst [vmem:[#allocation44_spill] sm:$0xff] %v7637_v58  ;;  %9406 = vst [vmem:[#allocation45_spill] sm:$0xff] %v7639_v46 }
 0x1c7   :  { %v7641_v50 = vpop.permute.xlu0 %1700  ;;  %v7643_v61 = vpop.permute.xlu1 %1756 }
 0x1c8   :  { %9407 = vst [vmem:[#allocation46_spill] sm:$0xff] %v7641_v50  ;;  %9408 = vst [vmem:[#allocation47_spill] sm:$0xff] %v7643_v61 }
 0x1cb   :  { %v7645_v62 = vpop.permute.xlu0 %1707  ;;  %v7647_v63 = vpop.permute.xlu1 %1763 }
 0x1cc   :  { %9409 = vst [vmem:[#allocation48_spill] sm:$0xff] %v7645_v62  ;;  %9410 = vst [vmem:[#allocation49_spill] sm:$0xff] %v7647_v63 }
 0x206   :  { %v1622_v3 = vpop.xlane.xlu1 %1621  ;;  %v1620_v4 = vpop.xlane.xlu0 %1619 }
 0x207   :  { %v7650_v1 = vadd.f32 %v7599_v40, %v1622_v3  ;;  %v7653_v8 = vadd.f32 %v7597_v19, %v1620_v4  ;;  %v9424_v40 = vlaneseq }
 0x209   :  { %1817 = vperm.xlu0 %6516, %v7650_v1   ;;  %1814 = vperm.xlu1 %6515, %v7653_v8   ;;  %v776_v23 = vand.u32 127, %v9424_v40 }
 0x20a   :  { %v1638_v10 = vpop.xlane.xlu1 %1637  ;;  %v1636_v5 = vpop.xlane.xlu0 %1635 }
 0x20b   :  { %v7658_v13 = vadd.f32 %v7603_v38, %v1638_v10  ;;  %v7661_v7 = vadd.f32 %v7601_v32, %v1636_v5 }
 0x20d   :  { %1841 = vperm.xlu0 %6516, %v7658_v13   ;;  %1838 = vperm.xlu1 %6515, %v7661_v7  }
 0x20e   :  { %v1640_v44 = vpop.xlane.xlu1 %1639  ;;  %v1624_v16 = vpop.xlane.xlu0 %1623 }
 0x20f   :  { %v7666_v18 = vadd.f32 %v7611_v37, %v1640_v44  ;;  %v7669_v20 = vadd.f32 %v7609_v47, %v1624_v16 }
 0x211   :  { %1844 = vperm.xlu0 %6516, %v7666_v18   ;;  %1820 = vperm.xlu1 %6515, %v7669_v20  }
 0x212   :  { %v1642_v21 = vpop.xlane.xlu1 %1641  ;;  %v1626_v24 = vpop.xlane.xlu0 %1625 }
 0x213   :  { %v7674_v27 = vadd.f32 %v7619_v43, %v1642_v21  ;;  %v7677_v28 = vadd.f32 %v7617_v11, %v1626_v24 }
 0x215   :  { %1847 = vperm.xlu0 %6516, %v7674_v27   ;;  %1823 = vperm.xlu1 %6515, %v7677_v28  }
 0x216   :  { %v1644_v29 = vpop.xlane.xlu1 %1643  ;;  %v1628_v30 = vpop.xlane.xlu0 %1627 }
 0x217   :  { %v7682_v31 = vadd.f32 %v7627_v54, %v1644_v29  ;;  %v7685_v3 = vadd.f32 %v7625_v51, %v1628_v30 }
 0x219   :  { %1850 = vperm.xlu0 %6516, %v7682_v31   ;;  %1826 = vperm.xlu1 %6515, %v7685_v3  }
 0x21a   :  { %v1646_v4 = vpop.xlane.xlu1 %1645  ;;  %v1630_v10 = vpop.xlane.xlu0 %1629 }
 0x21b   :  { %v7690_v5 = vadd.f32 %v7635_v52, %v1646_v4  ;;  %v7693_v44 = vadd.f32 %v7633_v56, %v1630_v10 }
 0x21d   :  { %1853 = vperm.xlu0 %6516, %v7690_v5   ;;  %1829 = vperm.xlu1 %6515, %v7693_v44  }
 0x21e   :  { %v1648_v16 = vpop.xlane.xlu1 %1647  ;;  %v1632_v21 = vpop.xlane.xlu0 %1631 }
 0x21f   :  { %v7698_v24 = vadd.f32 %v7643_v61, %v1648_v16  ;;  %v7701_v29 = vadd.f32 %v7641_v50, %v1632_v21 }
 0x221   :  { %1856 = vperm.xlu0 %6516, %v7698_v24   ;;  %1832 = vperm.xlu1 %6515, %v7701_v29  }
 0x222   :  { %v1650_v30 = vpop.xlane.xlu1 %1649  ;;  %v1634_v4 = vpop.xlane.xlu0 %1633 }
 0x226   :  { %v563_v10 = vpop.xlane.xlu1 %562  ;;  %v559_v0 = vpop.xlane.xlu0 %558 }
 0x227   :  { %v7706_v6 = vadd.f32 %v7583_v25, %v559_v0  ;;  %v7718_v52 = vadd.f32 %v7575_v35, %v563_v10 }
 0x229   :  { %728 = vperm.xlu0 %6516, %v7706_v6  }
 0x22a   :  { %v565_v9 = vpop.xlane.xlu1 %564  ;;  %v561_v56 = vpop.xlane.xlu0 %560 }
 0x22b   :  { %v7710_v16 = vadd.f32 %v7585_v26, %v565_v9  ;;  %v7713_v21 = vadd.f32 %v7561_v59, %v561_v56 }
 0x22d   :  { %9411 = vst [vmem:[#allocation50_spill] sm:$0xff] %v7710_v16  ;;  %737 = vperm.xlu0 %6516, %v7710_v16   ;;  %731 = vperm.xlu1 %6515, %v7713_v21  }
 0x22e   :  { %v569_v50 = vpop.xlane.xlu1 %568  ;;  %v567_v61 = vpop.xlane.xlu0 %566 }
 0x22f   :  { %v7721_v0 = vadd.f32 %v7595_v34, %v569_v50  ;;  %v7726_v56 = vadd.f32 %v7593_v57, %v567_v61 }
 0x231   :  { %9412 = vst [vmem:[#allocation51_spill] sm:$0xff] %v7721_v0  ;;  %743 = vperm.xlu0 %6516, %v7721_v0   ;;  %734 = vperm.xlu1 %6515, %v7718_v52  }
 0x232   :  { %v577_v9 = vpop.xlane.xlu1 %576  ;;  %v575_v26 = vpop.xlane.xlu0 %574 }
 0x233   :  { %v7729_v25 = vadd.f32 %v7615_v14, %v577_v9  ;;  %v7734_v50 = vadd.f32 %v7613_v48, %v575_v26 }
 0x235   :  { %9413 = vst [vmem:[#allocation52_spill] sm:$0xff] %v7729_v25  ;;  %755 = vperm.xlu0 %6516, %v7729_v25   ;;  %740 = vperm.xlu1 %6515, %v7726_v56   ;;  %9414 = vst [vmem:[#allocation53_spill] sm:$0xff] %v7734_v50 }
 0x236   :  { %v573_v10 = vpop.xlane.xlu1 %572  ;;  %v571_v35 = vpop.xlane.xlu0 %570 }
 0x237   :  { %v7737_v34 = vadd.f32 %v7607_v42, %v573_v10  ;;  %v7742_v9 = vadd.f32 %v7605_v39, %v571_v35 }
 0x239   :  { %9415 = vst [vmem:[#allocation54_spill] sm:$0xff] %v7737_v34  ;;  %749 = vperm.xlu0 %6516, %v7737_v34   ;;  %752 = vperm.xlu1 %6515, %v7734_v50  }
 0x23a   :  { %v581_v61 = vpop.xlane.xlu1 %580  ;;  %v579_v57 = vpop.xlane.xlu0 %578 }
 0x23b   :  { %v7745_v14 = vadd.f32 %v7623_v33, %v581_v61  ;;  %v7750_v10 = vadd.f32 %v7621_v49, %v579_v57  ;;  %v7766_v57 = vadd.f32 %v7647_v63, %v1650_v30 }
 0x23d   :  { %9416 = vst [vmem:[#allocation55_spill] sm:$0xff] %v7745_v14  ;;  %761 = vperm.xlu0 %6516, %v7745_v14   ;;  %746 = vperm.xlu1 %6515, %v7742_v9   ;;  %9417 = vst [vmem:[#allocation56_spill] sm:$0xff] %v7750_v10 }
 0x23e   :  { %v585_v26 = vpop.xlane.xlu1 %584  ;;  %v583_v48 = vpop.xlane.xlu0 %582  ;;  %9421 = vst [vmem:[#allocation60_spill] sm:$0xff] %v7766_v57 }
 0x23f   :  { %v7753_v42 = vadd.f32 %v7631_v41, %v585_v26  ;;  %v7758_v61 = vadd.f32 %v7629_v55, %v583_v48  ;;  %v7774_v48 = vadd.f32 %v7645_v62, %v1634_v4 }
 0x241   :  { %9418 = vst [vmem:[#allocation57_spill] sm:$0xff] %v7753_v42  ;;  %767 = vperm.xlu0 %6516, %v7753_v42   ;;  %758 = vperm.xlu1 %6515, %v7750_v10   ;;  %9419 = vst [vmem:[#allocation58_spill] sm:$0xff] %v7758_v61 }
 0x242   :  { %v589_v35 = vpop.xlane.xlu1 %588  ;;  %v587_v39 = vpop.xlane.xlu0 %586  ;;  %9423 = vst [vmem:[#allocation62_spill] sm:$0xff] %v7774_v48 }
 0x243   :  { %v7761_v33 = vadd.f32 %v7639_v46, %v589_v35  ;;  %v7769_v26 = vadd.f32 %v7637_v58, %v587_v39 }
 0x245   :  { %9420 = vst [vmem:[#allocation59_spill] sm:$0xff] %v7761_v33  ;;  %773 = vperm.xlu0 %6516, %v7761_v33   ;;  %764 = vperm.xlu1 %6515, %v7758_v61   ;;  %9422 = vst [vmem:[#allocation61_spill] sm:$0xff] %v7769_v26 }
 0x249   :  { %1859 = vperm.xlu0 %6516, %v7766_v57   ;;  %770 = vperm.xlu1 %6515, %v7769_v26   ;;  %v781_v57 = vadd.s32 4294967288, %v776_v23 }
 0x24b   :  { %v7810_v14 = vsub.s32 %v781_v57, %v7285_v12 }
 0x24d   :  { %1835 = vperm.xlu1 %6515, %v7774_v48   ;;  %v7807_v48 = vsub.s32 %v776_v23, %v7285_v12 }
 0x288   :  { %v7777_v35 = vpop.permute.xlu1 %1814  ;;  %v7779_v46 = vpop.permute.xlu0 %1817 }
 0x289   :  { %v1864_v23 = vrot.slane %v7777_v35, %v7807_v48  ;;  %v1868_v0 = vrot.slane %v7779_v46, %v7807_v48 }
 0x28c   :  { %v7781_v41 = vpop.permute.xlu1 %1838  ;;  %v7783_v30 = vpop.permute.xlu0 %1841 }
 0x28d   :  { %v1900_v35 = vrot.slane %v7783_v30, %v7807_v48 }
 0x290   :  { %v7785_v63 = vpop.permute.xlu1 %1820  ;;  %v7787_v39 = vpop.permute.xlu0 %1844 }
 0x291   :  { %v1872_v50 = vrot.slane %v7785_v63, %v7807_v48 }
 0x294   :  { %v7789_v58 = vpop.permute.xlu0 %1847  ;;  %v7791_v55 = vpop.permute.xlu1 %1823 }
 0x298   :  { %v7793_v4 = vpop.permute.xlu0 %1850  ;;  %v7795_v62 = vpop.permute.xlu1 %1826 }
 0x29c   :  { %v7797_v49 = vpop.permute.xlu0 %1853  ;;  %v7799_v59 = vpop.permute.xlu1 %1829 }
 0x2a0   :  { %v7801_v11 = vpop.permute.xlu0 %1856  ;;  %v7803_v43 = vpop.permute.xlu1 %1832 }
 0x2a8   :  { %v729_v51 = vpop.permute.xlu0 %728 }
 0x2ac   :  { %v732_v54 = vpop.permute.xlu1 %731  ;;  %v738_v47 = vpop.permute.xlu0 %737 }
 0x2ad   :  { %v785_v40 = vrot.slane %v732_v54, %v7810_v14  ;;  %v795_v34 = vrot.slane %v738_v47, %v7810_v14 }
 0x2b0   :  { %v735_v37 = vpop.permute.xlu1 %734  ;;  %v744_v32 = vpop.permute.xlu0 %743 }
 0x2b1   :  { %v791_v61 = vrot.slane %v735_v37, %v7807_v48  ;;  %v804_v12 = vrot.slane %v744_v32, %v7810_v14 }
 0x2b3   :  { %v796_v54 = vsel %vm786_vm5, %v795_v34, %v791_v61 }
 0x2b4   :  { %v741_v38 = vpop.permute.xlu1 %740  ;;  %v756_v19 = vpop.permute.xlu0 %755 }
 0x2b5   :  { %v800_v2 = vrot.slane %v741_v38, %v7807_v48  ;;  %v780_v38 = vrot.slane %v729_v51, %v7807_v48 }
 0x2b7   :  { %v805_v32 = vsel %vm786_vm5, %v804_v12, %v800_v2  ;;  %v787_v46 = vsel %vm786_vm5, %v785_v40, %v780_v38  ;;  %v1925_v2 = vsel %vm851_vm1, %v1868_v0, %v1864_v23  ;;  %v822_v12 = vrot.slane %v756_v19, %v7810_v14 }
 0x2b8   :  { %v753_v33 = vpop.permute.xlu1 %752  ;;  %v750_v42 = vpop.permute.xlu0 %749  ;;  %v1876_v0 = vrot.slane %v7791_v55, %v7807_v48  ;;  %v1908_v23 = vrot.slane %v7789_v58, %v7807_v48  ;;  %v1912_v58 = vrot.slane %v7793_v4, %v7807_v48  ;;  %v1920_v4 = vrot.slane %v7801_v11, %v7807_v48 }
 0x2b9   :  { %v813_v47 = vrot.slane %v750_v42, %v7810_v14  ;;  %v852_v42 = vsel %vm851_vm1, %v796_v54, %v787_v46  ;;  %v818_v61 = vrot.slane %v753_v33, %v7807_v48  ;;  %v1926_v54 = vsel %vm853_vm2, %v1872_v50, %v1925_v2 }
 0x2ba   :  { %v854_v30 = vsel %vm853_vm2, %v805_v32, %v852_v42 }
 0x2bb   :  { %v823_v19 = vsel %vm786_vm5, %v822_v12, %v818_v61 }
 0x2bc   :  { %v747_v26 = vpop.permute.xlu1 %746  ;;  %v762_v25 = vpop.permute.xlu0 %761 }
 0x2bd   :  { %v809_v10 = vrot.slane %v747_v26, %v7807_v48  ;;  %v1896_v26 = vrot.slane %v7781_v41, %v7807_v48  ;;  %v831_v63 = vrot.slane %v762_v25, %v7810_v14 }
 0x2bf   :  { %v814_v51 = vsel %vm786_vm5, %v813_v47, %v809_v10  ;;  %v1904_v10 = vrot.slane %v7787_v39, %v7807_v48  ;;  %v1932_v38 = vsel %vm851_vm1, %v1900_v35, %v1896_v26  ;;  %v1880_v39 = vrot.slane %v7795_v62, %v7807_v48 }
 0x2c0   :  { %v759_v57 = vpop.permute.xlu1 %758  ;;  %v768_v37 = vpop.permute.xlu0 %767  ;;  %v1884_v26 = vrot.slane %v7799_v59, %v7807_v48  ;;  %v1888_v62 = vrot.slane %v7803_v43, %v7807_v48  ;;  %v1916_v59 = vrot.slane %v7797_v49, %v7807_v48 }
 0x2c1   :  { %v827_v34 = vrot.slane %v759_v57, %v7807_v48  ;;  %v856_v57 = vsel %vm855_vm3, %v814_v51, %v854_v30  ;;  %v840_v33 = vrot.slane %v768_v37, %v7810_v14  ;;  %v1933_v32 = vsel %vm853_vm2, %v1904_v10, %v1932_v38 }
 0x2c2   :  { %v858_v35 = vsel %vm857_vm4, %v823_v19, %v856_v57  ;;  %v1934_v61 = vsel %vm855_vm3, %v1908_v23, %v1933_v32 }
 0x2c3   :  { %v832_v25 = vsel %vm786_vm5, %v831_v63, %v827_v34  ;;  %v1927_v34 = vsel %vm855_vm3, %v1876_v0, %v1926_v54  ;;  %v1935_v10 = vsel %vm857_vm4, %v1912_v58, %v1934_v61 }
 0x2c4   :  { %v765_v41 = vpop.permute.xlu1 %764  ;;  %v774_v16 = vpop.permute.xlu0 %773  ;;  %v860_v51 = vsel %vm859_vm6, %v832_v25, %v858_v35  ;;  %v1936_v11 = vsel %vm859_vm6, %v1916_v59, %v1935_v10 }
 0x2c5   :  { %v836_v40 = vrot.slane %v765_v41, %v7807_v48  ;;  %v849_v50 = vrot.slane %v774_v16, %v7810_v14  ;;  %v1928_v41 = vsel %vm857_vm4, %v1880_v39, %v1927_v34  ;;  %v1937_v38 = vsel %vm861_vm7, %v1920_v4, %v1936_v11 }
 0x2c7   :  { %v841_v47 = vsel %vm786_vm5, %v840_v33, %v836_v40  ;;  %v1929_v40 = vsel %vm859_vm6, %v1884_v26, %v1928_v41 }
 0x2c8   :  { %v771_v37 = vpop.permute.xlu1 %770  ;;  %v1860_v46 = vpop.permute.xlu0 %1859  ;;  %v862_v42 = vsel %vm861_vm7, %v841_v47, %v860_v51  ;;  %v1930_v12 = vsel %vm861_vm7, %v1888_v62, %v1929_v40 }
 0x2c9   :  { %v845_v55 = vrot.slane %v771_v37, %v7807_v48  ;;  %v1924_v30 = vrot.slane %v1860_v46, %v7807_v48 }
 0x2cb   :  { %v850_v16 = vsel %vm786_vm5, %v849_v50, %v845_v55  ;;  %v1938_v54 = vsel %vm863_vm8, %v1924_v30, %v1937_v38 }
 0x2cc   :  { %v1836_v43 = vpop.permute.xlu1 %1835  ;;  %v864_v2 = vsel %vm863_vm8, %v850_v16, %v862_v42  ;;  %v1945_v0 = vsel %vm1941_vm10, %v1938_v54, -inf }
 0x2cd   :  { %v1892_v63 = vrot.slane %v1836_v43, %v7807_v48  ;;  %v867_v49 = vsel %vm866_vm9, %v864_v2, -inf }
 0x2ce   :  { %868 = vmax.xlane.f32.xlu1 %v867_v49 }
 0x2cf   :  { %v1931_v57 = vsel %vm863_vm8, %v1892_v63, %v1930_v12 }
 0x2d0   :  { %v1942_v33 = vsel %vm1941_vm10, %v1931_v57, -inf }
 0x2d1   :  { %1943 = vmax.xlane.f32.xlu0 %v1942_v33 }
 0x2d5   :  { %1946 = vmax.xlane.f32.xlu0 %v1945_v0 }
 0x35b   :  { %v7937_v12 = vpop.xlane.xlu1 %868 }
 0x35c   :  { %9427 = vst [vmem:[#allocation65_spill] sm:$0xff] %v7937_v12 }
 0x35e   :  { %v7890_v25 = vpop.xlane.xlu0 %1943 }
 0x35f   :  { %9425 = vst [vmem:[#allocation63_spill] sm:$0xff] %v7890_v25  ;;  %v1953_v23 = vrot.slane %v7890_v25, %v7288_v15  ;;  %v1957_v39 = vrot.slane %v7890_v25, %v7291_v17  ;;  %v1961_v32 = vrot.slane %v7890_v25, %v7301_v22  ;;  %v1965_v62 = vrot.slane %v7890_v25, %v7323_v36 }
 0x360   :  { %v1977_v49 = vrot.slane %v7890_v25, %v7352_v60 }
 0x361   :  { %v2030_v19 = vsub.f32 %v7653_v8, %v1953_v23  ;;  %v2031_v47 = vsub.f32 %v7650_v1, %v1957_v39  ;;  %v2032_v46 = vsub.f32 %v7669_v20, %v1961_v32  ;;  %v2033_v42 = vsub.f32 %v7677_v28, %v1965_v62 }
 0x362   :  { %v7898_v37 = vpop.xlane.xlu0 %1946  ;;  %v2036_v38 = vsub.f32 %v7701_v29, %v1977_v49 }
 0x363   :  { %9426 = vst [vmem:[#allocation64_spill] sm:$0xff] %v7898_v37  ;;  %v2046_v26 = vmul.f32 1.442695, %v2030_v19  ;;  %v1985_v50 = vrot.slane %v7898_v37, %v7288_v15  ;;  %v2048_v55 = vmul.f32 1.442695, %v2031_v47  ;;  %v1989_v35 = vrot.slane %v7898_v37, %v7291_v17 }
 0x364   :  { %v1993_v1 = vrot.slane %v7898_v37, %v7301_v22  ;;  %v1997_v34 = vrot.slane %v7898_v37, %v7323_v36  ;;  %v2050_v61 = vmul.f32 1.442695, %v2032_v46  ;;  %v2052_v2 = vmul.f32 1.442695, %v2033_v42 }
 0x365   :  { %6856 = vpow2.f32 %v2046_v26  ;;  %v2038_v58 = vsub.f32 %v7661_v7, %v1985_v50  ;;  %v2039_v8 = vsub.f32 %v7658_v13, %v1989_v35  ;;  %v1969_v7 = vrot.slane %v7890_v25, %v7334_v45 }
 0x366   :  { %6858 = vpow2.f32 %v2048_v55  ;;  %v2040_v59 = vsub.f32 %v7666_v18, %v1993_v1  ;;  %v2001_v13 = vrot.slane %v7898_v37, %v7334_v45  ;;  %v2041_v41 = vsub.f32 %v7674_v27, %v1997_v34  ;;  %v9428_v34 = vld [vmem:[#allocation50_spill] sm:$0xff] }
 0x367   :  { %v2062_v51 = vmul.f32 1.442695, %v2038_v58  ;;  %v2064_v16 = vmul.f32 1.442695, %v2039_v8  ;;  %v1973_v18 = vrot.slane %v7890_v25, %v7343_v53  ;;  %v2034_v28 = vsub.f32 %v7685_v3, %v1969_v7 }
 0x368   :  { %v2066_v20 = vmul.f32 1.442695, %v2040_v59  ;;  %v2005_v27 = vrot.slane %v7898_v37, %v7343_v53  ;;  %v2042_v30 = vsub.f32 %v7682_v31, %v2001_v13  ;;  %v2068_v63 = vmul.f32 1.442695, %v2041_v41  ;;  %v9430_v41 = vld [vmem:[#allocation51_spill] sm:$0xff] }
 0x369   :  { %6860 = vpow2.f32 %v2062_v51  ;;  %v2035_v40 = vsub.f32 %v7693_v44, %v1973_v18  ;;  %v2054_v10 = vmul.f32 1.442695, %v2034_v28  ;;  %v2009_v3 = vrot.slane %v7898_v37, %v7352_v60 }
 0x36a   :  { %6862 = vpow2.f32 %v2064_v16  ;;  %v2043_v57 = vsub.f32 %v7690_v5, %v2005_v27  ;;  %v2070_v11 = vmul.f32 1.442695, %v2042_v30  ;;  %v874_v44 = vrot.slane %v7937_v12, %v7288_v15  ;;  %v9431_v30 = vld [vmem:[#allocation56_spill] sm:$0xff] }
 0x36b   :  { %6864 = vpow2.f32 %v2050_v61  ;;  %v2056_v54 = vmul.f32 1.442695, %v2035_v40  ;;  %v2044_v0 = vsub.f32 %v7698_v24, %v2009_v3  ;;  %v882_v19 = vrot.slane %v7937_v12, %v7301_v22  ;;  %v9429_v61 = vld [vmem:[#allocation53_spill] sm:$0xff]  ;;  %v9432_v40 = vld [vmem:[#allocation54_spill] sm:$0xff] }
 0x36c   :  { %6866 = vpow2.f32 %v2066_v20  ;;  %v2072_v5 = vmul.f32 1.442695, %v2043_v57  ;;  %v911_v47 = vsub.f32 %v7706_v6, %v874_v44  ;;  %v2058_v29 = vmul.f32 1.442695, %v2036_v38 }
 0x36d   :  { %6868 = vpow2.f32 %v2052_v2  ;;  %v878_v24 = vrot.slane %v7937_v12, %v7291_v17  ;;  %v912_v26 = vsub.f32 %v7713_v21, %v874_v44  ;;  %v2074_v50 = vmul.f32 1.442695, %v2044_v0  ;;  %v9433_v44 = vld [vmem:[#allocation16_spill] sm:$0xff] }
 0x36e   :  { %6870 = vpow2.f32 %v2068_v63  ;;  %v886_v6 = vrot.slane %v7937_v12, %v7323_v36  ;;  %v915_v32 = vsub.f32 %v7726_v56, %v882_v19  ;;  %v927_v58 = vmul.f32 1.442695, %v911_v47 }
 0x36f   :  { %v7922_v4 = vpop.eup %6856  ;;  %6872 = vpow2.f32 %v2054_v10  ;;  %v913_v1 = vsub.f32 %v7718_v52, %v878_v24  ;;  %v929_v21 = vmul.f32 1.442695, %v912_v26  ;;  %v890_v46 = vrot.slane %v7937_v12, %v7334_v45 }
 0x370   :  { %v7924_v43 = vpop.eup %6858  ;;  %2095 = vperm.xlu0 %6516, %v7922_v4   ;;  %6874 = vpow2.f32 %v2070_v11  ;;  %v917_v51 = vsub.f32 %v7742_v9, %v886_v6  ;;  %v935_v56 = vmul.f32 1.442695, %v915_v32  ;;  %v914_v59 = vsub.f32 %v9428_v34, %v878_v24 }
 0x371   :  { %2098 = vperm.xlu1 %6515, %v7924_v43   ;;  %6876 = vpow2.f32 %v2056_v54  ;;  %v931_v52 = vmul.f32 1.442695, %v913_v1  ;;  %v894_v42 = vrot.slane %v7937_v12, %v7343_v53  ;;  %v919_v13 = vsub.f32 %v9429_v61, %v890_v46  ;;  %v9434_v54 = vld [vmem:[#allocation58_spill] sm:$0xff]  ;;  %v9439_v1 = vld [vmem:[#allocation55_spill] sm:$0xff]  ;;  %v9443_v61 = vld [vmem:[#allocation57_spill] sm:$0xff] }
 0x372   :  { %6878 = vpow2.f32 %v2072_v5  ;;  %v939_v9 = vmul.f32 1.442695, %v917_v51  ;;  %v916_v20 = vsub.f32 %v9430_v41, %v882_v19  ;;  %v933_v18 = vmul.f32 1.442695, %v914_v59  ;;  %v9435_v19 = vld [vmem:[#allocation52_spill] sm:$0xff]  ;;  %v9442_v59 = vld [vmem:[#allocation62_spill] sm:$0xff] }
 0x373   :  { %v7942_v33 = vpop.eup %6860  ;;  %6880 = vpow2.f32 %v2058_v29  ;;  %v898_v27 = vrot.slane %v7937_v12, %v7352_v60  ;;  %v921_v63 = vsub.f32 %v9431_v30, %v894_v42  ;;  %v943_v49 = vmul.f32 1.442695, %v919_v13 }
 0x374   :  { %v7944_v31 = vpop.eup %6862  ;;  %2119 = vperm.xlu0 %6516, %v7942_v33   ;;  %6882 = vpow2.f32 %v2074_v50  ;;  %v918_v10 = vsub.f32 %v9432_v40, %v886_v6  ;;  %v937_v3 = vmul.f32 1.442695, %v916_v20  ;;  %v902_v38 = vrot.slane %v7937_v12, %v9433_v44  ;;  %v9438_v50 = vld [vmem:[#allocation61_spill] sm:$0xff] }
 0x375   :  { %2122 = vperm.xlu1 %6515, %v7944_v31   ;;  %v7952_v23 = vpop.eup %6864  ;;  %6884 = vpow2.f32 %v927_v58  ;;  %v923_v0 = vsub.f32 %v9434_v54, %v898_v27  ;;  %v947_v5 = vmul.f32 1.442695, %v921_v63  ;;  %v920_v47 = vsub.f32 %v9435_v19, %v890_v46 }
 0x376   :  { %v7954_v39 = vpop.eup %6866  ;;  %6886 = vpow2.f32 %v929_v21  ;;  %v941_v29 = vmul.f32 1.442695, %v918_v10  ;;  %v925_v6 = vsub.f32 %v9438_v50, %v902_v38  ;;  %v1981_v58 = vrot.slane %v7890_v25, %v9433_v44 }
 0x377   :  { %v7964_v55 = vpop.eup %6868  ;;  %6888 = vpow2.f32 %v935_v56  ;;  %v951_v32 = vmul.f32 1.442695, %v923_v0  ;;  %v922_v21 = vsub.f32 %v9439_v1, %v894_v42  ;;  %v945_v46 = vmul.f32 1.442695, %v920_v47 }
 0x378   :  { %2101 = vperm.xlu0 %6516, %v7952_v23   ;;  %v7966_v35 = vpop.eup %6870  ;;  %6890 = vpow2.f32 %v931_v52  ;;  %v955_v34 = vmul.f32 1.442695, %v925_v6  ;;  %v2037_v52 = vsub.f32 %v9442_v59, %v1981_v58  ;;  %v924_v13 = vsub.f32 %v9443_v61, %v898_v27 }
 0x379   :  { %2125 = vperm.xlu1 %6515, %v7954_v39   ;;  %v7974_v8 = vpop.eup %6872  ;;  %6892 = vpow2.f32 %v939_v9  ;;  %v949_v9 = vmul.f32 1.442695, %v922_v21 }
 0x37a   :  { %v7976_v62 = vpop.eup %6874  ;;  %6894 = vpow2.f32 %v933_v18  ;;  %v2060_v20 = vmul.f32 1.442695, %v2037_v52  ;;  %v9446_v18 = vld [vmem:[#allocation59_spill] sm:$0xff]  ;;  %v953_v63 = vmul.f32 1.442695, %v924_v13 }
 0x37b   :  { %v7984_v16 = vpop.eup %6876  ;;  %6896 = vpow2.f32 %v943_v49  ;;  %v926_v30 = vsub.f32 %v9446_v18, %v902_v38  ;;  %v2013_v49 = vrot.slane %v7898_v37, %v9433_v44 }
 0x37c   :  { %2104 = vperm.xlu0 %6516, %v7964_v55   ;;  %v7986_v7 = vpop.eup %6878  ;;  %6898 = vpow2.f32 %v937_v3  ;;  %v9449_v3 = vld [vmem:[#allocation60_spill] sm:$0xff] }
 0x37d   :  { %2128 = vperm.xlu1 %6515, %v7966_v35   ;;  %v7994_v28 = vpop.eup %6880  ;;  %6900 = vpow2.f32 %v947_v5  ;;  %v957_v10 = vmul.f32 1.442695, %v926_v30  ;;  %v2045_v54 = vsub.f32 %v9449_v3, %v2013_v49 }
 0x37e   :  { %v7996_v2 = vpop.eup %6882  ;;  %6902 = vpow2.f32 %v941_v29 }
 0x37f   :  { %v8004_v57 = vpop.eup %6884  ;;  %6904 = vpow2.f32 %v951_v32  ;;  %v2076_v5 = vmul.f32 1.442695, %v2045_v54 }
 0x380   :  { %2107 = vperm.xlu0 %6516, %v7974_v8   ;;  %v8006_v11 = vpop.eup %6886  ;;  %6906 = vpow2.f32 %v945_v46 }
 0x381   :  { %2131 = vperm.xlu1 %6515, %v7976_v62   ;;  %v8014_v24 = vpop.eup %6888  ;;  %6908 = vpow2.f32 %v955_v34 }
 0x382   :  { %9436 = vst [vmem:[#allocation50_spill] sm:$0xff] %v8014_v24  ;;  %v8016_v26 = vpop.eup %6890  ;;  %6910 = vpow2.f32 %v949_v9 }
 0x383   :  { %9437 = vst [vmem:[#allocation53_spill] sm:$0xff] %v8016_v26  ;;  %v8024_v51 = vpop.eup %6892  ;;  %6912 = vpow2.f32 %v2060_v20 }
 0x384   :  { %2110 = vperm.xlu0 %6516, %v7984_v16   ;;  %9440 = vst [vmem:[#allocation51_spill] sm:$0xff] %v8024_v51  ;;  %v8026_v56 = vpop.eup %6894  ;;  %6914 = vpow2.f32 %v953_v63 }
 0x385   :  { %2134 = vperm.xlu1 %6515, %v7986_v7   ;;  %9441 = vst [vmem:[#allocation56_spill] sm:$0xff] %v8026_v56  ;;  %v8032_v41 = vpop.eup %6896  ;;  %6916 = vpow2.f32 %v957_v10 }
 0x386   :  { %9444 = vst [vmem:[#allocation54_spill] sm:$0xff] %v8032_v41  ;;  %v8034_v42 = vpop.eup %6898  ;;  %6918 = vpow2.f32 %v2076_v5 }
 0x387   :  { %9445 = vst [vmem:[#allocation58_spill] sm:$0xff] %v8034_v42  ;;  %v8041_v27 = vpop.eup %6900 }
 0x388   :  { %2113 = vperm.xlu0 %6516, %v7994_v28   ;;  %9447 = vst [vmem:[#allocation52_spill] sm:$0xff] %v8041_v27  ;;  %v8043_v40 = vpop.eup %6902 }
 0x389   :  { %2137 = vperm.xlu1 %6515, %v7996_v2   ;;  %9448 = vst [vmem:[#allocation61_spill] sm:$0xff] %v8043_v40  ;;  %v8048_v0 = vpop.eup %6904 }
 0x38a   :  { %9450 = vst [vmem:[#allocation55_spill] sm:$0xff] %v8048_v0  ;;  %v8050_v38 = vpop.eup %6906 }
 0x38b   :  { %9451 = vst [vmem:[#allocation62_spill] sm:$0xff] %v8050_v38  ;;  %v8054_v19 = vpop.eup %6908 }
 0x38c   :  { %976 = vperm.xlu0 %6516, %v8004_v57   ;;  %9452 = vst [vmem:[#allocation57_spill] sm:$0xff] %v8054_v19  ;;  %v8056_v47 = vpop.eup %6910 }
 0x38d   :  { %979 = vperm.xlu1 %6515, %v8006_v11   ;;  %9453 = vst [vmem:[#allocation59_spill] sm:$0xff] %v8056_v47  ;;  %v8060_v29 = vpop.eup %6912 }
 0x38e   :  { %v8062_v50 = vpop.eup %6914 }
 0x38f   :  { %9454 = vst [vmem:[#allocation60_spill] sm:$0xff] %v8062_v50  ;;  %v8066_v6 = vpop.eup %6916 }
 0x390   :  { %988 = vperm.xlu0 %6516, %v8014_v24   ;;  %9455 = vst [vmem:[#allocation66_spill] sm:$0xff] %v8066_v6  ;;  %v8069_v32 = vpop.eup %6918 }
 0x391   :  { %982 = vperm.xlu1 %6515, %v8016_v26  }
 0x394   :  { %994 = vperm.xlu0 %6516, %v8024_v51  }
 0x395   :  { %985 = vperm.xlu1 %6515, %v8026_v56  }
 0x398   :  { %1000 = vperm.xlu0 %6516, %v8032_v41  }
 0x399   :  { %991 = vperm.xlu1 %6515, %v8034_v42  }
 0x39c   :  { %1006 = vperm.xlu0 %6516, %v8041_v27  }
 0x39d   :  { %997 = vperm.xlu1 %6515, %v8043_v40  }
 0x3a0   :  { %1012 = vperm.xlu0 %6516, %v8048_v0  }
 0x3a1   :  { %1003 = vperm.xlu1 %6515, %v8050_v38  }
 0x3a4   :  { %1018 = vperm.xlu0 %6516, %v8054_v19  }
 0x3a5   :  { %1009 = vperm.xlu1 %6515, %v8056_v47  }
 0x3a8   :  { %2116 = vperm.xlu0 %6516, %v8060_v29  }
 0x3a9   :  { %1015 = vperm.xlu1 %6515, %v8062_v50  }
 0x3ad   :  { %1021 = vperm.xlu1 %6515, %v8066_v6  }
 0x3b1   :  { %2140 = vperm.xlu1 %6515, %v8069_v32  }
 0x3ef   :  { %v2096_v58 = vpop.permute.xlu0 %2095 }
 0x3f0   :  { %v2099_v1 = vpop.permute.xlu1 %2098  ;;  %v2145_v0 = vrot.slane %v2096_v58, %v7807_v48 }
 0x3f1   :  { %v2149_v50 = vrot.slane %v2099_v1, %v7807_v48 }
 0x3f3   :  { %v8072_v21 = vpop.permute.xlu0 %2119  ;;  %v2206_v40 = vsel %vm851_vm1, %v2149_v50, %v2145_v0 }
 0x3f4   :  { %v8074_v46 = vpop.permute.xlu1 %2122  ;;  %v2177_v42 = vrot.slane %v8072_v21, %v7807_v48 }
 0x3f7   :  { %v2102_v34 = vpop.permute.xlu0 %2101 }
 0x3f8   :  { %v8076_v59 = vpop.permute.xlu1 %2125  ;;  %v2153_v47 = vrot.slane %v2102_v34, %v7807_v48  ;;  %v2181_v34 = vrot.slane %v8074_v46, %v7807_v48 }
 0x3fa   :  { %v2207_v24 = vsel %vm853_vm2, %v2153_v47, %v2206_v40 }
 0x3fb   :  { %v2105_v52 = vpop.permute.xlu0 %2104 }
 0x3fc   :  { %v8078_v61 = vpop.permute.xlu1 %2128  ;;  %v2157_v38 = vrot.slane %v2105_v52, %v7807_v48 }
 0x3fe   :  { %v2208_v52 = vsel %vm855_vm3, %v2157_v38, %v2207_v24 }
 0x3ff   :  { %v2108_v13 = vpop.permute.xlu0 %2107 }
 0x400   :  { %v8080_v9 = vpop.permute.xlu1 %2131  ;;  %v2161_v51 = vrot.slane %v2108_v13, %v7807_v48 }
 0x402   :  { %v2209_v46 = vsel %vm857_vm4, %v2161_v51, %v2208_v52 }
 0x403   :  { %v2111_v20 = vpop.permute.xlu0 %2110 }
 0x404   :  { %v8082_v18 = vpop.permute.xlu1 %2134  ;;  %v2165_v56 = vrot.slane %v2111_v20, %v7807_v48 }
 0x407   :  { %v2114_v30 = vpop.permute.xlu0 %2113 }
 0x408   :  { %v8084_v63 = vpop.permute.xlu1 %2137  ;;  %v2169_v26 = vrot.slane %v2114_v30, %v7807_v48 }
 0x40b   :  { %v977_v49 = vpop.permute.xlu0 %976 }
 0x40c   :  { %v980_v10 = vpop.permute.xlu1 %979  ;;  %v1026_v21 = vrot.slane %v977_v49, %v7807_v48 }
 0x40d   :  { %v1030_v13 = vrot.slane %v980_v10, %v7810_v14 }
 0x40f   :  { %v989_v3 = vpop.permute.xlu0 %988 }
 0x410   :  { %v983_v54 = vpop.permute.xlu1 %982  ;;  %v1044_v24 = vrot.slane %v989_v3, %v7807_v48 }
 0x411   :  { %v1035_v40 = vrot.slane %v983_v54, %v7807_v48 }
 0x413   :  { %v995_v5 = vpop.permute.xlu0 %994 }
 0x414   :  { %v986_v12 = vpop.permute.xlu1 %985  ;;  %v1053_v30 = vrot.slane %v995_v5, %v7807_v48 }
 0x415   :  { %v1039_v1 = vrot.slane %v986_v12, %v7810_v14  ;;  %v2185_v12 = vrot.slane %v8076_v59, %v7807_v48 }
 0x417   :  { %v1001_v37 = vpop.permute.xlu0 %1000  ;;  %v1040_v20 = vsel %vm786_vm5, %v1039_v1, %v1035_v40  ;;  %v2189_v40 = vrot.slane %v8078_v61, %v7807_v48  ;;  %v2197_v61 = vrot.slane %v8082_v18, %v7807_v48 }
 0x418   :  { %v992_v25 = vpop.permute.xlu1 %991  ;;  %v1062_v54 = vrot.slane %v1001_v37, %v7807_v48 }
 0x419   :  { %v1048_v0 = vrot.slane %v992_v25, %v7810_v14  ;;  %v2210_v25 = vsel %vm859_vm6, %v2165_v56, %v2209_v46 }
 0x41a   :  { %v2211_v3 = vsel %vm861_vm7, %v2169_v26, %v2210_v25 }
 0x41b   :  { %v1007_v6 = vpop.permute.xlu0 %1006 }
 0x41c   :  { %v998_v19 = vpop.permute.xlu1 %997  ;;  %v1071_v1 = vrot.slane %v1007_v6, %v7807_v48  ;;  %v2213_v6 = vsel %vm851_vm1, %v2181_v34, %v2177_v42 }
 0x41d   :  { %v1057_v47 = vrot.slane %v998_v19, %v7810_v14  ;;  %v1049_v19 = vsel %vm786_vm5, %v1048_v0, %v1044_v24  ;;  %v2214_v42 = vsel %vm853_vm2, %v2185_v12, %v2213_v6 }
 0x41f   :  { %v1013_v27 = vpop.permute.xlu0 %1012  ;;  %v1058_v56 = vsel %vm786_vm5, %v1057_v47, %v1053_v30  ;;  %v2193_v47 = vrot.slane %v8080_v9, %v7807_v48  ;;  %v2201_v9 = vrot.slane %v8084_v63, %v7807_v48  ;;  %v2215_v30 = vsel %vm855_vm3, %v2189_v40, %v2214_v42 }
 0x420   :  { %v1004_v41 = vpop.permute.xlu1 %1003  ;;  %v1080_v0 = vrot.slane %v1013_v27, %v7807_v48 }
 0x421   :  { %v1066_v38 = vrot.slane %v1004_v41, %v7810_v14  ;;  %v1031_v41 = vsel %vm786_vm5, %v1030_v13, %v1026_v21  ;;  %v2216_v18 = vsel %vm857_vm4, %v2193_v47, %v2215_v30 }
 0x422   :  { %v1095_v52 = vsel %vm851_vm1, %v1040_v20, %v1031_v41 }
 0x423   :  { %v1019_v58 = vpop.permute.xlu0 %1018  ;;  %v1096_v26 = vsel %vm853_vm2, %v1049_v19, %v1095_v52 }
 0x424   :  { %v1010_v50 = vpop.permute.xlu1 %1009  ;;  %v1097_v46 = vsel %vm855_vm3, %v1058_v56, %v1096_v26  ;;  %v1089_v25 = vrot.slane %v1019_v58, %v7807_v48 }
 0x425   :  { %v1075_v49 = vrot.slane %v1010_v50, %v7810_v14  ;;  %v1067_v50 = vsel %vm786_vm5, %v1066_v38, %v1062_v54  ;;  %v2217_v54 = vsel %vm859_vm6, %v2197_v61, %v2216_v18 }
 0x426   :  { %v1098_v38 = vsel %vm857_vm4, %v1067_v50, %v1097_v46  ;;  %v2218_v63 = vsel %vm861_vm7, %v2201_v9, %v2217_v54 }
 0x427   :  { %v2117_v10 = vpop.permute.xlu0 %2116  ;;  %v1076_v13 = vsel %vm786_vm5, %v1075_v49, %v1071_v1 }
 0x428   :  { %v1016_v59 = vpop.permute.xlu1 %1015  ;;  %v2173_v51 = vrot.slane %v2117_v10, %v7807_v48  ;;  %v1099_v34 = vsel %vm859_vm6, %v1076_v13, %v1098_v38 }
 0x429   :  { %v1084_v5 = vrot.slane %v1016_v59, %v7810_v14 }
 0x42a   :  { %v2212_v37 = vsel %vm863_vm8, %v2173_v51, %v2211_v3 }
 0x42b   :  { %v2222_v21 = vsel %vm1941_vm10, %v2212_v37, 0.0  ;;  %v1085_v27 = vsel %vm786_vm5, %v1084_v5, %v1080_v0 }
 0x42c   :  { %v1022_v24 = vpop.permute.xlu1 %1021  ;;  %2223 = vadd.xlane.f32.xlu0 %v2222_v21  ;;  %v1100_v10 = vsel %vm861_vm7, %v1085_v27, %v1099_v34 }
 0x42d   :  { %v1093_v20 = vrot.slane %v1022_v24, %v7810_v14 }
 0x42f   :  { %v1094_v49 = vsel %vm786_vm5, %v1093_v20, %v1089_v25 }
 0x430   :  { %v2141_v19 = vpop.permute.xlu1 %2140  ;;  %v1101_v58 = vsel %vm863_vm8, %v1094_v49, %v1100_v10 }
 0x431   :  { %v2205_v12 = vrot.slane %v2141_v19, %v7807_v48  ;;  %v1103_v59 = vsel %vm866_vm9, %v1101_v58, 0.0 }
 0x432   :  { %1104 = vadd.xlane.f32.xlu0 %v1103_v59 }
 0x433   :  { %v2219_v51 = vsel %vm863_vm8, %v2205_v12, %v2218_v63 }
 0x434   :  { %v2225_v3 = vsel %vm1941_vm10, %v2219_v51, 0.0 }
 0x435   :  { %2226 = vadd.xlane.f32.xlu1 %v2225_v3 }
 0x4b9   :  { %v2224_v41 = vpop.xlane.xlu0 %2223 }
 0x4ba   :  { %6920 = vrcp.f32 %v2224_v41 }
 0x4bf   :  { %v1105_v9 = vpop.xlane.xlu0 %1104 }
 0x4c2   :  { %v2227_v56 = vpop.xlane.xlu1 %2226 }
 0x4c3   :  { %6922 = vrcp.f32 %v2227_v56 }
 0x4c4   :  { %v8157_v1 = vpop.eup %6920  ;;  %6924 = vrcp.f32 %v1105_v9  ;;  %v9456_v9 = vld [vmem:[#allocation53_spill] sm:$0xff] }
 0x4c5   :  { %v2239_v5 = vrot.slane %v8157_v1, %v7291_v17  ;;  %v2235_v52 = vrot.slane %v8157_v1, %v7288_v15  ;;  %v2243_v21 = vrot.slane %v8157_v1, %v7301_v22  ;;  %v2247_v27 = vrot.slane %v8157_v1, %v7323_v36 }
 0x4c6   :  { %v2259_v41 = vrot.slane %v8157_v1, %v7352_v60 }
 0x4c7   :  { %v2313_v50 = vmul.f32 %v7924_v43, %v2239_v5  ;;  %v2312_v0 = vmul.f32 %v7922_v4, %v2235_v52  ;;  %v2314_v43 = vmul.f32 %v7952_v23, %v2243_v21  ;;  %v2315_v30 = vmul.f32 %v7964_v55, %v2247_v27 }
 0x4c8   :  { %v2251_v23 = vrot.slane %v8157_v1, %v7334_v45  ;;  %v2255_v55 = vrot.slane %v8157_v1, %v7343_v53 }
 0x4c9   :  { %v2333_v37 = vpack.c.bf16 %v2313_v50, %v2313_v50  ;;  %v2332_v40 = vpack.c.bf16 %v2312_v0, %v2312_v0  ;;  %v2334_v34 = vpack.c.bf16 %v2314_v43, %v2314_v43  ;;  %v2335_v19 = vpack.c.bf16 %v2315_v30, %v2315_v30  ;;  %v9457_v30 = vld [vmem:[#allocation56_spill] sm:$0xff] }
 0x4ca   :  { %v2316_v58 = vmul.f32 %v7974_v8, %v2251_v23  ;;  %v2317_v3 = vmul.f32 %v7984_v16, %v2255_v55  ;;  %v2318_v0 = vmul.f32 %v7994_v28, %v2259_v41 }
 0x4cb   :  { %v2366_v26 = vunpack.c.l.b16 %v2333_v37  ;;  %v2365_v13 = vunpack.c.l.b16 %v2332_v40  ;;  %v2367_v18 = vunpack.c.l.b16 %v2334_v34  ;;  %v2263_v37 = vrot.slane %v8157_v1, %v9433_v44 }
 0x4cc   :  { %v2336_v51 = vpack.c.bf16 %v2316_v58, %v2316_v58  ;;  %v2337_v50 = vpack.c.bf16 %v2317_v3, %v2317_v3  ;;  %v9460_v58 = vld [vmem:[#allocation51_spill] sm:$0xff]  ;;  %v9463_v3 = vld [vmem:[#allocation54_spill] sm:$0xff] }
 0x4cd   :  { %v8167_v6 = vpop.eup %6922  ;;  %2385 = vperm.xlu1 %6515, %v2366_v26   ;;  %2382 = vperm.xlu0 %6516, %v2365_v13  }
 0x4ce   :  { %v2267_v47 = vrot.slane %v8167_v6, %v7288_v15  ;;  %v2271_v46 = vrot.slane %v8167_v6, %v7291_v17  ;;  %v2275_v4 = vrot.slane %v8167_v6, %v7301_v22  ;;  %v2279_v25 = vrot.slane %v8167_v6, %v7323_v36  ;;  %v8204_v16 = vpop.eup %6924 }
 0x4cf   :  { %v2283_v49 = vrot.slane %v8167_v6, %v7334_v45  ;;  %v2287_v63 = vrot.slane %v8167_v6, %v7343_v53  ;;  %v2291_v52 = vrot.slane %v8167_v6, %v7352_v60  ;;  %v2370_v21 = vunpack.c.l.b16 %v2337_v50 }
 0x4d0   :  { %v2320_v24 = vmul.f32 %v7942_v33, %v2267_v47  ;;  %v2321_v61 = vmul.f32 %v7944_v31, %v2271_v46  ;;  %v2322_v38 = vmul.f32 %v7954_v39, %v2275_v4  ;;  %v2323_v39 = vmul.f32 %v7966_v35, %v2279_v25 }
 0x4d1   :  { %v2324_v59 = vmul.f32 %v7976_v62, %v2283_v49  ;;  %v2368_v35 = vunpack.c.l.b16 %v2335_v19  ;;  %v2325_v5 = vmul.f32 %v7986_v7, %v2287_v63  ;;  %v2369_v62 = vunpack.c.l.b16 %v2336_v51  ;;  %v9458_v49 = vld [vmem:[#allocation50_spill] sm:$0xff]  ;;  %v9461_v63 = vld [vmem:[#allocation61_spill] sm:$0xff] }
 0x4d2   :  { %v2340_v20 = vpack.c.bf16 %v2320_v24, %v2320_v24  ;;  %v2341_v42 = vpack.c.bf16 %v2321_v61, %v2321_v61  ;;  %v2342_v31 = vpack.c.bf16 %v2322_v38, %v2322_v38  ;;  %v2343_v12 = vpack.c.bf16 %v2323_v39, %v2323_v39 }
 0x4d3   :  { %v2344_v56 = vpack.c.bf16 %v2324_v59, %v2324_v59  ;;  %v2345_v26 = vpack.c.bf16 %v2325_v5, %v2325_v5  ;;  %v2326_v13 = vmul.f32 %v7996_v2, %v2291_v52  ;;  %v2295_v7 = vrot.slane %v8167_v6, %v9433_v44 }
 0x4d4   :  { %v2373_v33 = vunpack.c.l.b16 %v2340_v20  ;;  %v2374_v10 = vunpack.c.l.b16 %v2341_v42  ;;  %v2375_v54 = vunpack.c.l.b16 %v2342_v31  ;;  %v2376_v8 = vunpack.c.l.b16 %v2343_v12 }
 0x4d5   :  { %v2377_v40 = vunpack.c.l.b16 %v2344_v56  ;;  %v2338_v47 = vpack.c.bf16 %v2318_v0, %v2318_v0  ;;  %v2319_v46 = vmul.f32 %v8060_v29, %v2263_v37  ;;  %v2378_v4 = vunpack.c.l.b16 %v2345_v26 }
 0x4d6   :  { %2406 = vperm.xlu1 %6515, %v2373_v33   ;;  %2409 = vperm.xlu0 %6516, %v2374_v10   ;;  %v2346_v28 = vpack.c.bf16 %v2326_v13, %v2326_v13  ;;  %v2327_v43 = vmul.f32 %v8069_v32, %v2295_v7  ;;  %v1111_v1 = vrot.slane %v8204_v16, %v7288_v15  ;;  %v9459_v10 = vld [vmem:[#allocation58_spill] sm:$0xff]  ;;  %v9462_v51 = vmov 0.0   ;;  %v9465_v13 = vld [vmem:[#allocation52_spill] sm:$0xff] }
 0x4d7   :  { %v2371_v27 = vunpack.c.l.b16 %v2338_v47  ;;  %v2339_v2 = vpack.c.bf16 %v2319_v46, %v2319_v46  ;;  %v1115_v6 = vrot.slane %v8204_v16, %v7291_v17  ;;  %v1119_v32 = vrot.slane %v8204_v16, %v7301_v22  ;;  %6471 = vmatprep.mubr.msk.bf16.mxu1 %vm7148_vm11, %v9462_v51  ;;  %6465 = vmatprep.mubr.msk.bf16.mxu0 %vm7148_vm11, %v9462_v51  ;;  %v9467_v46 = vld [vmem:[#allocation55_spill] sm:$0xff] }
 0x4d8   :  { %v2379_v24 = vunpack.c.l.b16 %v2346_v28  ;;  %v2347_v61 = vpack.c.bf16 %v2327_v43, %v2327_v43  ;;  %v1148_v38 = vmul.f32 %v8004_v57, %v1111_v1  ;;  %v1149_v29 = vmul.f32 %v8006_v11, %v1111_v1  ;;  %v9468_v28 = vld [vmem:[#allocation60_spill] sm:$0xff] }
 0x4d9   :  { %v2372_v25 = vunpack.c.l.b16 %v2339_v2  ;;  %v1150_v34 = vmul.f32 %v9456_v9, %v1115_v6  ;;  %v1151_v23 = vmul.f32 %v9457_v30, %v1115_v6  ;;  %v1152_v33 = vmul.f32 %v9458_v49, %v1119_v32 }
 0x4da   :  { %2388 = vperm.xlu1 %6515, %v2367_v18   ;;  %2412 = vperm.xlu0 %6516, %v2375_v54   ;;  %v2380_v20 = vunpack.c.l.b16 %v2347_v61  ;;  %v1166_v42 = vpack.c.bf16 %v1149_v29, %v1148_v38  ;;  %v1153_v57 = vmul.f32 %v9459_v10, %v1119_v32  ;;  %v1123_v11 = vrot.slane %v8204_v16, %v7323_v36  ;;  %v9469_v29 = vld [vmem:[#allocation57_spill] sm:$0xff]  ;;  %v9470_v32 = vld [vmem:[#allocation66_spill] sm:$0xff] }
 0x4db   :  { %v1167_v18 = vpack.c.bf16 %v1151_v23, %v1150_v34  ;;  %v1127_v54 = vrot.slane %v8204_v16, %v7334_v45  ;;  %v1131_v50 = vrot.slane %v8204_v16, %v7343_v53  ;;  %v1135_v37 = vrot.slane %v8204_v16, %v7352_v60 }
 0x4dc   :  { %v1184_v31 = vunpack.c.h.b16 %v1166_v42  ;;  %v1183_v39 = vunpack.c.l.b16 %v1166_v42  ;;  %v1168_v19 = vpack.c.bf16 %v1153_v57, %v1152_v33  ;;  %v1154_v55 = vmul.f32 %v9460_v58, %v1123_v11 }
 0x4dd   :  { %v1186_v12 = vunpack.c.h.b16 %v1167_v18  ;;  %v1185_v59 = vunpack.c.l.b16 %v1167_v18  ;;  %v1156_v41 = vmul.f32 %v9463_v3, %v1127_v54  ;;  %v1158_v7 = vmul.f32 %v9465_v13, %v1131_v50 }
 0x4de   :  { %2391 = vperm.xlu1 %6515, %v2368_v35   ;;  %2415 = vperm.xlu0 %6516, %v2376_v8   ;;  %v1155_v35 = vmul.f32 %v9461_v63, %v1123_v11  ;;  %v9464_v8 = vld [vmem:[#allocation62_spill] sm:$0xff]  ;;  %v1188_v5 = vunpack.c.h.b16 %v1168_v19  ;;  %v1187_v52 = vunpack.c.l.b16 %v1168_v19  ;;  %v1161_v43 = vmul.f32 %v9468_v28, %v1135_v37 }
 0x4df   :  { %v1157_v56 = vmul.f32 %v9464_v8, %v1127_v54  ;;  %v1139_v6 = vrot.slane %v8204_v16, %v9433_v44  ;;  %v6568_v16 = vld [vmem:[#allocation7 + $0x84] ss:$8 sps:$4 sm:$0xff]  }
 0x4e0   :  { %2682 = vmatprep.subr.bf16.mxu0 %v6568_v16 }
 0x4e1   :  { %v1170_v0 = vpack.c.bf16 %v1157_v56, %v1156_v41 }
 0x4e2   :  { %2394 = vperm.xlu1 %6515, %v2369_v62   ;;  %2418 = vperm.xlu0 %6516, %v2377_v40   ;;  %v1169_v62 = vpack.c.bf16 %v1155_v35, %v1154_v55 }
 0x4e3   :  { %v1192_v1 = vunpack.c.h.b16 %v1170_v0 }
 0x4e4   :  { %v1190_v40 = vunpack.c.h.b16 %v1169_v62  ;;  %v1189_v26 = vunpack.c.l.b16 %v1169_v62 }
 0x4e6   :  { %2397 = vperm.xlu1 %6515, %v2370_v21   ;;  %2421 = vperm.xlu0 %6516, %v2378_v4   ;;  %v9466_v21 = vld [vmem:[#allocation59_spill] sm:$0xff]  ;;  %v1160_v4 = vmul.f32 %v9467_v46, %v1135_v37 }
 0x4e7   :  { %v1159_v47 = vmul.f32 %v9466_v21, %v1131_v50 }
 0x4e9   :  { %v1171_v2 = vpack.c.bf16 %v1159_v47, %v1158_v7 }
 0x4ea   :  { %2400 = vperm.xlu1 %6515, %v2371_v27   ;;  %2424 = vperm.xlu0 %6516, %v2379_v24   ;;  %v1191_v27 = vunpack.c.l.b16 %v1170_v0  ;;  %v1172_v24 = vpack.c.bf16 %v1161_v43, %v1160_v4 }
 0x4eb   :  { %v1194_v61 = vunpack.c.h.b16 %v1171_v2  ;;  %v1193_v38 = vunpack.c.l.b16 %v1171_v2 }
 0x4ec   :  { %v1196_v42 = vunpack.c.h.b16 %v1172_v24  ;;  %v1195_v9 = vunpack.c.l.b16 %v1172_v24 }
 0x4ee   :  { %2403 = vperm.xlu1 %6515, %v2372_v25   ;;  %2427 = vperm.xlu0 %6516, %v2380_v20   ;;  %v1162_v25 = vmul.f32 %v9469_v29, %v1139_v6  ;;  %v1163_v20 = vmul.f32 %v9470_v32, %v1139_v6 }
 0x4f0   :  { %v1173_v34 = vpack.c.bf16 %v1163_v20, %v1162_v25 }
 0x4f2   :  { %1203 = vperm.xlu0 %6516, %v1184_v31   ;;  %1200 = vperm.xlu1 %6515, %v1183_v39   ;;  %v1198_v30 = vunpack.c.h.b16 %v1173_v34  ;;  %v1197_v23 = vunpack.c.l.b16 %v1173_v34  ;;  %v9471_v34 = vmov 0  }
 0x4f6   :  { %1209 = vperm.xlu0 %6516, %v1186_v12   ;;  %1206 = vperm.xlu1 %6515, %v1185_v59  }
 0x4fa   :  { %1215 = vperm.xlu0 %6516, %v1188_v5   ;;  %1212 = vperm.xlu1 %6515, %v1187_v52  }
 0x4fe   :  { %1221 = vperm.xlu0 %6516, %v1190_v40   ;;  %1218 = vperm.xlu1 %6515, %v1189_v26  }
 0x502   :  { %1227 = vperm.xlu0 %6516, %v1192_v1   ;;  %1224 = vperm.xlu1 %6515, %v1191_v27  }
 0x506   :  { %1233 = vperm.xlu0 %6516, %v1194_v61   ;;  %1230 = vperm.xlu1 %6515, %v1193_v38  }
 0x50a   :  { %1239 = vperm.xlu0 %6516, %v1196_v42   ;;  %1236 = vperm.xlu1 %6515, %v1195_v9  }
 0x50e   :  { %1245 = vperm.xlu0 %6516, %v1198_v30   ;;  %1242 = vperm.xlu1 %6515, %v1197_v23  }
 0x54c   :  { %v2386_v49 = vpop.permute.xlu1 %2385  ;;  %v2383_v33 = vpop.permute.xlu0 %2382 }
 0x54d   :  { %v2436_v12 = vrot.slane %v2386_v49, %v7807_v48  ;;  %v2432_v59 = vrot.slane %v2383_v33, %v7807_v48 }
 0x54f   :  { %v2493_v0 = vsel %vm851_vm1, %v2436_v12, %v2432_v59 }
 0x555   :  { %v2407_v10 = vpop.permute.xlu1 %2406  ;;  %v2410_v57 = vpop.permute.xlu0 %2409 }
 0x556   :  { %v2464_v63 = vrot.slane %v2407_v10, %v7807_v48  ;;  %v2468_v35 = vrot.slane %v2410_v57, %v7807_v48 }
 0x558   :  { %v2500_v37 = vsel %vm851_vm1, %v2468_v35, %v2464_v63 }
 0x559   :  { %v2389_v11 = vpop.permute.xlu1 %2388  ;;  %v2413_v31 = vpop.permute.xlu0 %2412 }
 0x55a   :  { %v2440_v3 = vrot.slane %v2389_v11, %v7807_v48  ;;  %v2472_v41 = vrot.slane %v2413_v31, %v7807_v48 }
 0x55c   :  { %v2494_v13 = vsel %vm853_vm2, %v2440_v3, %v2493_v0  ;;  %v2501_v7 = vsel %vm853_vm2, %v2472_v41, %v2500_v37 }
 0x55d   :  { %v2392_v39 = vpop.permute.xlu1 %2391  ;;  %v2416_v18 = vpop.permute.xlu0 %2415 }
 0x55e   :  { %v2444_v8 = vrot.slane %v2392_v39, %v7807_v48  ;;  %v2476_v56 = vrot.slane %v2416_v18, %v7807_v48 }
 0x560   :  { %v2495_v46 = vsel %vm855_vm3, %v2444_v8, %v2494_v13  ;;  %v2502_v4 = vsel %vm855_vm3, %v2476_v56, %v2501_v7 }
 0x561   :  { %v2395_v19 = vpop.permute.xlu1 %2394  ;;  %v2419_v58 = vpop.permute.xlu0 %2418 }
 0x562   :  { %v2448_v5 = vrot.slane %v2395_v19, %v7807_v48  ;;  %v2480_v52 = vrot.slane %v2419_v58, %v7807_v48 }
 0x564   :  { %v2496_v28 = vsel %vm857_vm4, %v2448_v5, %v2495_v46  ;;  %v2503_v43 = vsel %vm857_vm4, %v2480_v52, %v2502_v4 }
 0x565   :  { %v2398_v55 = vpop.permute.xlu1 %2397  ;;  %v2422_v54 = vpop.permute.xlu0 %2421 }
 0x566   :  { %v2452_v40 = vrot.slane %v2398_v55, %v7807_v48  ;;  %v2484_v26 = vrot.slane %v2422_v54, %v7807_v48 }
 0x568   :  { %v2497_v2 = vsel %vm859_vm6, %v2452_v40, %v2496_v28  ;;  %v2504_v6 = vsel %vm859_vm6, %v2484_v26, %v2503_v43 }
 0x569   :  { %v2401_v62 = vpop.permute.xlu1 %2400  ;;  %v2425_v50 = vpop.permute.xlu0 %2424 }
 0x56a   :  { %v2456_v21 = vrot.slane %v2401_v62, %v7807_v48  ;;  %v2488_v47 = vrot.slane %v2425_v50, %v7807_v48 }
 0x56c   :  { %v2498_v38 = vsel %vm861_vm7, %v2456_v21, %v2497_v2  ;;  %v2505_v29 = vsel %vm861_vm7, %v2488_v47, %v2504_v6 }
 0x56d   :  { %v2404_v1 = vpop.permute.xlu1 %2403  ;;  %v2428_v27 = vpop.permute.xlu0 %2427 }
 0x56e   :  { %v2460_v24 = vrot.slane %v2404_v1, %v7807_v48  ;;  %v2492_v61 = vrot.slane %v2428_v27, %v7807_v48 }
 0x570   :  { %v2499_v25 = vsel %vm863_vm8, %v2460_v24, %v2498_v38  ;;  %v2506_v32 = vsel %vm863_vm8, %v2492_v61, %v2505_v29  ;;  %v6566_v38 = vld [vmem:[#allocation7 + $0x80] ss:$8 sps:$4 sm:$0xff]  }
 0x571   :  { %v2507_v20 = vpack.c.b16 %v2506_v32, %v2499_v25  ;;  %v1201_v42 = vpop.permute.xlu1 %1200  ;;  %v1204_v9 = vpop.permute.xlu0 %1203  ;;  %v6571_v25 = vld [vmem:[#allocation7 + $0x94] ss:$8 sps:$4 sm:$0xff]   ;;  %v6569_v32 = vld [vmem:[#allocation7 + $0x90] ss:$8 sps:$4 sm:$0xff]  }
 0x572   :  { %v1250_v54 = vrot.slane %v1201_v42, %v7807_v48  ;;  %v1254_v12 = vrot.slane %v1204_v9, %v7810_v14  ;;  %v6572_v42 = vld [vmem:[#allocation7 + $0xa0] ss:$8 sps:$4 sm:$0xff]   ;;  %v6577_v9 = vld [vmem:[#allocation7 + $0xb4] ss:$8 sps:$4 sm:$0xff]  }
 0x573   :  { %6472 = vmatmul.mubr.msk.bf16.vlgmr.msra.gmra.mrb[8].mxu1 %vm1941_vm10, %v2507_v20  ;;  %v6574_v20 = vld [vmem:[#allocation7 + $0xa4] ss:$8 sps:$4 sm:$0xff]  }
 0x574   :  { %2854 = vmatprep.mubr.bf16.mxu1 %v9471_v34  ;;  %v1255_v50 = vsel %vm786_vm5, %v1254_v12, %v1250_v54  ;;  %v6601_v54 = vld [vmem:[#allocation8 + $0xb4] ss:$8 sps:$4 sm:$0xff]   ;;  %v6599_v12 = vld [vmem:[#allocation8 + $0xb0] ss:$8 sps:$4 sm:$0xff]  }
 0x575   :  { %v1207_v30 = vpop.permute.xlu1 %1206  ;;  %v1210_v23 = vpop.permute.xlu0 %1209 }
 0x576   :  { %v1259_v31 = vrot.slane %v1207_v30, %v7807_v48  ;;  %v1263_v39 = vrot.slane %v1210_v23, %v7810_v14  ;;  %v6575_v30 = vld [vmem:[#allocation7 + $0xb0] ss:$8 sps:$4 sm:$0xff]   ;;  %v6580_v23 = vld [vmem:[#allocation7 + $0xc4] ss:$8 sps:$4 sm:$0xff]  }
 0x578   :  { %v1264_v41 = vsel %vm786_vm5, %v1263_v39, %v1259_v31  ;;  %v6592_v31 = vld [vmem:[#allocation8 + $0x84] ss:$8 sps:$4 sm:$0xff]   ;;  %v6595_v39 = vld [vmem:[#allocation8 + $0x94] ss:$8 sps:$4 sm:$0xff]  }
 0x579   :  { %v1213_v16 = vpop.permute.xlu1 %1212  ;;  %v1216_v49 = vpop.permute.xlu0 %1215  ;;  %v1319_v26 = vsel %vm851_vm1, %v1264_v41, %v1255_v50  ;;  %2822 = vmatprep.subr.bf16.mxu1 %v6592_v31  ;;  %v6608_v41 = vld [vmem:[#allocation8 + $0xe0] ss:$8 sps:$4 sm:$0xff]   ;;  %v6241_v50 = vld [vmem:[%s9270_s8 + $0x4] ss:$0 sm:$0xff] }
 0x57a   :  { %v1268_v18 = vrot.slane %v1213_v16, %v7807_v48  ;;  %v1272_v19 = vrot.slane %v1216_v49, %v7810_v14  ;;  %v6578_v16 = vld [vmem:[#allocation7 + $0xc0] ss:$8 sps:$4 sm:$0xff]   ;;  %v6581_v49 = vld [vmem:[#allocation7 + $0xd0] ss:$8 sps:$4 sm:$0xff]  }
 0x57c   :  { %v1273_v5 = vsel %vm786_vm5, %v1272_v19, %v1268_v18  ;;  %v6587_v18 = vld [vmem:[#allocation7 + $0xf0] ss:$8 sps:$4 sm:$0xff]  }
 0x57d   :  { %v1219_v33 = vpop.permute.xlu1 %1218  ;;  %v1222_v10 = vpop.permute.xlu0 %1221  ;;  %v1320_v7 = vsel %vm853_vm2, %v1273_v5, %v1319_v26  ;;  %v6593_v19 = vld [vmem:[#allocation8 + $0x90] ss:$8 sps:$4 sm:$0xff]  }
 0x57e   :  { %v1277_v59 = vrot.slane %v1219_v33, %v7807_v48  ;;  %v1281_v63 = vrot.slane %v1222_v10, %v7810_v14  ;;  %v6583_v33 = vld [vmem:[#allocation7 + $0xd4] ss:$8 sps:$4 sm:$0xff]   ;;  %v6584_v10 = vld [vmem:[#allocation7 + $0xe0] ss:$8 sps:$4 sm:$0xff]   ;;  %v6611_v5 = vld [vmem:[#allocation8 + $0xf0] ss:$8 sps:$4 sm:$0xff]  }
 0x580   :  { %v1282_v0 = vsel %vm786_vm5, %v1281_v63, %v1277_v59  ;;  %v6604_v59 = vld [vmem:[#allocation8 + $0xc4] ss:$8 sps:$4 sm:$0xff]   ;;  %v6602_v63 = vld [vmem:[#allocation8 + $0xc0] ss:$8 sps:$4 sm:$0xff]  }
 0x581   :  { %v1225_v57 = vpop.permute.xlu1 %1224  ;;  %v1228_v11 = vpop.permute.xlu0 %1227  ;;  %v1321_v47 = vsel %vm855_vm3, %v1282_v0, %v1320_v7 }
 0x582   :  { %v1286_v35 = vrot.slane %v1225_v57, %v7807_v48  ;;  %v1290_v3 = vrot.slane %v1228_v11, %v7810_v14  ;;  %v6589_v57 = vld [vmem:[#allocation7 + $0xf4] ss:$8 sps:$4 sm:$0xff]   ;;  %v6590_v11 = vld [vmem:[#allocation8 + $0x80] ss:$8 sps:$4 sm:$0xff]  }
 0x583   :  { %2823 = vmatpush1.bf16.msra.mxu1 %v6590_v11 }
 0x584   :  { %v1291_v13 = vsel %vm786_vm5, %v1290_v3, %v1286_v35  ;;  %2824 = vmatprep.subr.bf16.mxu1 %v6595_v39  ;;  %v6607_v35 = vld [vmem:[#allocation8 + $0xd4] ss:$8 sps:$4 sm:$0xff]   ;;  %v6605_v3 = vld [vmem:[#allocation8 + $0xd0] ss:$8 sps:$4 sm:$0xff]   ;;  %v9475_v39 = vld [vmem:[#allocation17_spill] sm:$0xff] }
 0x585   :  { %v1231_v58 = vpop.permute.xlu1 %1230  ;;  %v1234_v55 = vpop.permute.xlu0 %1233  ;;  %v1322_v43 = vsel %vm857_vm4, %v1291_v13, %v1321_v47  ;;  %v6242_v13 = vld [vmem:[%s9270_s8 + $0x5] ss:$0 sm:$0xff] }
 0x586   :  { %v1295_v8 = vrot.slane %v1231_v58, %v7807_v48  ;;  %v1299_v56 = vrot.slane %v1234_v55, %v7810_v14  ;;  %v6598_v58 = vld [vmem:[#allocation8 + $0xa4] ss:$8 sps:$4 sm:$0xff]   ;;  %v6596_v55 = vld [vmem:[#allocation8 + $0xa0] ss:$8 sps:$4 sm:$0xff]  }
 0x587   :  { %2825 = vmatpush1.bf16.msra.mxu1 %v6593_v19 }
 0x588   :  { %v1300_v21 = vsel %vm786_vm5, %v1299_v56, %v1295_v8  ;;  %2826 = vmatprep.subr.bf16.mxu1 %v6598_v58  ;;  %v6610_v8 = vld [vmem:[#allocation8 + $0xe4] ss:$8 sps:$4 sm:$0xff]   ;;  %v6613_v56 = vld [vmem:[#allocation8 + $0xf4] ss:$8 sps:$4 sm:$0xff]  }
 0x589   :  { %v1237_v52 = vpop.permute.xlu1 %1236  ;;  %v1240_v62 = vpop.permute.xlu0 %1239  ;;  %v1323_v2 = vsel %vm859_vm6, %v1300_v21, %v1322_v43 }
 0x58a   :  { %v1304_v37 = vrot.slane %v1237_v52, %v7807_v48  ;;  %v1308_v40 = vrot.slane %v1240_v62, %v7810_v14  ;;  %v9472_v52 = vld [vmem:[#allocation63_spill] sm:$0xff]  ;;  %v9473_v62 = vld [vmem:[#allocation64_spill] sm:$0xff] }
 0x58b   :  { %2827 = vmatpush1.bf16.msra.mxu1 %v6596_v55  ;;  %vm2328_vm12 = vcmp.gt.f32.partialorder %v9472_v52, -1e+20  ;;  %vm2329_vm13 = vcmp.gt.f32.partialorder %v9473_v62, -1e+20 }
 0x58c   :  { %v1309_v46 = vsel %vm786_vm5, %v1308_v40, %v1304_v37  ;;  %2828 = vmatprep.subr.bf16.mxu1 %v6601_v54  ;;  %v2330_v0 = vsel %vm2328_vm12, 1.0, %v9462_v51  ;;  %v2331_v7 = vsel %vm2329_vm13, 1.0, %v9462_v51 }
 0x58d   :  { %v1243_v4 = vpop.permute.xlu1 %1242  ;;  %v1246_v28 = vpop.permute.xlu0 %1245  ;;  %v1324_v6 = vsel %vm861_vm7, %v1309_v46, %v1323_v2 }
 0x58e   :  { %v1313_v1 = vrot.slane %v1243_v4, %v7807_v48  ;;  %v1317_v27 = vrot.slane %v1246_v28, %v7810_v14 }
 0x58f   :  { %2829 = vmatpush1.bf16.msra.mxu1 %v6599_v12 }
 0x590   :  { %v1318_v24 = vsel %vm786_vm5, %v1317_v27, %v1313_v1  ;;  %2830 = vmatprep.subr.bf16.mxu1 %v6604_v59 }
 0x591   :  { %v1325_v61 = vsel %vm863_vm8, %v1318_v24, %v1324_v6  ;;  %v9474_v24 = vld [vmem:[#allocation65_spill] sm:$0xff] }
 0x592   :  { %v1326_v29 = vpack.c.b16 %v1325_v61, %v1325_v61  ;;  %vm1164_vm14 = vcmp.gt.f32.partialorder %v9474_v24, -1e+20  ;;  %v6239_v61 = vld [vmem:[%s9270_s8 + $0x2] ss:$0 sm:$0xff] }
 0x593   :  { %2831 = vmatpush1.bf16.msra.mxu1 %v6602_v63 }
 0x594   :  { %6466 = vmatmul.mubr.msk.bf16.vlgmr.msra.gmra.mrb[0].mxu0 %vm866_vm9, %v1326_v29  ;;  %2832 = vmatprep.subr.bf16.mxu1 %v6607_v35 }
 0x595   :  { %2683 = vmatpush1.bf16.msra.mxu0 %v6566_v38  ;;  %2714 = vmatprep.mubr.bf16.mxu0 %v9471_v34  ;;  %v6586_v34 = vld [vmem:[#allocation7 + $0xe4] ss:$8 sps:$4 sm:$0xff]   ;;  %v1165_v38 = vsel %vm1164_vm14, 1.0, %v9462_v51 }
 0x596   :  { %2684 = vmatprep.subr.bf16.mxu0 %v6571_v25 }
 0x597   :  { %2833 = vmatpush1.bf16.msra.mxu1 %v6605_v3 }
 0x598   :  { %2834 = vmatprep.subr.bf16.mxu1 %v6610_v8 }
 0x599   :  { %2685 = vmatpush1.bf16.msra.mxu0 %v6569_v32 }
 0x59a   :  { %2686 = vmatprep.subr.bf16.mxu0 %v6574_v20  ;;  %v6240_v20 = vld [vmem:[%s9270_s8 + $0x3] ss:$0 sm:$0xff] }
 0x59b   :  { %2835 = vmatpush1.bf16.msra.mxu1 %v6608_v41 }
 0x59c   :  { %2836 = vmatprep.subr.bf16.mxu1 %v6613_v56 }
 0x59d   :  { %2687 = vmatpush1.bf16.msra.mxu0 %v6572_v42 }
 0x59e   :  { %2688 = vmatprep.subr.bf16.mxu0 %v6577_v9 }
 0x59f   :  { %2837 = vmatpush1.bf16.msra.mxu1 %v6611_v5 }
 0x5a0   :  { %6481 = vmatprep.subr.bf16.mxu1 %v9462_v51 }
 0x5a1   :  { %2689 = vmatpush1.bf16.msra.mxu0 %v6575_v30 }
 0x5a2   :  { %2690 = vmatprep.subr.bf16.mxu0 %v6580_v23 }
 0x5a5   :  { %2691 = vmatpush1.bf16.msra.mxu0 %v6578_v16 }
 0x5a6   :  { %2692 = vmatprep.subr.bf16.mxu0 %v6583_v33 }
 0x5a9   :  { %2693 = vmatpush1.bf16.msra.mxu0 %v6581_v49 }
 0x5aa   :  { %2694 = vmatprep.subr.bf16.mxu0 %v6586_v34 }
 0x5ad   :  { %2695 = vmatpush1.bf16.msra.mxu0 %v6584_v10 }
 0x5ae   :  { %2696 = vmatprep.subr.bf16.mxu0 %v6589_v57 }
 0x5b1   :  { %2697 = vmatpush1.bf16.msra.mxu0 %v6587_v18 }
 0x5b2   :  { %6475 = vmatprep.subr.bf16.mxu0 %v9462_v51 }
 0x646   :  { %v2549_v37 = vpop.f32.mrb[8].mxu1 }
 0x647   :  { %v2556_v40 = vmul.f32 %v2549_v37, %v2330_v0  ;;  %v6473_v26 = vpop.f32.mrb[9].mxu1 }
 0x648   :  { %v2552_v21 = vpop.f32.mrb[10].mxu1 }
 0x649   :  { %v2574_v47 = vmul.f32 %v6241_v50, %v2556_v40  ;;  %v2557_v46 = vmul.f32 %v2552_v21, %v2331_v7  ;;  %v6474_v4 = vpop.f32.mrb[11].mxu1 }
 0x64b   :  { %v2580_v28 = vadd.f32 %v6242_v13, %v2574_v47  ;;  %v2575_v43 = vmul.f32 %v6241_v50, %v2557_v46 }
 0x64d   :  { %v2581_v1 = vadd.f32 %v6242_v13, %v2575_v43  ;;  %v2582_v27 = vmax.f32 %v2580_v28, 0.0 }
 0x64f   :  { %v2583_v2 = vmax.f32 %v2581_v1, 0.0 }
 0x651   :  { %v2584_v6 = vpack.c.bf16 %v2583_v2, %v2582_v27 }
 0x653   :  { %2715 = vmatmul.mubr.bf16.vlgmr.msra.gmra.mrb[4].mxu0 %v2584_v6 }
 0x654   :  { %6477 = vmatprep.mubr.msk.bf16.mxu0 %vm7148_vm11, %v9462_v51 }
 0x667   :  { %v1364_v29 = vpop.f32.mrb[0].mxu0 }
 0x668   :  { %v1370_v25 = vmul.f32 %v1364_v29, %v1165_v38  ;;  %v6467_v32 = vpop.f32.mrb[1].mxu0 }
 0x669   :  { %v1367_v42 = vpop.f32.mrb[2].mxu0 }
 0x66a   :  { %v2562_v9 = vmul.f32 %v6239_v61, %v1370_v25  ;;  %v6468_v30 = vpop.f32.mrb[3].mxu0 }
 0x66c   :  { %v2567_v23 = vadd.f32 %v6240_v20, %v2562_v9 }
 0x66e   :  { %v2568_v16 = vmax.f32 %v2567_v23, 0.0 }
 0x670   :  { %v2569_v49 = vpack.c.bf16 %v2568_v16, %v2568_v16 }
 0x672   :  { %2855 = vmatmul.mubr.bf16.vlgmr.msra.gmra.mrb[12].mxu1 %v2569_v49 }
 0x673   :  { %6483 = vmatprep.mubr.msk.bf16.mxu1 %vm7148_vm11, %v9462_v51 }
 0x726   :  { %v8336_v33 = vpop.f32.mrb[4].mxu0 }
 0x727   :  { %v2718_v10 = vpop.f32.mrb[5].mxu0 }
 0x728   :  { %v8338_v34 = vpop.f32.mrb[6].mxu0  ;;  %v3725_v31 = vcombine.high %v2718_v10, %v2718_v10  ;;  %v3732_v18 = vrot.slane %v2718_v10, %v9475_v39 }
 0x729   :  { %v2722_v57 = vpop.f32.mrb[7].mxu0  ;;  %v3526_v11 = vpack.c.bf16 %v8338_v34, %v8336_v33 }
 0x72a   :  { %v3781_v19 = vrot.slane %v2722_v57, %v9475_v39  ;;  %v3739_v58 = vrot.slane %v3725_v31, %v9475_v39  ;;  %v3740_v55 = vcombine.high %v3732_v18, %v3732_v18  ;;  %v3748_v54 = vrot.slane %v3732_v18, %v9475_v39 }
 0x72b   :  { %6476 = vmatpush3.bf16.msra.mxu0 %v3526_v11  ;;  %v3774_v59 = vcombine.high %v2722_v57, %v2722_v57 }
 0x72c   :  { %6487 = vmatprep.subr.bf16.mxu0 %v9462_v51  ;;  %v3789_v12 = vcombine.high %v3781_v19, %v3781_v19  ;;  %v3797_v63 = vrot.slane %v3781_v19, %v9475_v39  ;;  %v3741_v35 = vcombine.high %v3739_v58, %v3739_v58  ;;  %v8349_v3 = vrot.slane %v3739_v58, %v9475_v39 }
 0x72d   :  { %v3762_v41 = vrot.slane %v3740_v55, %v9475_v39  ;;  %v3770_v8 = vcombine.high %v3748_v54, %v3748_v54  ;;  %v3788_v5 = vrot.slane %v3774_v59, %v9475_v39  ;;  %v3826_v0 = vrot.slane %v3748_v54, %v7288_v15  ;;  %v8397_v54 = vld [vmem:[%s9270_s8 + $0x7] ss:$0 sm:$0xff] }
 0x72e   :  { %v3811_v56 = vrot.slane %v3789_v12, %v9475_v39  ;;  %v3819_v52 = vcombine.high %v3797_v63, %v3797_v63  ;;  %v8355_v62 = vrot.slane %v3741_v35, %v9475_v39  ;;  %v3771_v50 = vcombine.high %v8349_v3, %v8349_v3 }
 0x72f   :  { %v3772_v37 = vcombine.high %v3762_v41, %v3762_v41  ;;  %v3830_v40 = vrot.slane %v3762_v41, %v7288_v15  ;;  %v3834_v26 = vrot.slane %v3770_v8, %v7288_v15  ;;  %v3790_v21 = vcombine.high %v3788_v5, %v3788_v5 }
 0x730   :  { %v3862_v13 = vrot.slane %v3811_v56, %v7288_v15  ;;  %v3858_v47 = vrot.slane %v3797_v63, %v7288_v15  ;;  %v3866_v46 = vrot.slane %v3819_v52, %v7288_v15  ;;  %v3842_v24 = vrot.slane %v8349_v3, %v7288_v15 }
 0x731   :  { %v3804_v61 = vrot.slane %v3788_v5, %v9475_v39  ;;  %v3773_v30 = vcombine.high %v8355_v62, %v8355_v62  ;;  %v8385_v23 = vrot.slane %v3790_v21, %v9475_v39  ;;  %v3821_v16 = vcombine.high %v3811_v56, %v3811_v56 }
 0x732   :  { %v3838_v18 = vrot.slane %v3772_v37, %v7288_v15  ;;  %v3846_v19 = vrot.slane %v8355_v62, %v7288_v15  ;;  %v3850_v58 = vrot.slane %v3771_v50, %v7288_v15 }
 0x733   :  { %v3820_v55 = vcombine.high %v3804_v61, %v3804_v61  ;;  %v3874_v12 = vrot.slane %v3804_v61, %v7288_v15  ;;  %v3870_v3 = vrot.slane %v3821_v16, %v7288_v15  ;;  %v3878_v41 = vrot.slane %v8385_v23, %v7288_v15 }
 0x734   :  { %v3854_v56 = vrot.slane %v3773_v30, %v7288_v15 }
 0x735   :  { %v3882_v61 = vrot.slane %v3820_v55, %v7288_v15 }
 0x745   :  { %v2856_v7 = vpop.f32.mrb[12].mxu1 }
 0x746   :  { %v2877_v4 = vrot.slane %v2856_v7, %v9475_v39  ;;  %v8366_v28 = vpop.f32.mrb[13].mxu1  ;;  %v2870_v49 = vcombine.high %v2856_v7, %v2856_v7 }
 0x747   :  { %v2860_v43 = vpop.f32.mrb[14].mxu1  ;;  %v4569_v1 = vpack.c.bf16 %v8366_v28, %v8366_v28  ;;  %v3904_v27 = vadd.f32 %v3830_v40, %v8366_v28  ;;  %v3903_v2 = vadd.f32 %v3826_v0, %v8366_v28  ;;  %v3912_v6 = vadd.f32 %v3862_v13, %v8366_v28 }
 0x748   :  { %v8377_v38 = vrot.slane %v2877_v4, %v9475_v39  ;;  %v2861_v29 = vpop.f32.mrb[15].mxu1  ;;  %v3911_v25 = vadd.f32 %v3858_v47, %v8366_v28  ;;  %v3913_v9 = vadd.f32 %v3866_v46, %v8366_v28  ;;  %v2885_v59 = vcombine.high %v2877_v4, %v2877_v4 }
 0x749   :  { %v4733_v32 = vsel %vm2511_vm0, %v4569_v1, 0  ;;  %v3920_v20 = vmul.f32 0.2, %v3904_v27  ;;  %v3919_v42 = vmul.f32 0.2, %v3903_v2  ;;  %v2884_v8 = vrot.slane %v2870_v49, %v9475_v39 }
 0x74a   :  { %6482 = vmatpush3.bf16.msra.mxu1 %v4733_v32  ;;  %v2922_v10 = vrot.slane %v8377_v38, %v7288_v15  ;;  %v3928_v31 = vmul.f32 0.2, %v3912_v6  ;;  %v3927_v50 = vmul.f32 0.2, %v3911_v25  ;;  %v3929_v0 = vmul.f32 0.2, %v3913_v9 }
 0x74b   :  { %v3936_v57 = vmax.f32 %v3904_v27, %v3920_v20  ;;  %v3935_v11 = vmax.f32 %v3903_v2, %v3919_v42  ;;  %6493 = vmatprep.subr.bf16.mxu1 %v9462_v51  ;;  %v3905_v37 = vadd.f32 %v3834_v26, %v8366_v28  ;;  %v3915_v40 = vadd.f32 %v3874_v12, %v8366_v28 }
 0x74c   :  { %v8401_v63 = vadd.f32 %v2922_v10, %v8336_v33  ;;  %v8404_v35 = vadd.f32 %v2922_v10, %v8338_v34  ;;  %v3944_v62 = vmax.f32 %v3912_v6, %v3928_v31  ;;  %v3907_v13 = vadd.f32 %v3842_v24, %v8366_v28 }
 0x74d   :  { %v3956_v5 = vmul.f32 %v8397_v54, %v3936_v57  ;;  %v3955_v52 = vmul.f32 %v8397_v54, %v3935_v11  ;;  %v2907_v7 = vrot.slane %v2885_v59, %v9475_v39  ;;  %v3943_v21 = vmax.f32 %v3911_v25, %v3927_v50 }
 0x74e   :  { %v3914_v47 = vadd.f32 %v3870_v3, %v8366_v28  ;;  %v3964_v46 = vmul.f32 %v8397_v54, %v3944_v62  ;;  %v3921_v4 = vmul.f32 0.2, %v3905_v37  ;;  %v3931_v43 = vmul.f32 0.2, %v3915_v40 }
 0x74f   :  { %3973 = vadd.xlane.f32.xlu0 %v3956_v5  ;;  %3971 = vadd.xlane.f32.xlu1 %v3955_v52  ;;  %v3923_v1 = vmul.f32 0.2, %v3907_v13  ;;  %v3963_v27 = vmul.f32 %v8397_v54, %v3943_v21  ;;  %v3945_v2 = vmax.f32 %v3913_v9, %v3929_v0  ;;  %v3906_v26 = vadd.f32 %v3838_v18, %v8366_v28 }
 0x750   :  { %v3916_v6 = vadd.f32 %v3878_v41, %v8366_v28  ;;  %v3822_v24 = vcombine.high %v8385_v23, %v8385_v23  ;;  %v2915_v29 = vcombine.high %v8377_v38, %v8377_v38  ;;  %v3937_v25 = vmax.f32 %v3905_v37, %v3921_v4 }
 0x751   :  { %v2886_v32 = vcombine.high %v2884_v8, %v2884_v8  ;;  %v2900_v20 = vrot.slane %v2884_v8, %v9475_v39  ;;  %v3908_v42 = vadd.f32 %v3846_v19, %v8366_v28  ;;  %v3947_v9 = vmax.f32 %v3915_v40, %v3931_v43 }
 0x752   :  { %v3939_v30 = vmax.f32 %v3907_v13, %v3923_v1  ;;  %v3930_v16 = vmul.f32 0.2, %v3914_v47  ;;  %v3917_v49 = vadd.f32 %v3882_v61, %v8366_v28  ;;  %v2926_v23 = vrot.slane %v2907_v7, %v7288_v15 }
 0x753   :  { %3989 = vadd.xlane.f32.xlu0 %v3964_v46  ;;  %3987 = vadd.xlane.f32.xlu1 %v3963_v27  ;;  %v3965_v10 = vmul.f32 %v8397_v54, %v3945_v2  ;;  %v3957_v57 = vmul.f32 %v8397_v54, %v3937_v25  ;;  %v3922_v38 = vmul.f32 0.2, %v3906_v26  ;;  %v2917_v11 = vcombine.high %v2907_v7, %v2907_v7 }
 0x754   :  { %v2930_v31 = vrot.slane %v2915_v29, %v7288_v15  ;;  %v3909_v18 = vadd.f32 %v3850_v58, %v8366_v28  ;;  %v8436_v55 = vadd.f32 %v3854_v56, %v8366_v28  ;;  %v2914_v19 = vrot.slane %v2886_v32, %v9475_v39 }
 0x755   :  { %v2938_v12 = vrot.slane %v2900_v20, %v7288_v15  ;;  %v3886_v59 = vrot.slane %v3822_v24, %v7288_v15  ;;  %v3967_v3 = vmul.f32 %v8397_v54, %v3947_v9  ;;  %v3959_v41 = vmul.f32 %v8397_v54, %v3939_v30 }
 0x756   :  { %v3946_v8 = vmax.f32 %v3914_v47, %v3930_v16  ;;  %v3932_v5 = vmul.f32 0.2, %v3916_v6  ;;  %v3938_v52 = vmax.f32 %v3906_v26, %v3922_v38  ;;  %v3924_v62 = vmul.f32 0.2, %v3908_v42  ;;  %v8492_v38 = vld [vmem:[%s9270_s8 + $0x6] ss:$0 sm:$0xff] }
 0x757   :  { %3991 = vadd.xlane.f32.xlu0 %v3965_v10  ;;  %3975 = vadd.xlane.f32.xlu1 %v3957_v57  ;;  %v3918_v58 = vadd.f32 %v3886_v59, %v8366_v28  ;;  %v8445_v56 = vadd.f32 %v2926_v23, %v8336_v33  ;;  %v2916_v39 = vcombine.high %v2900_v20, %v2900_v20  ;;  %v3933_v28 = vmul.f32 0.2, %v3917_v49 }
 0x758   :  { %v2934_v50 = vrot.slane %v2917_v11, %v7288_v15  ;;  %v8449_v0 = vadd.f32 %v2930_v31, %v8336_v33  ;;  %v2942_v37 = vrot.slane %v2914_v19, %v7288_v15  ;;  %v8453_v40 = vadd.f32 %v2926_v23, %v8338_v34 }
 0x759   :  { %v3966_v13 = vmul.f32 %v8397_v54, %v3946_v8  ;;  %v3948_v7 = vmax.f32 %v3916_v6, %v3932_v5  ;;  %v8457_v21 = vadd.f32 %v2938_v12, %v8336_v33  ;;  %v3958_v47 = vmul.f32 %v8397_v54, %v3938_v52 }
 0x75a   :  { %v3940_v46 = vmax.f32 %v3908_v42, %v3924_v62  ;;  %v3925_v4 = vmul.f32 0.2, %v3909_v18  ;;  %v8461_v43 = vadd.f32 %v2930_v31, %v8338_v34  ;;  %v2946_v1 = vrot.slane %v2916_v39, %v7288_v15 }
 0x75b   :  { %3995 = vadd.xlane.f32.xlu0 %v3967_v3  ;;  %3979 = vadd.xlane.f32.xlu1 %v3959_v41  ;;  %v8465_v27 = vadd.f32 %v2934_v50, %v8336_v33  ;;  %v8468_v2 = vadd.f32 %v2938_v12, %v8338_v34  ;;  %v2918_v26 = vcombine.high %v2914_v19, %v2914_v19  ;;  %v2976_v61 = vmul.f32 0.2, %v8404_v35 }
 0x75c   :  { %v3968_v6 = vmul.f32 %v8397_v54, %v3948_v7  ;;  %v3949_v24 = vmax.f32 %v3917_v49, %v3933_v28  ;;  %v3926_v29 = vmul.f32 0.2, %v8436_v55  ;;  %v3960_v25 = vmul.f32 %v8397_v54, %v3940_v46 }
 0x75d   :  { %v3941_v32 = vmax.f32 %v3909_v18, %v3925_v4  ;;  %v2969_v20 = vadd.f32 %v2942_v37, %v8336_v33  ;;  %v8476_v42 = vadd.f32 %v2934_v50, %v8338_v34  ;;  %v8479_v9 = vadd.f32 %v2946_v1, %v8336_v33 }
 0x75e   :  { %v8482_v30 = vadd.f32 %v2942_v37, %v8338_v34  ;;  %v3969_v16 = vmul.f32 %v8397_v54, %v3949_v24  ;;  %v2992_v49 = vmax.f32 %v8404_v35, %v2976_v61  ;;  %v2975_v23 = vmul.f32 0.2, %v8401_v63 }
 0x75f   :  { %3993 = vadd.xlane.f32.xlu0 %v3966_v13  ;;  %3977 = vadd.xlane.f32.xlu1 %v3958_v47  ;;  %v2950_v10 = vrot.slane %v2918_v26, %v7288_v15  ;;  %v3961_v57 = vmul.f32 %v8397_v54, %v3941_v32  ;;  %v3942_v11 = vmax.f32 %v8436_v55, %v3926_v29  ;;  %v3934_v31 = vmul.f32 0.2, %v3918_v58 }
 0x760   :  { %v8496_v18 = vadd.f32 %v2946_v1, %v8338_v34  ;;  %v3012_v12 = vmul.f32 %v8492_v38, %v2992_v49  ;;  %v2977_v59 = vmul.f32 0.2, %v8445_v56  ;;  %v2991_v55 = vmax.f32 %v8401_v63, %v2975_v23 }
 0x761   :  { %v2973_v19 = vadd.f32 %v2950_v10, %v8336_v33  ;;  %v8500_v35 = vadd.f32 %v2950_v10, %v8338_v34  ;;  %v3962_v3 = vmul.f32 %v8397_v54, %v3942_v11  ;;  %v3950_v41 = vmax.f32 %v3918_v58, %v3934_v31 }
 0x762   :  { %v2979_v8 = vmul.f32 0.2, %v8449_v0  ;;  %v2993_v33 = vmax.f32 %v8445_v56, %v2977_v59  ;;  %v2978_v34 = vmul.f32 0.2, %v8453_v40  ;;  %v3011_v52 = vmul.f32 %v8492_v38, %v2991_v55 }
 0x763   :  { %3997 = vadd.xlane.f32.xlu0 %v3968_v6  ;;  %3981 = vadd.xlane.f32.xlu1 %v3960_v25  ;;  %v3970_v5 = vmul.f32 %v8397_v54, %v3950_v41  ;;  %v2983_v39 = vmul.f32 0.2, %v8457_v21  ;;  %v2980_v37 = vmul.f32 0.2, %v8461_v43  ;;  %v2981_v54 = vmul.f32 0.2, %v8465_v27 }
 0x764   :  { %v2995_v62 = vmax.f32 %v8449_v0, %v2979_v8  ;;  %v3013_v63 = vmul.f32 %v8492_v38, %v2993_v33  ;;  %v2994_v58 = vmax.f32 %v8453_v40, %v2978_v34  ;;  %v2984_v13 = vmul.f32 0.2, %v8468_v2  ;;  %v9478_v8 = vld [vmem:[#allocation27_spill] sm:$0xff]  ;;  %v9479_v33 = vld [vmem:[#allocation26_spill] sm:$0xff] }
 0x765   :  { %v2999_v56 = vmax.f32 %v8457_v21, %v2983_v39  ;;  %v2996_v28 = vmax.f32 %v8461_v43, %v2980_v37  ;;  %v2997_v40 = vmax.f32 %v8465_v27, %v2981_v54  ;;  %v2985_v47 = vmul.f32 0.2, %v2969_v20  ;;  %v9481_v39 = vld [vmem:[#allocation30_spill] sm:$0xff] }
 0x766   :  { %v3015_v50 = vmul.f32 %v8492_v38, %v2995_v62  ;;  %v3014_v0 = vmul.f32 %v8492_v38, %v2994_v58  ;;  %v3000_v21 = vmax.f32 %v8468_v2, %v2984_v13  ;;  %v2982_v46 = vmul.f32 0.2, %v8476_v42  ;;  %v9483_v54 = vld [vmem:[#allocation38_spill] sm:$0xff] }
 0x767   :  { %3999 = vadd.xlane.f32.xlu0 %v3969_v16  ;;  %3983 = vadd.xlane.f32.xlu1 %v3961_v57  ;;  %v3019_v7 = vmul.f32 %v8492_v38, %v2999_v56  ;;  %v3016_v4 = vmul.f32 %v8492_v38, %v2996_v28  ;;  %v3017_v1 = vmul.f32 %v8492_v38, %v2997_v40  ;;  %v2987_v6 = vmul.f32 0.2, %v8479_v9  ;;  %v9482_v56 = vld [vmem:[#allocation39_spill] sm:$0xff] }
 0x768   :  { %v3001_v26 = vmax.f32 %v2969_v20, %v2985_v47  ;;  %v3020_v43 = vmul.f32 %v8492_v38, %v3000_v21  ;;  %v2998_v27 = vmax.f32 %v8476_v42, %v2982_v46  ;;  %v2986_v2 = vmul.f32 0.2, %v8482_v30  ;;  %v9484_v28 = vld [vmem:[#allocation35_spill] sm:$0xff]  ;;  %v9485_v47 = vld [vmem:[#allocation34_spill] sm:$0xff] }
 0x769   :  { %v3003_v61 = vmax.f32 %v8479_v9, %v2987_v6  ;;  %v2989_v29 = vmul.f32 0.2, %v2973_v19  ;;  %v2988_v49 = vmul.f32 0.2, %v8496_v18  ;;  %v2990_v10 = vmul.f32 0.2, %v8500_v35 }
 0x76a   :  { %v3021_v24 = vmul.f32 %v8492_v38, %v3001_v26  ;;  %v3018_v25 = vmul.f32 %v8492_v38, %v2998_v27  ;;  %v3002_v20 = vmax.f32 %v8482_v30, %v2986_v2  ;;  %v9487_v6 = vld [vmem:[#allocation42_spill] sm:$0xff] }
 0x76b   :  { %3029 = vadd.xlane.f32.xlu0 %v3012_v12  ;;  %3985 = vadd.xlane.f32.xlu1 %v3962_v3  ;;  %v3023_v32 = vmul.f32 %v8492_v38, %v3003_v61  ;;  %v3005_v16 = vmax.f32 %v2973_v19, %v2989_v29  ;;  %v3004_v23 = vmax.f32 %v8496_v18, %v2988_v49  ;;  %v9476_v12 = vld [vmem:[#allocation25_spill] sm:$0xff]  ;;  %v9477_v3 = vld [vmem:[#allocation24_spill] sm:$0xff]  ;;  %v9488_v61 = vld [vmem:[#allocation47_spill] sm:$0xff] }
 0x76c   :  { %v3022_v42 = vmul.f32 %v8492_v38, %v3002_v20  ;;  %v3006_v11 = vmax.f32 %v8500_v35, %v2990_v10  ;;  %v9489_v29 = vld [vmem:[#allocation46_spill] sm:$0xff] }
 0x76d   :  { %v3025_v9 = vmul.f32 %v8492_v38, %v3005_v16  ;;  %v3024_v57 = vmul.f32 %v8492_v38, %v3004_v23  ;;  %v9490_v16 = vld [vmem:[#allocation18_spill] sm:$0xff]  ;;  %v9491_v23 = vld [vmem:[#allocation20_spill] sm:$0xff] }
 0x76e   :  { %v3026_v30 = vmul.f32 %v8492_v38, %v3006_v11 }
 0x76f   :  { %4001 = vadd.xlane.f32.xlu0 %v3970_v5  ;;  %3027 = vadd.xlane.f32.xlu1 %v3011_v52  ;;  %v9480_v52 = vld [vmem:[#allocation31_spill] sm:$0xff] }
 0x773   :  { %3031 = vadd.xlane.f32.xlu0 %v3013_v63  ;;  %3035 = vadd.xlane.f32.xlu1 %v3015_v50 }
 0x777   :  { %3033 = vadd.xlane.f32.xlu0 %v3014_v0  ;;  %3043 = vadd.xlane.f32.xlu1 %v3019_v7 }
 0x77b   :  { %3037 = vadd.xlane.f32.xlu0 %v3016_v4  ;;  %3039 = vadd.xlane.f32.xlu1 %v3017_v1  ;;  %v9486_v1 = vld [vmem:[#allocation43_spill] sm:$0xff] }
 0x77f   :  { %3045 = vadd.xlane.f32.xlu0 %v3020_v43  ;;  %3047 = vadd.xlane.f32.xlu1 %v3021_v24 }
 0x783   :  { %3041 = vadd.xlane.f32.xlu0 %v3018_v25  ;;  %3051 = vadd.xlane.f32.xlu1 %v3023_v32 }
 0x787   :  { %3049 = vadd.xlane.f32.xlu0 %v3022_v42  ;;  %3055 = vadd.xlane.f32.xlu1 %v3025_v9 }
 0x78b   :  { %3053 = vadd.xlane.f32.xlu0 %v3024_v57 }
 0x78f   :  { %3057 = vadd.xlane.f32.xlu0 %v3026_v30  ;;  %v9492_v30 = vld [vmem:[#allocation19_spill] sm:$0xff] }
 0x7dc   :  { %v3974_v31 = vpop.xlane.xlu0 %3973  ;;  %v3972_v19 = vpop.xlane.xlu1 %3971 }
 0x7dd   :  { %v8546_v59 = vadd.f32 %v3974_v31, %v9476_v12  ;;  %v8549_v41 = vadd.f32 %v3972_v19, %v9477_v3  ;;  %v9493_v3 = vld [vmem:[#allocation21_spill] sm:$0xff] }
 0x7df   :  { %4039 = vperm.xlu0 %6516, %v8546_v59   ;;  %4036 = vperm.xlu1 %6515, %v8549_v41  }
 0x7e0   :  { %v3990_v18 = vpop.xlane.xlu0 %3989  ;;  %v3988_v55 = vpop.xlane.xlu1 %3987 }
 0x7e1   :  { %v8554_v35 = vadd.f32 %v3990_v18, %v9478_v8  ;;  %v8557_v38 = vadd.f32 %v3988_v55, %v9479_v33  ;;  %v9495_v33 = vld [vmem:[#allocation22_spill] sm:$0xff] }
 0x7e3   :  { %4063 = vperm.xlu0 %6516, %v8554_v35   ;;  %4060 = vperm.xlu1 %6515, %v8557_v38  }
 0x7e4   :  { %v3992_v34 = vpop.xlane.xlu0 %3991  ;;  %v3976_v5 = vpop.xlane.xlu1 %3975 }
 0x7e5   :  { %v8562_v62 = vadd.f32 %v3992_v34, %v9480_v52  ;;  %v8565_v63 = vadd.f32 %v3976_v5, %v9481_v39  ;;  %v9496_v5 = vld [vmem:[#allocation23_spill] sm:$0xff] }
 0x7e7   :  { %4066 = vperm.xlu0 %6516, %v8562_v62   ;;  %4042 = vperm.xlu1 %6515, %v8565_v63  }
 0x7e8   :  { %v3996_v58 = vpop.xlane.xlu0 %3995  ;;  %v3980_v50 = vpop.xlane.xlu1 %3979 }
 0x7e9   :  { %v8570_v37 = vadd.f32 %v3996_v58, %v9482_v56  ;;  %v8573_v0 = vadd.f32 %v3980_v50, %v9483_v54  ;;  %v9498_v58 = vld [vmem:[#allocation32_spill] sm:$0xff]  ;;  %v9500_v56 = vld [vmem:[#allocation33_spill] sm:$0xff] }
 0x7eb   :  { %4072 = vperm.xlu0 %6516, %v8570_v37   ;;  %4048 = vperm.xlu1 %6515, %v8573_v0  }
 0x7ec   :  { %v3994_v13 = vpop.xlane.xlu0 %3993  ;;  %v3978_v7 = vpop.xlane.xlu1 %3977 }
 0x7ed   :  { %v8578_v40 = vadd.f32 %v3994_v13, %v9484_v28  ;;  %v8581_v21 = vadd.f32 %v3978_v7, %v9485_v47  ;;  %v9502_v28 = vld [vmem:[#allocation28_spill] sm:$0xff] }
 0x7ef   :  { %4069 = vperm.xlu0 %6516, %v8578_v40   ;;  %4045 = vperm.xlu1 %6515, %v8581_v21  }
 0x7f0   :  { %v3998_v46 = vpop.xlane.xlu0 %3997  ;;  %v3982_v4 = vpop.xlane.xlu1 %3981 }
 0x7f1   :  { %v8586_v26 = vadd.f32 %v3998_v46, %v9486_v1  ;;  %v8589_v43 = vadd.f32 %v3982_v4, %v9487_v6  ;;  %v9503_v46 = vld [vmem:[#allocation29_spill] sm:$0xff] }
 0x7f3   :  { %4075 = vperm.xlu0 %6516, %v8586_v26   ;;  %4051 = vperm.xlu1 %6515, %v8589_v43  }
 0x7f4   :  { %v4000_v27 = vpop.xlane.xlu0 %3999  ;;  %v3984_v24 = vpop.xlane.xlu1 %3983 }
 0x7f5   :  { %v8594_v2 = vadd.f32 %v4000_v27, %v9488_v61  ;;  %v8597_v25 = vadd.f32 %v3984_v24, %v9489_v29  ;;  %v9505_v27 = vld [vmem:[#allocation36_spill] sm:$0xff]  ;;  %v9507_v61 = vld [vmem:[#allocation37_spill] sm:$0xff] }
 0x7f7   :  { %4078 = vperm.xlu0 %6516, %v8594_v2   ;;  %4054 = vperm.xlu1 %6515, %v8597_v25  }
 0x7f8   :  { %v3030_v32 = vpop.xlane.xlu0 %3029  ;;  %v3986_v20 = vpop.xlane.xlu1 %3985 }
 0x7f9   :  { %v8602_v49 = vadd.f32 %v3030_v32, %v9490_v16  ;;  %v9509_v16 = vld [vmem:[#allocation40_spill] sm:$0xff] }
 0x7fb   :  { %3095 = vperm.xlu0 %6516, %v8602_v49  }
 0x7fc   :  { %v4002_v42 = vpop.xlane.xlu0 %4001  ;;  %v3028_v9 = vpop.xlane.xlu1 %3027 }
 0x7fd   :  { %v8606_v10 = vadd.f32 %v3028_v9, %v9491_v23  ;;  %v9511_v23 = vld [vmem:[#allocation41_spill] sm:$0xff] }
 0x7ff   :  { %3092 = vperm.xlu1 %6515, %v8606_v10  }
 0x800   :  { %v3032_v57 = vpop.xlane.xlu0 %3031  ;;  %v3036_v11 = vpop.xlane.xlu1 %3035 }
 0x801   :  { %v8610_v31 = vadd.f32 %v3032_v57, %v9492_v30  ;;  %v8618_v34 = vadd.f32 %v3036_v11, %v9495_v33 }
 0x803   :  { %3098 = vperm.xlu1 %6515, %v8610_v31  }
 0x804   :  { %v3034_v19 = vpop.xlane.xlu0 %3033  ;;  %v3044_v12 = vpop.xlane.xlu1 %3043 }
 0x805   :  { %v8614_v18 = vadd.f32 %v3034_v19, %v9493_v3  ;;  %v8626_v50 = vadd.f32 %v3044_v12, %v9498_v58  ;;  %v9513_v19 = vld [vmem:[#allocation44_spill] sm:$0xff]  ;;  %v9515_v3 = vld [vmem:[#allocation45_spill] sm:$0xff] }
 0x807   :  { %9494 = vst [vmem:[#allocation53_spill] sm:$0xff] %v8614_v18  ;;  %3101 = vperm.xlu1 %6515, %v8614_v18   ;;  %9499 = vst [vmem:[#allocation50_spill] sm:$0xff] %v8626_v50 }
 0x808   :  { %v3038_v55 = vpop.xlane.xlu0 %3037  ;;  %v3040_v8 = vpop.xlane.xlu1 %3039 }
 0x809   :  { %v8621_v52 = vadd.f32 %v3038_v55, %v9496_v5  ;;  %v8634_v47 = vadd.f32 %v3040_v8, %v9502_v28  ;;  %v9517_v8 = vld [vmem:[#allocation48_spill] sm:$0xff]  ;;  %v9519_v5 = vld [vmem:[#allocation49_spill] sm:$0xff] }
 0x80a   :  { %v8666_v33 = vadd.f32 %v3986_v20, %v9517_v8 }
 0x80b   :  { %9497 = vst [vmem:[#allocation56_spill] sm:$0xff] %v8621_v52  ;;  %3107 = vperm.xlu0 %6516, %v8621_v52   ;;  %3104 = vperm.xlu1 %6515, %v8618_v34  }
 0x80c   :  { %v3046_v39 = vpop.xlane.xlu0 %3045  ;;  %v3048_v13 = vpop.xlane.xlu1 %3047  ;;  %9518 = vst [vmem:[#allocation60_spill] sm:$0xff] %v8666_v33 }
 0x80d   :  { %v8629_v54 = vadd.f32 %v3046_v39, %v9500_v56  ;;  %v8642_v24 = vadd.f32 %v3048_v13, %v9505_v27  ;;  %v8669_v39 = vadd.f32 %v4002_v42, %v9519_v5 }
 0x80f   :  { %9501 = vst [vmem:[#allocation58_spill] sm:$0xff] %v8629_v54  ;;  %3119 = vperm.xlu0 %6516, %v8629_v54   ;;  %3116 = vperm.xlu1 %6515, %v8626_v50   ;;  %9506 = vst [vmem:[#allocation61_spill] sm:$0xff] %v8642_v24 }
 0x810   :  { %v3042_v7 = vpop.xlane.xlu0 %3041  ;;  %v3052_v1 = vpop.xlane.xlu1 %3051  ;;  %9520 = vst [vmem:[#allocation57_spill] sm:$0xff] %v8669_v39 }
 0x811   :  { %v8637_v4 = vadd.f32 %v3042_v7, %v9503_v46  ;;  %v8650_v9 = vadd.f32 %v3052_v1, %v9509_v16 }
 0x813   :  { %9504 = vst [vmem:[#allocation51_spill] sm:$0xff] %v8637_v4  ;;  %3113 = vperm.xlu0 %6516, %v8637_v4   ;;  %3110 = vperm.xlu1 %6515, %v8634_v47   ;;  %9510 = vst [vmem:[#allocation62_spill] sm:$0xff] %v8650_v9 }
 0x814   :  { %v3050_v6 = vpop.xlane.xlu0 %3049  ;;  %v3056_v11 = vpop.xlane.xlu1 %3055 }
 0x815   :  { %v8645_v29 = vadd.f32 %v3050_v6, %v9507_v61  ;;  %v8658_v12 = vadd.f32 %v3056_v11, %v9513_v19 }
 0x817   :  { %9508 = vst [vmem:[#allocation54_spill] sm:$0xff] %v8645_v29  ;;  %3125 = vperm.xlu0 %6516, %v8645_v29   ;;  %3122 = vperm.xlu1 %6515, %v8642_v24   ;;  %9514 = vst [vmem:[#allocation59_spill] sm:$0xff] %v8658_v12 }
 0x818   :  { %v3054_v32 = vpop.xlane.xlu0 %3053 }
 0x819   :  { %v8653_v57 = vadd.f32 %v3054_v32, %v9511_v23 }
 0x81b   :  { %9512 = vst [vmem:[#allocation52_spill] sm:$0xff] %v8653_v57  ;;  %3131 = vperm.xlu0 %6516, %v8653_v57   ;;  %3128 = vperm.xlu1 %6515, %v8650_v9  }
 0x81c   :  { %v3058_v30 = vpop.xlane.xlu0 %3057 }
 0x81d   :  { %v8661_v55 = vadd.f32 %v3058_v30, %v9515_v3 }
 0x81f   :  { %9516 = vst [vmem:[#allocation55_spill] sm:$0xff] %v8661_v55  ;;  %3137 = vperm.xlu0 %6516, %v8661_v55   ;;  %3134 = vperm.xlu1 %6515, %v8658_v12  }
 0x823   :  { %4081 = vperm.xlu0 %6516, %v8669_v39   ;;  %4057 = vperm.xlu1 %6515, %v8666_v33  }
 0x85e   :  { %v4040_v58 = vpop.permute.xlu0 %4039  ;;  %v4037_v56 = vpop.permute.xlu1 %4036 }
 0x85f   :  { %v4090_v24 = vrot.slane %v4040_v58, %v7807_v48  ;;  %v4086_v18 = vrot.slane %v4037_v56, %v7807_v48 }
 0x862   :  { %v4064_v13 = vpop.permute.xlu0 %4063  ;;  %v4061_v7 = vpop.permute.xlu1 %4060 }
 0x866   :  { %v4043_v28 = vpop.permute.xlu1 %4042  ;;  %v8673_v46 = vpop.permute.xlu0 %4066 }
 0x86a   :  { %v8675_v1 = vpop.permute.xlu1 %4048  ;;  %v8677_v6 = vpop.permute.xlu0 %4072 }
 0x86e   :  { %v4046_v20 = vpop.permute.xlu1 %4045  ;;  %v8679_v27 = vpop.permute.xlu0 %4069 }
 0x872   :  { %v8681_v42 = vpop.permute.xlu1 %4051  ;;  %v8683_v61 = vpop.permute.xlu0 %4075 }
 0x876   :  { %v8685_v32 = vpop.permute.xlu1 %4054  ;;  %v8687_v23 = vpop.permute.xlu0 %4078 }
 0x87a   :  { %v3096_v30 = vpop.permute.xlu0 %3095 }
 0x87e   :  { %v3093_v16 = vpop.permute.xlu1 %3092 }
 0x87f   :  { %v3142_v54 = vrot.slane %v3093_v16, %v7807_v48  ;;  %v4118_v16 = vrot.slane %v4061_v7, %v7807_v48 }
 0x882   :  { %v3099_v11 = vpop.permute.xlu1 %3098 }
 0x883   :  { %v3151_v12 = vrot.slane %v3099_v11, %v7807_v48  ;;  %v4094_v11 = vrot.slane %v4043_v28, %v7807_v48 }
 0x886   :  { %v3102_v19 = vpop.permute.xlu1 %3101 }
 0x887   :  { %v3155_v57 = vrot.slane %v3102_v19, %v7810_v14  ;;  %v3146_v19 = vrot.slane %v3096_v30, %v7810_v14  ;;  %v4098_v30 = vrot.slane %v4046_v20, %v7807_v48 }
 0x88a   :  { %v3108_v3 = vpop.permute.xlu0 %3107  ;;  %v3105_v8 = vpop.permute.xlu1 %3104 }
 0x88b   :  { %v3164_v29 = vrot.slane %v3108_v3, %v7810_v14  ;;  %v3160_v33 = vrot.slane %v3105_v8, %v7807_v48  ;;  %v3156_v3 = vsel %vm786_vm5, %v3155_v57, %v3151_v12  ;;  %v4122_v8 = vrot.slane %v4064_v13, %v7807_v48 }
 0x88e   :  { %v3120_v5 = vpop.permute.xlu0 %3119  ;;  %v3117_v51 = vpop.permute.xlu1 %3116 }
 0x88f   :  { %v3182_v12 = vrot.slane %v3120_v5, %v7810_v14  ;;  %v3178_v13 = vrot.slane %v3117_v51, %v7807_v48  ;;  %v4130_v51 = vrot.slane %v8679_v27, %v7807_v48  ;;  %v4154_v5 = vsel %vm851_vm1, %v4122_v8, %v4118_v16 }
 0x890   :  { %v4102_v8 = vrot.slane %v8675_v1, %v7807_v48  ;;  %v4110_v16 = vrot.slane %v8685_v32, %v7807_v48  ;;  %v4142_v1 = vrot.slane %v8687_v23, %v7807_v48 }
 0x892   :  { %v3114_v39 = vpop.permute.xlu0 %3113  ;;  %v3111_v55 = vpop.permute.xlu1 %3110 }
 0x893   :  { %v3173_v4 = vrot.slane %v3114_v39, %v7810_v14  ;;  %v3169_v9 = vrot.slane %v3111_v55, %v7807_v48  ;;  %v3165_v39 = vsel %vm786_vm5, %v3164_v29, %v3160_v33  ;;  %v3147_v55 = vsel %vm786_vm5, %v3146_v19, %v3142_v54 }
 0x894   :  { %v3211_v57 = vsel %vm851_vm1, %v3156_v3, %v3147_v55  ;;  %v3183_v3 = vsel %vm786_vm5, %v3182_v12, %v3178_v13  ;;  %v4134_v12 = vrot.slane %v8677_v6, %v7807_v48 }
 0x895   :  { %v3174_v50 = vsel %vm786_vm5, %v3173_v4, %v3169_v9  ;;  %v3212_v29 = vsel %vm853_vm2, %v3165_v39, %v3211_v57 }
 0x896   :  { %v3126_v44 = vpop.permute.xlu0 %3125  ;;  %v3123_v52 = vpop.permute.xlu1 %3122  ;;  %v3213_v9 = vsel %vm855_vm3, %v3174_v50, %v3212_v29  ;;  %v4106_v50 = vrot.slane %v8681_v42, %v7807_v48  ;;  %v4138_v42 = vrot.slane %v8683_v61, %v7807_v48 }
 0x897   :  { %v3191_v58 = vrot.slane %v3126_v44, %v7810_v14  ;;  %v3187_v56 = vrot.slane %v3123_v52, %v7807_v48  ;;  %v4147_v44 = vsel %vm851_vm1, %v4090_v24, %v4086_v18  ;;  %v4126_v52 = vrot.slane %v8673_v46, %v7807_v48 }
 0x898   :  { %v4148_v33 = vsel %vm853_vm2, %v4094_v11, %v4147_v44  ;;  %v3214_v27 = vsel %vm857_vm4, %v3183_v3, %v3213_v9 }
 0x899   :  { %v3192_v20 = vsel %vm786_vm5, %v3191_v58, %v3187_v56  ;;  %v4149_v19 = vsel %vm855_vm3, %v4098_v30, %v4148_v33  ;;  %v4155_v55 = vsel %vm853_vm2, %v4126_v52, %v4154_v5 }
 0x89a   :  { %v3132_v7 = vpop.permute.xlu0 %3131  ;;  %v3129_v28 = vpop.permute.xlu1 %3128  ;;  %v3215_v58 = vsel %vm859_vm6, %v3192_v20, %v3214_v27  ;;  %v4156_v56 = vsel %vm855_vm3, %v4130_v51, %v4155_v55  ;;  %v4150_v13 = vsel %vm857_vm4, %v4102_v8, %v4149_v19 }
 0x89b   :  { %v3200_v54 = vrot.slane %v3132_v7, %v7810_v14  ;;  %v3196_v4 = vrot.slane %v3129_v28, %v7807_v48  ;;  %v4151_v29 = vsel %vm859_vm6, %v4106_v50, %v4150_v13  ;;  %v4157_v44 = vsel %vm857_vm4, %v4134_v12, %v4156_v56 }
 0x89c   :  { %v4152_v6 = vsel %vm861_vm7, %v4110_v16, %v4151_v29  ;;  %v4158_v52 = vsel %vm859_vm6, %v4138_v42, %v4157_v44 }
 0x89d   :  { %v3201_v18 = vsel %vm786_vm5, %v3200_v54, %v3196_v4  ;;  %v4159_v33 = vsel %vm861_vm7, %v4142_v1, %v4158_v52 }
 0x89e   :  { %v3138_v24 = vpop.permute.xlu0 %3137  ;;  %v3135_v39 = vpop.permute.xlu1 %3134  ;;  %v3216_v57 = vsel %vm861_vm7, %v3201_v18, %v3215_v58 }
 0x89f   :  { %v3209_v46 = vrot.slane %v3138_v24, %v7810_v14  ;;  %v3205_v11 = vrot.slane %v3135_v39, %v7807_v48 }
 0x8a1   :  { %v3210_v30 = vsel %vm786_vm5, %v3209_v46, %v3205_v11 }
 0x8a2   :  { %v4082_v32 = vpop.permute.xlu0 %4081  ;;  %v4058_v7 = vpop.permute.xlu1 %4057  ;;  %v3217_v28 = vsel %vm863_vm8, %v3210_v30, %v3216_v57 }
 0x8a3   :  { %v4146_v61 = vrot.slane %v4082_v32, %v7807_v48  ;;  %v4114_v54 = vrot.slane %v4058_v7, %v7807_v48  ;;  %v3219_v4 = vsel %vm866_vm9, %v3217_v28, -inf }
 0x8a4   :  { %3220 = vmax.xlane.f32.xlu1 %v3219_v4 }
 0x8a5   :  { %v4153_v23 = vsel %vm863_vm8, %v4114_v54, %v4152_v6  ;;  %v4160_v51 = vsel %vm863_vm8, %v4146_v61, %v4159_v33 }
 0x8a6   :  { %v4163_v9 = vsel %vm1941_vm10, %v4153_v23, -inf  ;;  %v4166_v20 = vsel %vm1941_vm10, %v4160_v51, -inf }
 0x8a7   :  { %4164 = vmax.xlane.f32.xlu0 %v4163_v9 }
 0x8ab   :  { %4167 = vmax.xlane.f32.xlu0 %v4166_v20 }
 0x931   :  { %v8805_v54 = vpop.xlane.xlu1 %3220 }
 0x932   :  { %9523 = vst [vmem:[#allocation64_spill] sm:$0xff] %v8805_v54 }
 0x934   :  { %v8761_v5 = vpop.xlane.xlu0 %4164 }
 0x935   :  { %9521 = vst [vmem:[#allocation66_spill] sm:$0xff] %v8761_v5  ;;  %v4174_v19 = vrot.slane %v8761_v5, %v7288_v15  ;;  %v4178_v3 = vrot.slane %v8761_v5, %v7291_v17  ;;  %v4182_v18 = vrot.slane %v8761_v5, %v7301_v22  ;;  %v4186_v46 = vrot.slane %v8761_v5, %v7323_v36 }
 0x936   :  { %v4190_v16 = vrot.slane %v8761_v5, %v7334_v45  ;;  %v4198_v13 = vrot.slane %v8761_v5, %v7352_v60 }
 0x937   :  { %v4251_v24 = vsub.f32 %v8549_v41, %v4174_v19  ;;  %v4252_v39 = vsub.f32 %v8546_v59, %v4178_v3  ;;  %v4253_v11 = vsub.f32 %v8565_v63, %v4182_v18  ;;  %v4254_v58 = vsub.f32 %v8581_v21, %v4186_v46 }
 0x938   :  { %v8771_v50 = vpop.xlane.xlu0 %4167  ;;  %v4194_v63 = vrot.slane %v8761_v5, %v7343_v53  ;;  %v4255_v42 = vsub.f32 %v8573_v0, %v4190_v16  ;;  %v8826_v19 = vrot.slane %v8805_v54, %v7301_v22  ;;  %v8838_v46 = vrot.slane %v8805_v54, %v7323_v36 }
 0x939   :  { %9522 = vst [vmem:[#allocation63_spill] sm:$0xff] %v8771_v50  ;;  %v4267_v27 = vmul.f32 1.442695, %v4251_v24  ;;  %v4269_v55 = vmul.f32 1.442695, %v4252_v39  ;;  %v4210_v8 = vrot.slane %v8771_v50, %v7291_v17  ;;  %v4214_v59 = vrot.slane %v8771_v50, %v7301_v22 }
 0x93a   :  { %v4271_v41 = vmul.f32 1.442695, %v4253_v11  ;;  %v4273_v30 = vmul.f32 1.442695, %v4254_v58  ;;  %v4218_v57 = vrot.slane %v8771_v50, %v7323_v36  ;;  %v4256_v1 = vsub.f32 %v8589_v43, %v4194_v63 }
 0x93b   :  { %6926 = vpow2.f32 %v4267_v27  ;;  %v4260_v56 = vsub.f32 %v8554_v35, %v4210_v8  ;;  %v4261_v21 = vsub.f32 %v8562_v62, %v4214_v59  ;;  %v4275_v35 = vmul.f32 1.442695, %v4255_v42 }
 0x93c   :  { %6928 = vpow2.f32 %v4269_v55  ;;  %v4222_v32 = vrot.slane %v8771_v50, %v7334_v45  ;;  %v4262_v0 = vsub.f32 %v8578_v40, %v4218_v57  ;;  %v4257_v62 = vsub.f32 %v8597_v25, %v4198_v13 }
 0x93d   :  { %6930 = vpow2.f32 %v4271_v41  ;;  %v4285_v12 = vmul.f32 1.442695, %v4260_v56  ;;  %v4287_v7 = vmul.f32 1.442695, %v4261_v21  ;;  %v4277_v61 = vmul.f32 1.442695, %v4256_v1 }
 0x93e   :  { %6932 = vpow2.f32 %v4273_v30  ;;  %v4206_v43 = vrot.slane %v8771_v50, %v7288_v15  ;;  %v4226_v40 = vrot.slane %v8771_v50, %v7343_v53  ;;  %v4263_v4 = vsub.f32 %v8570_v37, %v4222_v32  ;;  %v9524_v30 = vld [vmem:[#allocation50_spill] sm:$0xff]  ;;  %v9525_v21 = vld [vmem:[#allocation53_spill] sm:$0xff] }
 0x93f   :  { %6934 = vpow2.f32 %v4285_v12  ;;  %v4289_v44 = vmul.f32 1.442695, %v4262_v0  ;;  %v3226_v25 = vrot.slane %v8805_v54, %v7288_v15  ;;  %v4279_v52 = vmul.f32 1.442695, %v4257_v62  ;;  %v9526_v32 = vld [vmem:[#allocation61_spill] sm:$0xff]  ;;  %v9527_v62 = vld [vmem:[#allocation56_spill] sm:$0xff] }
 0x940   :  { %6936 = vpow2.f32 %v4275_v35  ;;  %v4259_v23 = vsub.f32 %v8557_v38, %v4206_v43  ;;  %v4230_v9 = vrot.slane %v8771_v50, %v7352_v60  ;;  %v4264_v33 = vsub.f32 %v8586_v26, %v4226_v40 }
 0x941   :  { %6938 = vpow2.f32 %v4287_v7  ;;  %v4291_v37 = vmul.f32 1.442695, %v4263_v4  ;;  %v3263_v3 = vsub.f32 %v8606_v10, %v3226_v25  ;;  %v3267_v10 = vsub.f32 %v8618_v34, %v8826_v19 }
 0x942   :  { %6940 = vpow2.f32 %v4277_v61  ;;  %v4283_v38 = vmul.f32 1.442695, %v4259_v23  ;;  %v4265_v26 = vsub.f32 %v8594_v2, %v4230_v9  ;;  %v4293_v18 = vmul.f32 1.442695, %v4264_v33  ;;  %v9530_v33 = vld [vmem:[#allocation51_spill] sm:$0xff] }
 0x943   :  { %6942 = vpow2.f32 %v4289_v44  ;;  %v3279_v11 = vmul.f32 1.442695, %v3263_v3  ;;  %v3230_v2 = vrot.slane %v8805_v54, %v7291_v17  ;;  %v3264_v27 = vsub.f32 %v8602_v49, %v3226_v25  ;;  %v9528_v44 = vld [vmem:[#allocation16_spill] sm:$0xff] }
 0x944   :  { %6944 = vpow2.f32 %v4279_v52  ;;  %v4295_v55 = vmul.f32 1.442695, %v4265_v26  ;;  %v3242_v34 = vrot.slane %v8805_v54, %v7334_v45  ;;  %v3269_v58 = vsub.f32 %v8634_v47, %v8838_v46  ;;  %v9529_v52 = vld [vmem:[#allocation62_spill] sm:$0xff]  ;;  %v9531_v26 = vld [vmem:[#allocation59_spill] sm:$0xff] }
 0x945   :  { %v8796_v28 = vpop.eup %6926  ;;  %6946 = vpow2.f32 %v4291_v37  ;;  %v3287_v41 = vmul.f32 1.442695, %v3267_v10  ;;  %v3265_v49 = vsub.f32 %v8610_v31, %v3230_v2  ;;  %v3281_v59 = vmul.f32 1.442695, %v3264_v27 }
 0x946   :  { %v8798_v29 = vpop.eup %6928  ;;  %4316 = vperm.xlu0 %6516, %v8796_v28   ;;  %6948 = vpow2.f32 %v4283_v38  ;;  %v3246_v42 = vrot.slane %v8805_v54, %v7343_v53  ;;  %v3271_v57 = vsub.f32 %v9524_v30, %v3242_v34  ;;  %v3291_v47 = vmul.f32 1.442695, %v3269_v58  ;;  %v9535_v30 = vld [vmem:[#allocation54_spill] sm:$0xff] }
 0x947   :  { %4319 = vperm.xlu1 %6515, %v8798_v29   ;;  %v8810_v6 = vpop.eup %6930  ;;  %6950 = vpow2.f32 %v4293_v18  ;;  %v3266_v12 = vsub.f32 %v9525_v21, %v3230_v2  ;;  %v3283_v31 = vmul.f32 1.442695, %v3265_v49  ;;  %v3250_v35 = vrot.slane %v8805_v54, %v7352_v60  ;;  %v9532_v2 = vld [vmem:[#allocation58_spill] sm:$0xff]  ;;  %v9534_v49 = vld [vmem:[#allocation60_spill] sm:$0xff] }
 0x948   :  { %v8819_v51 = vpop.eup %6932  ;;  %6952 = vpow2.f32 %v3279_v11  ;;  %v3273_v0 = vsub.f32 %v9526_v32, %v3246_v42  ;;  %v3295_v7 = vmul.f32 1.442695, %v3271_v57  ;;  %v3268_v61 = vsub.f32 %v9527_v62, %v8826_v19 }
 0x949   :  { %v8821_v20 = vpop.eup %6934  ;;  %6954 = vpow2.f32 %v4295_v55  ;;  %v3285_v43 = vmul.f32 1.442695, %v3266_v12  ;;  %v3254_v25 = vrot.slane %v8805_v54, %v9528_v44  ;;  %v3275_v23 = vsub.f32 %v9529_v52, %v3250_v35 }
 0x94a   :  { %4322 = vperm.xlu0 %6516, %v8810_v6   ;;  %v8831_v24 = vpop.eup %6936  ;;  %6956 = vpow2.f32 %v3287_v41  ;;  %v3299_v9 = vmul.f32 1.442695, %v3273_v0  ;;  %v3270_v37 = vsub.f32 %v9530_v33, %v8838_v46  ;;  %v3289_v19 = vmul.f32 1.442695, %v3268_v61  ;;  %v9543_v33 = vld [vmem:[#allocation57_spill] sm:$0xff] }
 0x94b   :  { %4343 = vperm.xlu1 %6515, %v8821_v20   ;;  %v8833_v39 = vpop.eup %6938  ;;  %6958 = vpow2.f32 %v3281_v59  ;;  %v3277_v18 = vsub.f32 %v9531_v26, %v3254_v25  ;;  %v3303_v10 = vmul.f32 1.442695, %v3275_v23  ;;  %v4202_v11 = vrot.slane %v8761_v5, %v9528_v44 }
 0x94c   :  { %v8846_v8 = vpop.eup %6940  ;;  %6960 = vpow2.f32 %v3291_v47  ;;  %v3272_v27 = vsub.f32 %v9532_v2, %v3242_v34  ;;  %v3293_v46 = vmul.f32 1.442695, %v3270_v37  ;;  %v3274_v57 = vsub.f32 %v9535_v30, %v3246_v42  ;;  %v9540_v42 = vld [vmem:[#allocation55_spill] sm:$0xff] }
 0x94d   :  { %v8848_v16 = vpop.eup %6942  ;;  %6962 = vpow2.f32 %v3283_v31  ;;  %v3307_v41 = vmul.f32 1.442695, %v3277_v18  ;;  %v4258_v59 = vsub.f32 %v9534_v49, %v4202_v11  ;;  %v9537_v31 = vld [vmem:[#allocation52_spill] sm:$0xff]  ;;  %v3278_v61 = vsub.f32 %v9540_v42, %v3254_v25 }
 0x94e   :  { %4325 = vperm.xlu0 %6516, %v8819_v51   ;;  %v8857_v56 = vpop.eup %6944  ;;  %6964 = vpow2.f32 %v3295_v7  ;;  %v3297_v47 = vmul.f32 1.442695, %v3272_v27  ;;  %v3276_v32 = vsub.f32 %v9537_v31, %v3250_v35  ;;  %v3301_v0 = vmul.f32 1.442695, %v3274_v57 }
 0x94f   :  { %4346 = vperm.xlu1 %6515, %v8833_v39   ;;  %v8859_v63 = vpop.eup %6946  ;;  %6966 = vpow2.f32 %v3285_v43  ;;  %v4281_v12 = vmul.f32 1.442695, %v4258_v59  ;;  %v4234_v52 = vrot.slane %v8771_v50, %v9528_v44 }
 0x950   :  { %v8867_v13 = vpop.eup %6948  ;;  %6968 = vpow2.f32 %v3299_v9  ;;  %v3305_v43 = vmul.f32 1.442695, %v3276_v32  ;;  %v3309_v9 = vmul.f32 1.442695, %v3278_v61 }
 0x951   :  { %v8869_v1 = vpop.eup %6950  ;;  %6970 = vpow2.f32 %v3289_v19  ;;  %v4266_v37 = vsub.f32 %v9543_v33, %v4234_v52 }
 0x952   :  { %4328 = vperm.xlu0 %6516, %v8831_v24   ;;  %v8878_v40 = vpop.eup %6952  ;;  %6972 = vpow2.f32 %v3303_v10 }
 0x953   :  { %4349 = vperm.xlu1 %6515, %v8848_v16   ;;  %v8880_v4 = vpop.eup %6954  ;;  %6974 = vpow2.f32 %v3293_v46  ;;  %v4297_v26 = vmul.f32 1.442695, %v4266_v37 }
 0x954   :  { %v8889_v3 = vpop.eup %6956  ;;  %6976 = vpow2.f32 %v3307_v41 }
 0x955   :  { %v8891_v38 = vpop.eup %6958  ;;  %6978 = vpow2.f32 %v3297_v47 }
 0x956   :  { %4331 = vperm.xlu0 %6516, %v8846_v8   ;;  %v8899_v55 = vpop.eup %6960  ;;  %6980 = vpow2.f32 %v4281_v12 }
 0x957   :  { %4352 = vperm.xlu1 %6515, %v8859_v63   ;;  %9533 = vst [vmem:[#allocation65_spill] sm:$0xff] %v8899_v55  ;;  %v8901_v58 = vpop.eup %6962  ;;  %6982 = vpow2.f32 %v3301_v0 }
 0x958   :  { %v8907_v21 = vpop.eup %6964  ;;  %6984 = vpow2.f32 %v3305_v43 }
 0x959   :  { %9536 = vst [vmem:[#allocation17_spill] sm:$0xff] %v8907_v21  ;;  %v8909_v34 = vpop.eup %6966  ;;  %6986 = vpow2.f32 %v3309_v9 }
 0x95a   :  { %4334 = vperm.xlu0 %6516, %v8857_v56   ;;  %v8914_v7 = vpop.eup %6968  ;;  %6988 = vpow2.f32 %v4297_v26 }
 0x95b   :  { %4355 = vperm.xlu1 %6515, %v8869_v1   ;;  %9538 = vst [vmem:[#allocation25_spill] sm:$0xff] %v8914_v7  ;;  %v8916_v62 = vpop.eup %6970 }
 0x95c   :  { %9539 = vst [vmem:[#allocation24_spill] sm:$0xff] %v8916_v62  ;;  %v8923_v23 = vpop.eup %6972 }
 0x95d   :  { %9541 = vst [vmem:[#allocation27_spill] sm:$0xff] %v8923_v23  ;;  %v8925_v35 = vpop.eup %6974 }
 0x95e   :  { %4340 = vperm.xlu0 %6516, %v8867_v13   ;;  %9542 = vst [vmem:[#allocation26_spill] sm:$0xff] %v8925_v35  ;;  %v8930_v19 = vpop.eup %6976 }
 0x95f   :  { %4358 = vperm.xlu1 %6515, %v8880_v4   ;;  %9544 = vst [vmem:[#allocation31_spill] sm:$0xff] %v8930_v19  ;;  %v8932_v25 = vpop.eup %6978 }
 0x960   :  { %9545 = vst [vmem:[#allocation30_spill] sm:$0xff] %v8932_v25  ;;  %v8936_v18 = vpop.eup %6980 }
 0x961   :  { %9546 = vst [vmem:[#allocation39_spill] sm:$0xff] %v8936_v18  ;;  %v8938_v10 = vpop.eup %6982 }
 0x962   :  { %3328 = vperm.xlu0 %6516, %v8878_v40   ;;  %9547 = vst [vmem:[#allocation38_spill] sm:$0xff] %v8938_v10  ;;  %v8942_v11 = vpop.eup %6984 }
 0x963   :  { %3331 = vperm.xlu1 %6515, %v8891_v38   ;;  %9548 = vst [vmem:[#allocation35_spill] sm:$0xff] %v8942_v11  ;;  %v8945_v2 = vpop.eup %6986 }
 0x964   :  { %9549 = vst [vmem:[#allocation34_spill] sm:$0xff] %v8945_v2  ;;  %v8948_v27 = vpop.eup %6988 }
 0x965   :  { %9550 = vst [vmem:[#allocation43_spill] sm:$0xff] %v8948_v27 }
 0x966   :  { %3340 = vperm.xlu0 %6516, %v8889_v3  }
 0x967   :  { %3334 = vperm.xlu1 %6515, %v8901_v58  }
 0x96a   :  { %3346 = vperm.xlu0 %6516, %v8899_v55  }
 0x96b   :  { %3337 = vperm.xlu1 %6515, %v8909_v34  }
 0x96e   :  { %3352 = vperm.xlu0 %6516, %v8907_v21  }
 0x96f   :  { %3343 = vperm.xlu1 %6515, %v8916_v62  }
 0x972   :  { %3358 = vperm.xlu0 %6516, %v8914_v7  }
 0x973   :  { %3349 = vperm.xlu1 %6515, %v8925_v35  }
 0x976   :  { %3364 = vperm.xlu0 %6516, %v8923_v23  }
 0x977   :  { %3355 = vperm.xlu1 %6515, %v8932_v25  }
 0x97a   :  { %3370 = vperm.xlu0 %6516, %v8930_v19  }
 0x97b   :  { %3361 = vperm.xlu1 %6515, %v8938_v10  }
 0x97e   :  { %4337 = vperm.xlu0 %6516, %v8936_v18  }
 0x97f   :  { %3367 = vperm.xlu1 %6515, %v8942_v11  }
 0x983   :  { %3373 = vperm.xlu1 %6515, %v8945_v2  }
 0x987   :  { %4361 = vperm.xlu1 %6515, %v8948_v27  }
 0x9c5   :  { %v4317_v46 = vpop.permute.xlu0 %4316 }
 0x9c6   :  { %v4320_v41 = vpop.permute.xlu1 %4319  ;;  %v4366_v18 = vrot.slane %v4317_v46, %v7807_v48 }
 0x9c7   :  { %v4370_v2 = vrot.slane %v4320_v41, %v7807_v48 }
 0x9c9   :  { %v4323_v49 = vpop.permute.xlu0 %4322  ;;  %v4427_v25 = vsel %vm851_vm1, %v4370_v2, %v4366_v18 }
 0x9ca   :  { %v4344_v30 = vpop.permute.xlu1 %4343  ;;  %v4374_v11 = vrot.slane %v4323_v49, %v7807_v48 }
 0x9cb   :  { %v4402_v21 = vrot.slane %v4344_v30, %v7807_v48 }
 0x9cc   :  { %v4428_v46 = vsel %vm853_vm2, %v4374_v11, %v4427_v25 }
 0x9cd   :  { %v4326_v59 = vpop.permute.xlu0 %4325 }
 0x9ce   :  { %v4347_v47 = vpop.permute.xlu1 %4346  ;;  %v4378_v44 = vrot.slane %v4326_v59, %v7807_v48 }
 0x9d0   :  { %v4429_v49 = vsel %vm855_vm3, %v4378_v44, %v4428_v46 }
 0x9d1   :  { %v4329_v57 = vpop.permute.xlu0 %4328 }
 0x9d2   :  { %v4350_v31 = vpop.permute.xlu1 %4349  ;;  %v4382_v7 = vrot.slane %v4329_v57, %v7807_v48 }
 0x9d4   :  { %v4430_v57 = vsel %vm857_vm4, %v4382_v7, %v4429_v49 }
 0x9d5   :  { %v4332_v12 = vpop.permute.xlu0 %4331 }
 0x9d6   :  { %v8951_v0 = vpop.permute.xlu1 %4352  ;;  %v4386_v35 = vrot.slane %v4332_v12, %v7807_v48 }
 0x9d8   :  { %v4431_v18 = vsel %vm859_vm6, %v4386_v35, %v4430_v57  ;;  %v4414_v57 = vrot.slane %v8951_v0, %v7807_v48 }
 0x9d9   :  { %v4335_v32 = vpop.permute.xlu0 %4334 }
 0x9da   :  { %v8953_v61 = vpop.permute.xlu1 %4355  ;;  %v4390_v41 = vrot.slane %v4335_v32, %v7807_v48 }
 0x9db   :  { %v4418_v0 = vrot.slane %v8953_v61, %v7807_v48 }
 0x9dc   :  { %v4432_v44 = vsel %vm861_vm7, %v4390_v41, %v4431_v18 }
 0x9dd   :  { %v4341_v42 = vpop.permute.xlu0 %4340 }
 0x9de   :  { %v8955_v52 = vpop.permute.xlu1 %4358  ;;  %v4398_v10 = vrot.slane %v4341_v42, %v7807_v48  ;;  %v4406_v42 = vrot.slane %v4347_v47, %v7807_v48 }
 0x9e0   :  { %v4434_v59 = vsel %vm851_vm1, %v4402_v21, %v4398_v10 }
 0x9e1   :  { %v3329_v43 = vpop.permute.xlu0 %3328  ;;  %v4435_v12 = vsel %vm853_vm2, %v4406_v42, %v4434_v59 }
 0x9e2   :  { %v3332_v33 = vpop.permute.xlu1 %3331  ;;  %v3378_v21 = vrot.slane %v3329_v43, %v7807_v48 }
 0x9e3   :  { %v3382_v10 = vrot.slane %v3332_v33, %v7810_v14 }
 0x9e5   :  { %v3341_v9 = vpop.permute.xlu0 %3340 }
 0x9e6   :  { %v3335_v26 = vpop.permute.xlu1 %3334  ;;  %v3396_v47 = vrot.slane %v3341_v9, %v7807_v48 }
 0x9e7   :  { %v3387_v7 = vrot.slane %v3335_v26, %v7807_v48 }
 0x9e9   :  { %v3347_v37 = vpop.permute.xlu0 %3346 }
 0x9ea   :  { %v3338_v5 = vpop.permute.xlu1 %3337  ;;  %v3405_v49 = vrot.slane %v3347_v37, %v7807_v48 }
 0x9eb   :  { %v3391_v2 = vrot.slane %v3338_v5, %v7810_v14  ;;  %v4410_v5 = vrot.slane %v4350_v31, %v7807_v48 }
 0x9ed   :  { %v3353_v50 = vpop.permute.xlu0 %3352  ;;  %v3392_v41 = vsel %vm786_vm5, %v3391_v2, %v3387_v7  ;;  %v4436_v26 = vsel %vm855_vm3, %v4410_v5, %v4435_v12 }
 0x9ee   :  { %v3344_v27 = vpop.permute.xlu1 %3343 }
 0x9ef   :  { %v3400_v25 = vrot.slane %v3344_v27, %v7810_v14 }
 0x9f1   :  { %v3359_v54 = vpop.permute.xlu0 %3358  ;;  %v3401_v31 = vsel %vm786_vm5, %v3400_v25, %v3396_v47  ;;  %v4422_v47 = vrot.slane %v8955_v52, %v7807_v48 }
 0x9f2   :  { %v3350_v23 = vpop.permute.xlu1 %3349  ;;  %v3423_v9 = vrot.slane %v3359_v54, %v7807_v48 }
 0x9f3   :  { %v3409_v35 = vrot.slane %v3350_v23, %v7810_v14  ;;  %v3414_v23 = vrot.slane %v3353_v50, %v7807_v48 }
 0x9f5   :  { %v3365_v19 = vpop.permute.xlu0 %3364  ;;  %v3410_v37 = vsel %vm786_vm5, %v3409_v35, %v3405_v49 }
 0x9f6   :  { %v3356_v62 = vpop.permute.xlu1 %3355  ;;  %v3432_v2 = vrot.slane %v3365_v19, %v7807_v48 }
 0x9f7   :  { %v3418_v46 = vrot.slane %v3356_v62, %v7810_v14  ;;  %v3383_v62 = vsel %vm786_vm5, %v3382_v10, %v3378_v21 }
 0x9f8   :  { %v3447_v18 = vsel %vm851_vm1, %v3392_v41, %v3383_v62 }
 0x9f9   :  { %v3371_v55 = vpop.permute.xlu0 %3370  ;;  %v3419_v50 = vsel %vm786_vm5, %v3418_v46, %v3414_v23 }
 0x9fa   :  { %v3362_v11 = vpop.permute.xlu1 %3361  ;;  %v3441_v19 = vrot.slane %v3371_v55, %v7807_v48 }
 0x9fb   :  { %v3427_v43 = vrot.slane %v3362_v11, %v7810_v14 }
 0x9fd   :  { %v4338_v30 = vpop.permute.xlu0 %4337  ;;  %v3428_v12 = vsel %vm786_vm5, %v3427_v43, %v3423_v9 }
 0x9fe   :  { %v4394_v32 = vrot.slane %v4338_v30, %v7807_v48  ;;  %v3368_v59 = vpop.permute.xlu1 %3367  ;;  %v3448_v30 = vsel %vm853_vm2, %v3401_v31, %v3447_v18 }
 0x9ff   :  { %v3436_v42 = vrot.slane %v3368_v59, %v7810_v14  ;;  %v3449_v25 = vsel %vm855_vm3, %v3410_v37, %v3448_v30 }
 0xa00   :  { %v4433_v27 = vsel %vm863_vm8, %v4394_v32, %v4432_v44  ;;  %v4437_v32 = vsel %vm857_vm4, %v4414_v57, %v4436_v26  ;;  %v3450_v44 = vsel %vm857_vm4, %v3419_v50, %v3449_v25 }
 0xa01   :  { %v4443_v33 = vsel %vm1941_vm10, %v4433_v27, 0.0  ;;  %v3437_v54 = vsel %vm786_vm5, %v3436_v42, %v3432_v2  ;;  %v3451_v10 = vsel %vm859_vm6, %v3428_v12, %v3450_v44  ;;  %v4438_v5 = vsel %vm859_vm6, %v4418_v0, %v4437_v32 }
 0xa02   :  { %4444 = vadd.xlane.f32.xlu1 %v4443_v33  ;;  %v3374_v11 = vpop.permute.xlu1 %3373  ;;  %v3452_v35 = vsel %vm861_vm7, %v3437_v54, %v3451_v10  ;;  %v4439_v49 = vsel %vm861_vm7, %v4422_v47, %v4438_v5 }
 0xa03   :  { %v3445_v21 = vrot.slane %v3374_v11, %v7810_v14 }
 0xa05   :  { %v3446_v7 = vsel %vm786_vm5, %v3445_v21, %v3441_v19 }
 0xa06   :  { %v4362_v46 = vpop.permute.xlu1 %4361  ;;  %v3453_v61 = vsel %vm863_vm8, %v3446_v7, %v3452_v35 }
 0xa07   :  { %v4426_v27 = vrot.slane %v4362_v46, %v7807_v48  ;;  %v3455_v55 = vsel %vm866_vm9, %v3453_v61, 0.0 }
 0xa08   :  { %3456 = vadd.xlane.f32.xlu0 %v3455_v55 }
 0xa09   :  { %v4440_v41 = vsel %vm863_vm8, %v4426_v27, %v4439_v49 }
 0xa0a   :  { %v4446_v43 = vsel %vm1941_vm10, %v4440_v41, 0.0 }
 0xa0c   :  { %4447 = vadd.xlane.f32.xlu0 %v4446_v43 }
 0xa8f   :  { %v4445_v33 = vpop.xlane.xlu1 %4444 }
 0xa90   :  { %6990 = vrcp.f32 %v4445_v33 }
 0xa95   :  { %v3457_v26 = vpop.xlane.xlu0 %3456 }
 0xa99   :  { %v4448_v62 = vpop.xlane.xlu0 %4447 }
 0xa9a   :  { %v9024_v23 = vpop.eup %6990  ;;  %6992 = vrcp.f32 %v4448_v62 }
 0xa9b   :  { %v4460_v52 = vrot.slane %v9024_v23, %v7291_v17  ;;  %v4456_v31 = vrot.slane %v9024_v23, %v7288_v15  ;;  %v4464_v59 = vrot.slane %v9024_v23, %v7301_v22  ;;  %v4468_v57 = vrot.slane %v9024_v23, %v7323_v36 }
 0xa9c   :  { %v4472_v50 = vrot.slane %v9024_v23, %v7334_v45  ;;  %6994 = vrcp.f32 %v3457_v26  ;;  %v4480_v44 = vrot.slane %v9024_v23, %v7352_v60 }
 0xa9d   :  { %v4534_v9 = vmul.f32 %v8798_v29, %v4460_v52  ;;  %v4533_v37 = vmul.f32 %v8796_v28, %v4456_v31  ;;  %v4535_v42 = vmul.f32 %v8810_v6, %v4464_v59  ;;  %v4536_v54 = vmul.f32 %v8819_v51, %v4468_v57 }
 0xa9e   :  { %v4476_v28 = vrot.slane %v9024_v23, %v7343_v53  ;;  %v4537_v11 = vmul.f32 %v8831_v24, %v4472_v50 }
 0xa9f   :  { %v4554_v18 = vpack.c.bf16 %v4534_v9, %v4534_v9  ;;  %v4553_v2 = vpack.c.bf16 %v4533_v37, %v4533_v37  ;;  %v4555_v25 = vpack.c.bf16 %v4535_v42, %v4535_v42  ;;  %v4556_v6 = vpack.c.bf16 %v4536_v54, %v4536_v54 }
 0xaa0   :  { %v4538_v0 = vmul.f32 %v8846_v8, %v4476_v28  ;;  %v4557_v21 = vpack.c.bf16 %v4537_v11, %v4537_v11  ;;  %v4539_v8 = vmul.f32 %v8857_v56, %v4480_v44 }
 0xaa1   :  { %v4587_v30 = vunpack.c.l.b16 %v4554_v18  ;;  %v4586_v12 = vunpack.c.l.b16 %v4553_v2  ;;  %v4588_v29 = vunpack.c.l.b16 %v4555_v25  ;;  %v4589_v19 = vunpack.c.l.b16 %v4556_v6  ;;  %v9551_v6 = vld [vmem:[#allocation24_spill] sm:$0xff] }
 0xaa2   :  { %v4590_v47 = vunpack.c.l.b16 %v4557_v21  ;;  %v4558_v46 = vpack.c.bf16 %v4538_v0, %v4538_v0  ;;  %v4559_v41 = vpack.c.bf16 %v4539_v8, %v4539_v8  ;;  %v9553_v21 = vld [vmem:[#allocation26_spill] sm:$0xff] }
 0xaa3   :  { %4606 = vperm.xlu0 %6516, %v4587_v30   ;;  %4603 = vperm.xlu1 %6515, %v4586_v12  }
 0xaa4   :  { %v9043_v32 = vpop.eup %6992  ;;  %v4591_v43 = vunpack.c.l.b16 %v4558_v46 }
 0xaa5   :  { %v4492_v51 = vrot.slane %v9043_v32, %v7291_v17  ;;  %v4496_v10 = vrot.slane %v9043_v32, %v7301_v22  ;;  %v4500_v35 = vrot.slane %v9043_v32, %v7323_v36  ;;  %v4488_v61 = vrot.slane %v9043_v32, %v7288_v15 }
 0xaa6   :  { %v9059_v27 = vpop.eup %6994  ;;  %v4508_v59 = vrot.slane %v9043_v32, %v7343_v53 }
 0xaa7   :  { %4609 = vperm.xlu1 %6515, %v4588_v29   ;;  %v4542_v7 = vmul.f32 %v8821_v20, %v4492_v51  ;;  %v4543_v24 = vmul.f32 %v8833_v39, %v4496_v10  ;;  %v4544_v20 = vmul.f32 %v8848_v16, %v4500_v35  ;;  %v4504_v39 = vrot.slane %v9043_v32, %v7334_v45  ;;  %v9554_v35 = vld [vmem:[#allocation17_spill] sm:$0xff] }
 0xaa8   :  { %v4541_v56 = vmul.f32 %v8867_v13, %v4488_v61  ;;  %v3463_v33 = vrot.slane %v9059_v27, %v7288_v15  ;;  %v4592_v16 = vunpack.c.l.b16 %v4559_v41  ;;  %v3467_v13 = vrot.slane %v9059_v27, %v7291_v17 }
 0xaa9   :  { %v4562_v5 = vpack.c.bf16 %v4542_v7, %v4542_v7  ;;  %v4563_v49 = vpack.c.bf16 %v4543_v24, %v4543_v24  ;;  %v4564_v52 = vpack.c.bf16 %v4544_v20, %v4544_v20  ;;  %v4545_v31 = vmul.f32 %v8859_v63, %v4504_v39  ;;  %v9557_v39 = vld [vmem:[#allocation38_spill] sm:$0xff] }
 0xaaa   :  { %v4561_v62 = vpack.c.bf16 %v4541_v56, %v4541_v56  ;;  %v3500_v9 = vmul.f32 %v8878_v40, %v3463_v33  ;;  %v3501_v37 = vmul.f32 %v8891_v38, %v3463_v33  ;;  %v4546_v18 = vmul.f32 %v8869_v1, %v4508_v59  ;;  %v9560_v59 = vld [vmem:[#allocation35_spill] sm:$0xff] }
 0xaab   :  { %4612 = vperm.xlu1 %6515, %v4589_v19   ;;  %v4595_v55 = vunpack.c.l.b16 %v4562_v5  ;;  %v4596_v26 = vunpack.c.l.b16 %v4563_v49  ;;  %v4597_v42 = vunpack.c.l.b16 %v4564_v52  ;;  %v4565_v57 = vpack.c.bf16 %v4545_v31, %v4545_v31  ;;  %v9555_v5 = vld [vmem:[#allocation30_spill] sm:$0xff]  ;;  %v9556_v49 = vld [vmem:[#allocation25_spill] sm:$0xff]  ;;  %v9559_v52 = vld [vmem:[#allocation27_spill] sm:$0xff] }
 0xaac   :  { %v4512_v63 = vrot.slane %v9043_v32, %v7352_v60  ;;  %v3471_v2 = vrot.slane %v9059_v27, %v7301_v22  ;;  %v4594_v50 = vunpack.c.l.b16 %v4561_v62  ;;  %v3518_v30 = vpack.c.bf16 %v3501_v37, %v3500_v9 }
 0xaad   :  { %4630 = vperm.xlu0 %6516, %v4595_v55   ;;  %v3502_v40 = vmul.f32 %v8901_v58, %v3467_v13  ;;  %v3503_v38 = vmul.f32 %v8909_v34, %v3467_v13  ;;  %v4598_v12 = vunpack.c.l.b16 %v4565_v57  ;;  %v4566_v25 = vpack.c.bf16 %v4546_v18, %v4546_v18  ;;  %v9561_v13 = vld [vmem:[#allocation31_spill] sm:$0xff]  ;;  %v9562_v57 = vld [vmem:[#allocation34_spill] sm:$0xff] }
 0xaae   :  { %v4547_v54 = vmul.f32 %v8880_v4, %v4512_v63  ;;  %v3475_v1 = vrot.slane %v9059_v27, %v7323_v36  ;;  %v3536_v28 = vunpack.c.h.b16 %v3518_v30  ;;  %v3504_v22 = vmul.f32 %v8889_v3, %v3471_v2  ;;  %v9552_v4 = vld [vmem:[#allocation65_spill] sm:$0xff] }
 0xaaf   :  { %4615 = vperm.xlu1 %6515, %v4590_v47   ;;  %v3519_v29 = vpack.c.bf16 %v3503_v38, %v3502_v40  ;;  %v3505_v11 = vmul.f32 %v9551_v6, %v3471_v2  ;;  %v4599_v0 = vunpack.c.l.b16 %v4566_v25  ;;  %v3479_v34 = vrot.slane %v9059_v27, %v7334_v45 }
 0xab0   :  { %v4567_v58 = vpack.c.bf16 %v4547_v54, %v4547_v54  ;;  %v3506_v51 = vmul.f32 %v9552_v4, %v3475_v1  ;;  %v3507_v36 = vmul.f32 %v9553_v21, %v3475_v1  ;;  %v3483_v3 = vrot.slane %v9059_v27, %v7343_v53 }
 0xab1   :  { %4633 = vperm.xlu0 %6516, %v4596_v26   ;;  %v3537_v44 = vunpack.c.l.b16 %v3519_v29  ;;  %v3520_v19 = vpack.c.bf16 %v3505_v11, %v3504_v22  ;;  %v3508_v8 = vmul.f32 %v9554_v35, %v3479_v34  ;;  %v3509_v47 = vmul.f32 %v9555_v5, %v3479_v34 }
 0xab2   :  { %v4600_v10 = vunpack.c.l.b16 %v4567_v58  ;;  %v3521_v24 = vpack.c.bf16 %v3507_v36, %v3506_v51  ;;  %v3535_v45 = vunpack.c.l.b16 %v3518_v30  ;;  %v3487_v46 = vrot.slane %v9059_v27, %v7352_v60 }
 0xab3   :  { %4618 = vperm.xlu1 %6515, %v4591_v43   ;;  %v3539_v7 = vunpack.c.l.b16 %v3520_v19  ;;  %v3522_v55 = vpack.c.bf16 %v3509_v47, %v3508_v8  ;;  %v3510_v20 = vmul.f32 %v9556_v49, %v3483_v3  ;;  %v3511_v41 = vmul.f32 %v9557_v39, %v3483_v3  ;;  %v9558_v43 = vld [vmem:[#allocation16_spill] sm:$0xff] }
 0xab4   :  { %v3541_v61 = vunpack.c.l.b16 %v3521_v24  ;;  %v3538_v53 = vunpack.c.h.b16 %v3519_v29  ;;  %v3491_v56 = vrot.slane %v9059_v27, %v9558_v43  ;;  %v3512_v31 = vmul.f32 %v9559_v52, %v3487_v46 }
 0xab5   :  { %4636 = vperm.xlu0 %6516, %v4597_v42   ;;  %v3543_v33 = vunpack.c.l.b16 %v3522_v55  ;;  %v3523_v26 = vpack.c.bf16 %v3511_v41, %v3510_v20  ;;  %v3540_v60 = vunpack.c.h.b16 %v3520_v19  ;;  %v4484_v62 = vrot.slane %v9024_v23, %v9558_v43 }
 0xab6   :  { %v3514_v42 = vmul.f32 %v9561_v13, %v3491_v56  ;;  %v3515_v18 = vmul.f32 %v9562_v57, %v3491_v56  ;;  %v3542_v27 = vunpack.c.h.b16 %v3521_v24  ;;  %v3544_v40 = vunpack.c.h.b16 %v3522_v55 }
 0xab7   :  { %4621 = vperm.xlu1 %6515, %v4592_v16   ;;  %v3513_v16 = vmul.f32 %v9560_v59, %v3487_v46  ;;  %v3545_v9 = vunpack.c.l.b16 %v3523_v26  ;;  %v3546_v23 = vunpack.c.h.b16 %v3523_v26  ;;  %v4516_v25 = vrot.slane %v9043_v32, %v9558_v43 }
 0xab8   :  { %v3525_v2 = vpack.c.bf16 %v3515_v18, %v3514_v42 }
 0xab9   :  { %4639 = vperm.xlu0 %6516, %v4598_v12   ;;  %v3524_v37 = vpack.c.bf16 %v3513_v16, %v3512_v31 }
 0xaba   :  { %v3549_v38 = vunpack.c.l.b16 %v3525_v2  ;;  %v3550_v22 = vunpack.c.h.b16 %v3525_v2 }
 0xabb   :  { %4627 = vperm.xlu1 %6515, %v4594_v50   ;;  %v3547_v63 = vunpack.c.l.b16 %v3524_v37  ;;  %v9563_v50 = vld [vmem:[#allocation39_spill] sm:$0xff]  ;;  %v3548_v1 = vunpack.c.h.b16 %v3524_v37 }
 0xabc   :  { %v4540_v30 = vmul.f32 %v9563_v50, %v4484_v62 }
 0xabd   :  { %4642 = vperm.xlu0 %6516, %v4599_v0  }
 0xabe   :  { %v4560_v12 = vpack.c.bf16 %v4540_v30, %v4540_v30 }
 0xabf   :  { %3555 = vperm.xlu1 %6515, %v3536_v28   ;;  %v9564_v28 = vld [vmem:[#allocation43_spill] sm:$0xff] }
 0xac0   :  { %v4593_v54 = vunpack.c.l.b16 %v4560_v12  ;;  %v4548_v29 = vmul.f32 %v9564_v28, %v4516_v25 }
 0xac1   :  { %4645 = vperm.xlu0 %6516, %v4600_v10  }
 0xac2   :  { %v4568_v6 = vpack.c.bf16 %v4548_v29, %v4548_v29 }
 0xac3   :  { %3558 = vperm.xlu1 %6515, %v3537_v44  }
 0xac4   :  { %v4601_v11 = vunpack.c.l.b16 %v4568_v6 }
 0xac5   :  { %3552 = vperm.xlu0 %6516, %v3535_v45  }
 0xac7   :  { %3564 = vperm.xlu1 %6515, %v3539_v7  }
 0xac9   :  { %3561 = vperm.xlu0 %6516, %v3538_v53  }
 0xacb   :  { %3570 = vperm.xlu1 %6515, %v3541_v61  }
 0xacd   :  { %3567 = vperm.xlu0 %6516, %v3540_v60  }
 0xacf   :  { %3576 = vperm.xlu1 %6515, %v3543_v33  }
 0xad1   :  { %3573 = vperm.xlu0 %6516, %v3542_v27  }
 0xad3   :  { %3582 = vperm.xlu1 %6515, %v3545_v9  }
 0xad5   :  { %3579 = vperm.xlu0 %6516, %v3544_v40  }
 0xad7   :  { %3588 = vperm.xlu1 %6515, %v3547_v63  }
 0xad9   :  { %3585 = vperm.xlu0 %6516, %v3546_v23  }
 0xadb   :  { %3594 = vperm.xlu1 %6515, %v3549_v38  }
 0xadd   :  { %3591 = vperm.xlu0 %6516, %v3548_v1  }
 0xadf   :  { %4624 = vperm.xlu1 %6515, %v4593_v54  }
 0xae1   :  { %3597 = vperm.xlu0 %6516, %v3550_v22  }
 0xae5   :  { %4648 = vperm.xlu0 %6516, %v4601_v11  }
 0xb22   :  { %v4604_v0 = vpop.permute.xlu1 %4603  ;;  %v4607_v44 = vpop.permute.xlu0 %4606 }
 0xb23   :  { %v4657_v41 = vrot.slane %v4607_v44, %v7807_v48  ;;  %v4653_v53 = vrot.slane %v4604_v0, %v7807_v48 }
 0xb25   :  { %v4714_v59 = vsel %vm851_vm1, %v4657_v41, %v4653_v53 }
 0xb26   :  { %v9110_v58 = vpop.permute.xlu1 %4609 }
 0xb27   :  { %v4661_v42 = vrot.slane %v9110_v58, %v7807_v48 }
 0xb2a   :  { %v9112_v34 = vpop.permute.xlu1 %4612 }
 0xb2b   :  { %v4665_v38 = vrot.slane %v9112_v34, %v7807_v48  ;;  %v4715_v34 = vsel %vm853_vm2, %v4661_v42, %v4714_v59 }
 0xb2c   :  { %v4631_v32 = vpop.permute.xlu0 %4630 }
 0xb2d   :  { %v4689_v43 = vrot.slane %v4631_v32, %v7807_v48 }
 0xb2e   :  { %v9114_v19 = vpop.permute.xlu1 %4615 }
 0xb2f   :  { %v4669_v44 = vrot.slane %v9114_v19, %v7807_v48 }
 0xb30   :  { %v4634_v51 = vpop.permute.xlu0 %4633 }
 0xb31   :  { %v4693_v52 = vrot.slane %v4634_v51, %v7807_v48 }
 0xb32   :  { %v9116_v4 = vpop.permute.xlu1 %4618 }
 0xb34   :  { %v4637_v36 = vpop.permute.xlu0 %4636 }
 0xb35   :  { %v4697_v57 = vrot.slane %v4637_v36, %v7807_v48  ;;  %v4673_v36 = vrot.slane %v9116_v4, %v7807_v48 }
 0xb36   :  { %v9118_v21 = vpop.permute.xlu1 %4621 }
 0xb37   :  { %v4677_v4 = vrot.slane %v9118_v21, %v7807_v48 }
 0xb38   :  { %v4640_v3 = vpop.permute.xlu0 %4639 }
 0xb39   :  { %v4701_v6 = vrot.slane %v4640_v3, %v7807_v48 }
 0xb3a   :  { %v4628_v10 = vpop.permute.xlu1 %4627 }
 0xb3b   :  { %v4685_v39 = vrot.slane %v4628_v10, %v7807_v48 }
 0xb3c   :  { %v9120_v24 = vpop.permute.xlu0 %4642 }
 0xb3d   :  { %v4721_v26 = vsel %vm851_vm1, %v4689_v43, %v4685_v39 }
 0xb3e   :  { %v3556_v7 = vpop.permute.xlu1 %3555  ;;  %v4722_v62 = vsel %vm853_vm2, %v4693_v52, %v4721_v26 }
 0xb3f   :  { %v3606_v2 = vrot.slane %v3556_v7, %v7810_v14  ;;  %v4723_v12 = vsel %vm855_vm3, %v4697_v57, %v4722_v62  ;;  %v6280_v57 = vld [vmem:[%s9270_s8 + $0x9] ss:$0 sm:$0xff] }
 0xb40   :  { %v9122_v8 = vpop.permute.xlu0 %4645  ;;  %v4724_v10 = vsel %vm857_vm4, %v4701_v6, %v4723_v12 }
 0xb42   :  { %v3559_v35 = vpop.permute.xlu1 %3558 }
 0xb43   :  { %v3611_v9 = vrot.slane %v3559_v35, %v7807_v48 }
 0xb44   :  { %v3553_v47 = vpop.permute.xlu0 %3552 }
 0xb45   :  { %v3602_v37 = vrot.slane %v3553_v47, %v7807_v48  ;;  %v4705_v47 = vrot.slane %v9120_v24, %v7807_v48 }
 0xb46   :  { %v3565_v5 = vpop.permute.xlu1 %3564 }
 0xb47   :  { %v3620_v18 = vrot.slane %v3565_v5, %v7807_v48  ;;  %v3607_v1 = vsel %vm786_vm5, %v3606_v2, %v3602_v37  ;;  %v9567_v37 = vld [vmem:[#allocation66_spill] sm:$0xff] }
 0xb48   :  { %v3562_v46 = vpop.permute.xlu0 %3561 }
 0xb49   :  { %v3615_v31 = vrot.slane %v3562_v46, %v7810_v14 }
 0xb4a   :  { %v3571_v45 = vpop.permute.xlu1 %3570 }
 0xb4b   :  { %v3616_v50 = vsel %vm786_vm5, %v3615_v31, %v3611_v9  ;;  %v3629_v30 = vrot.slane %v3571_v45, %v7807_v48 }
 0xb4c   :  { %v3568_v55 = vpop.permute.xlu0 %3567  ;;  %v3671_v11 = vsel %vm851_vm1, %v3616_v50, %v3607_v1  ;;  %vm4549_vm1 = vcmp.gt.f32.partialorder %v9567_v37, -1e+20  ;;  %v6281_v50 = vld [vmem:[%s9270_s8 + $0xa] ss:$0 sm:$0xff] }
 0xb4d   :  { %v3624_v16 = vrot.slane %v3568_v55, %v7810_v14  ;;  %v4709_v55 = vrot.slane %v9122_v8, %v7807_v48  ;;  %v6663_v37 = vld [vmem:[#allocation10 + $0xf4] ss:$8 sps:$4 sm:$0xff]  }
 0xb4e   :  { %v3577_v61 = vpop.permute.xlu1 %3576 }
 0xb4f   :  { %v3625_v23 = vsel %vm786_vm5, %v3624_v16, %v3620_v18  ;;  %v3638_v25 = vrot.slane %v3577_v61, %v7807_v48  ;;  %v4716_v61 = vsel %vm855_vm3, %v4665_v38, %v4715_v34  ;;  %v9565_v16 = vmov 0.0  }
 0xb50   :  { %v3574_v20 = vpop.permute.xlu0 %3573  ;;  %v3672_v32 = vsel %vm853_vm2, %v3625_v23, %v3671_v11 }
 0xb51   :  { %v3633_v13 = vrot.slane %v3574_v20, %v7810_v14  ;;  %v4725_v20 = vsel %vm859_vm6, %v4705_v47, %v4724_v10  ;;  %v6618_v10 = vld [vmem:[#allocation10 + $0x4] ss:$8 sps:$4 sm:$0xff]   ;;  %v6619_v47 = vld [vmem:[#allocation10 + $0x10] ss:$8 sps:$4 sm:$0xff]  }
 0xb52   :  { %v3583_v49 = vpop.permute.xlu1 %3582  ;;  %v4726_v26 = vsel %vm861_vm7, %v4709_v55, %v4725_v20  ;;  %v6628_v55 = vld [vmem:[#allocation10 + $0x40] ss:$8 sps:$4 sm:$0xff]   ;;  %v6631_v20 = vld [vmem:[#allocation10 + $0x50] ss:$8 sps:$4 sm:$0xff]  }
 0xb53   :  { %v3634_v28 = vsel %vm786_vm5, %v3633_v13, %v3629_v30  ;;  %v3647_v29 = vrot.slane %v3583_v49, %v7807_v48  ;;  %v4551_v30 = vsel %vm4549_vm1, 1.0, %v9565_v16 }
 0xb54   :  { %v3580_v56 = vpop.permute.xlu0 %3579  ;;  %v3673_v3 = vsel %vm855_vm3, %v3634_v28, %v3672_v32  ;;  %v6614_v32 = vld [vmem:[%s9267_s5] sm:$0xff]  }
 0xb55   :  { %v3642_v27 = vrot.slane %v3580_v56, %v7810_v14 }
 0xb56   :  { %v3589_v33 = vpop.permute.xlu1 %3588 }
 0xb57   :  { %v3643_v0 = vsel %vm786_vm5, %v3642_v27, %v3638_v25  ;;  %v3656_v58 = vrot.slane %v3589_v33, %v7807_v48  ;;  %v9568_v27 = vld [vmem:[#allocation63_spill] sm:$0xff] }
 0xb58   :  { %v3586_v60 = vpop.permute.xlu0 %3585  ;;  %v3674_v19 = vsel %vm857_vm4, %v3643_v0, %v3673_v3  ;;  %vm4550_vm2 = vcmp.gt.f32.partialorder %v9568_v27, -1e+20  ;;  %v6282_v25 = vld [vmem:[%s9270_s8 + $0xb] ss:$0 sm:$0xff]  ;;  %v6672_v27 = vld [vmem:[#allocation10 + $0x124] ss:$8 sps:$4 sm:$0xff]  }
 0xb59   :  { %v3651_v40 = vrot.slane %v3586_v60, %v7810_v14  ;;  %v6279_v60 = vld [vmem:[%s9270_s8 + $0x8] ss:$0 sm:$0xff] }
 0xb5a   :  { %v3595_v63 = vpop.permute.xlu1 %3594 }
 0xb5b   :  { %v3652_v51 = vsel %vm786_vm5, %v3651_v40, %v3647_v29  ;;  %v3665_v45 = vrot.slane %v3595_v63, %v7807_v48 }
 0xb5c   :  { %v3592_v54 = vpop.permute.xlu0 %3591  ;;  %v3675_v49 = vsel %vm859_vm6, %v3652_v51, %v3674_v19  ;;  %v6624_v19 = vld [vmem:[#allocation10 + $0x24] ss:$8 sps:$4 sm:$0xff]  }
 0xb5d   :  { %v3660_v22 = vrot.slane %v3592_v54, %v7810_v14  ;;  %v4552_v54 = vsel %vm4550_vm2, 1.0, %v9565_v16 }
 0xb5e   :  { %v4625_v35 = vpop.permute.xlu1 %4624 }
 0xb5f   :  { %v3661_v7 = vsel %vm786_vm5, %v3660_v22, %v3656_v58  ;;  %v4681_v39 = vrot.slane %v4625_v35, %v7807_v48  ;;  %v6616_v35 = vld [vmem:[#allocation10] ss:$8 sps:$4 sm:$0xff]  }
 0xb60   :  { %v3598_v5 = vpop.permute.xlu0 %3597  ;;  %v3676_v24 = vsel %vm861_vm7, %v3661_v7, %v3675_v49  ;;  %v6615_v7 = vld [vmem:[%s9266_s4] sm:$0xff]  }
 0xb61   :  { %v3669_v46 = vrot.slane %v3598_v5, %v7810_v14  ;;  %v4717_v14 = vsel %vm857_vm4, %v4669_v44, %v4716_v61  ;;  %v6621_v5 = vld [vmem:[#allocation10 + $0x14] ss:$8 sps:$4 sm:$0xff]   ;;  %v6625_v61 = vld [vmem:[#allocation10 + $0x30] ss:$8 sps:$4 sm:$0xff]  }
 0xb62   :  { %v4718_v21 = vsel %vm859_vm6, %v4673_v36, %v4717_v14  ;;  %v6633_v49 = vld [vmem:[#allocation10 + $0x54] ss:$8 sps:$4 sm:$0xff]   ;;  %v6637_v14 = vld [vmem:[#allocation10 + $0x70] ss:$8 sps:$4 sm:$0xff]  }
 0xb63   :  { %v3670_v41 = vsel %vm786_vm5, %v3669_v46, %v3665_v45  ;;  %v4719_v33 = vsel %vm861_vm7, %v4677_v4, %v4718_v21  ;;  %v6622_v45 = vld [vmem:[#allocation10 + $0x20] ss:$8 sps:$4 sm:$0xff]   ;;  %v6627_v46 = vld [vmem:[#allocation10 + $0x34] ss:$8 sps:$4 sm:$0xff]   ;;  %v6630_v4 = vld [vmem:[#allocation10 + $0x44] ss:$8 sps:$4 sm:$0xff]  }
 0xb64   :  { %v3677_v53 = vsel %vm863_vm8, %v3670_v41, %v3676_v24  ;;  %v4649_v43 = vpop.permute.xlu0 %4648  ;;  %v4720_v52 = vsel %vm863_vm8, %v4681_v39, %v4719_v33  ;;  %v6636_v24 = vld [vmem:[#allocation10 + $0x64] ss:$8 sps:$4 sm:$0xff]   ;;  %v6634_v39 = vld [vmem:[#allocation10 + $0x60] ss:$8 sps:$4 sm:$0xff]   ;;  %v6639_v41 = vld [vmem:[#allocation10 + $0x74] ss:$8 sps:$4 sm:$0xff]  }
 0xb65   :  { %v3678_v56 = vpack.c.b16 %v3677_v53, %v3677_v53  ;;  %v4713_v8 = vrot.slane %v4649_v43, %v7807_v48  ;;  %v9566_v48 = vld [vmem:[#allocation64_spill] sm:$0xff]  ;;  %v6645_v21 = vld [vmem:[#allocation10 + $0x94] ss:$8 sps:$4 sm:$0xff]  }
 0xb66   :  { %vm3516_vm15 = vcmp.gt.f32.partialorder %v9566_v48, -1e+20  ;;  %v6642_v53 = vld [vmem:[#allocation10 + $0x84] ss:$8 sps:$4 sm:$0xff]   ;;  %v6640_v43 = vld [vmem:[#allocation10 + $0x80] ss:$8 sps:$4 sm:$0xff]  }
 0xb67   :  { %v4727_v31 = vsel %vm863_vm8, %v4713_v8, %v4726_v26  ;;  %6478 = vmatmul.mubr.msk.bf16.vlgmr.msra.gmra.mrb[8].mxu0 %vm866_vm9, %v3678_v56  ;;  %v3517_v62 = vsel %vm3516_vm15, 1.0, %v9565_v16  ;;  %v6643_v56 = vld [vmem:[#allocation10 + $0x90] ss:$8 sps:$4 sm:$0xff]   ;;  %v6648_v8 = vld [vmem:[#allocation10 + $0xa4] ss:$8 sps:$4 sm:$0xff]  }
 0xb68   :  { %v4728_v59 = vpack.c.b16 %v4727_v31, %v4720_v52  ;;  %6489 = vmatprep.mubr.msk.bf16.mxu0 %vm7148_vm11, %v9565_v16  ;;  %v6646_v33 = vld [vmem:[#allocation10 + $0xa0] ss:$8 sps:$4 sm:$0xff]   ;;  %v6651_v26 = vld [vmem:[#allocation10 + $0xb4] ss:$8 sps:$4 sm:$0xff]   ;;  %v6649_v52 = vld [vmem:[#allocation10 + $0xb0] ss:$8 sps:$4 sm:$0xff]  }
 0xb69   :  { %v6654_v31 = vld [vmem:[#allocation10 + $0xc4] ss:$8 sps:$4 sm:$0xff]   ;;  %v6655_v48 = vld [vmem:[#allocation10 + $0xd0] ss:$8 sps:$4 sm:$0xff]  }
 0xb6a   :  { %6484 = vmatmul.mubr.msk.bf16.vlgmr.msra.gmra.mrb[16].mxu1 %vm1941_vm10, %v4728_v59  ;;  %v6652_v59 = vld [vmem:[#allocation10 + $0xc0] ss:$8 sps:$4 sm:$0xff]  }
 0xb6b   :  { %6495 = vmatprep.mubr.msk.bf16.mxu1 %vm7148_vm11, %v9565_v16  ;;  %v6657_v16 = vld [vmem:[#allocation10 + $0xd4] ss:$8 sps:$4 sm:$0xff]  }
 0xc3a   :  { %v3716_v9 = vpop.f32.mrb[8].mxu0 }
 0xc3b   :  { %v3722_v13 = vmul.f32 %v3716_v9, %v3517_v62  ;;  %v6479_v42 = vpop.f32.mrb[9].mxu0  ;;  %v6658_v62 = vld [vmem:[#allocation10 + $0xe0] ss:$8 sps:$4 sm:$0xff]   ;;  %v6661_v9 = vld [vmem:[#allocation10 + $0xf0] ss:$8 sps:$4 sm:$0xff]  }
 0xc3c   :  { %v3719_v18 = vpop.f32.mrb[10].mxu0  ;;  %v6666_v42 = vld [vmem:[#allocation10 + $0x104] ss:$8 sps:$4 sm:$0xff]  }
 0xc3d   :  { %v4782_v63 = vmul.f32 %v6279_v60, %v3722_v13  ;;  %v6480_v2 = vpop.f32.mrb[11].mxu0  ;;  %v4769_v40 = vpop.f32.mrb[16].mxu1  ;;  %v6660_v60 = vld [vmem:[#allocation10 + $0xe4] ss:$8 sps:$4 sm:$0xff]   ;;  %v6664_v13 = vld [vmem:[#allocation10 + $0x100] ss:$8 sps:$4 sm:$0xff]  }
 0xc3e   :  { %v4776_v38 = vmul.f32 %v4769_v40, %v4551_v30  ;;  %v6485_v12 = vpop.f32.mrb[17].mxu1  ;;  %v6667_v18 = vld [vmem:[#allocation10 + $0x110] ss:$8 sps:$4 sm:$0xff]   ;;  %v6675_v2 = vld [vmem:[#allocation10 + $0x134] ss:$8 sps:$4 sm:$0xff]  }
 0xc3f   :  { %v4787_v23 = vadd.f32 %v6280_v57, %v4782_v63  ;;  %v4772_v1 = vpop.f32.mrb[18].mxu1  ;;  %v6669_v57 = vld [vmem:[#allocation10 + $0x114] ss:$8 sps:$4 sm:$0xff]   ;;  %v6670_v63 = vld [vmem:[#allocation10 + $0x120] ss:$8 sps:$4 sm:$0xff]  }
 0xc40   :  { %v4794_v28 = vmul.f32 %v6281_v50, %v4776_v38  ;;  %v4777_v29 = vmul.f32 %v4772_v1, %v4552_v54  ;;  %v6486_v22 = vpop.f32.mrb[19].mxu1  ;;  %v6678_v30 = vld [vmem:[#allocation10 + $0x144] ss:$8 sps:$4 sm:$0xff]   ;;  %v6676_v40 = vld [vmem:[#allocation10 + $0x140] ss:$8 sps:$4 sm:$0xff]  }
 0xc41   :  { %v4788_v6 = vmax.f32 %v4787_v23, 0.0  ;;  %v6681_v38 = vld [vmem:[#allocation10 + $0x154] ss:$8 sps:$4 sm:$0xff]   ;;  %v6679_v12 = vld [vmem:[#allocation10 + $0x150] ss:$8 sps:$4 sm:$0xff]  }
 0xc42   :  { %v4800_v11 = vadd.f32 %v6282_v25, %v4794_v28  ;;  %v4795_v0 = vmul.f32 %v6281_v50, %v4777_v29  ;;  %v6673_v50 = vld [vmem:[#allocation10 + $0x130] ss:$8 sps:$4 sm:$0xff]   ;;  %v6684_v23 = vld [vmem:[#allocation10 + $0x164] ss:$8 sps:$4 sm:$0xff]   ;;  %v6687_v54 = vld [vmem:[#allocation10 + $0x174] ss:$8 sps:$4 sm:$0xff]  }
 0xc43   :  { %v4789_v58 = vpack.c.bf16 %v4788_v6, %v4788_v6  ;;  %v6685_v1 = vld [vmem:[#allocation10 + $0x170] ss:$8 sps:$4 sm:$0xff]   ;;  %v6690_v28 = vld [vmem:[#allocation10 + $0x184] ss:$8 sps:$4 sm:$0xff]   ;;  %v6688_v29 = vld [vmem:[#allocation10 + $0x180] ss:$8 sps:$4 sm:$0xff]  }
 0xc44   :  { %v4801_v34 = vadd.f32 %v6282_v25, %v4795_v0  ;;  %v4802_v51 = vmax.f32 %v4800_v11, 0.0  ;;  %v6682_v25 = vld [vmem:[#allocation10 + $0x160] ss:$8 sps:$4 sm:$0xff]   ;;  %v6693_v22 = vld [vmem:[#allocation10 + $0x194] ss:$8 sps:$4 sm:$0xff]  }
 0xc45   :  { %v4867_v44 = vsel %vm2511_vm0, %v4789_v58, 0  ;;  %v6691_v6 = vld [vmem:[#allocation10 + $0x190] ss:$8 sps:$4 sm:$0xff]   ;;  %v6696_v11 = vld [vmem:[#allocation10 + $0x1a4] ss:$8 sps:$4 sm:$0xff]  }
 0xc46   :  { %v4803_v36 = vmax.f32 %v4801_v34, 0.0  ;;  %6494 = vmatpush3.bf16.msra.mxu1 %v4867_v44  ;;  %v6694_v0 = vld [vmem:[#allocation10 + $0x1a0] ss:$8 sps:$4 sm:$0xff]   ;;  %v6699_v58 = vld [vmem:[#allocation10 + $0x1b4] ss:$8 sps:$4 sm:$0xff]  }
 0xc47   :  { %5371 = vmatprep.subr.bf16.mxu1 %v6666_v42  ;;  %v6697_v34 = vld [vmem:[#allocation10 + $0x1b0] ss:$8 sps:$4 sm:$0xff]   ;;  %v6702_v44 = vld [vmem:[#allocation10 + $0x1c4] ss:$8 sps:$4 sm:$0xff]   ;;  %v6742_v42 = vld [vmem:[#allocation10 + $0x2a0] ss:$8 sps:$4 sm:$0xff]  }
 0xc48   :  { %v4804_v3 = vpack.c.bf16 %v4803_v36, %v4802_v51  ;;  %v6705_v51 = vld [vmem:[#allocation10 + $0x1d4] ss:$8 sps:$4 sm:$0xff]   ;;  %v6703_v36 = vld [vmem:[#allocation10 + $0x1d0] ss:$8 sps:$4 sm:$0xff]  }
 0xc49   :  { %6496 = vmatmul.mubr.msk.bf16.vlgmr.msra.gmra.mrb[20].mxu1 %vm1941_vm10, %v6614_v32  ;;  %v6700_v32 = vld [vmem:[#allocation10 + $0x1c0] ss:$8 sps:$4 sm:$0xff]  }
 0xc4a   :  { %6488 = vmatpush3.bf16.msra.mxu0 %v4804_v3  ;;  %5372 = vmatpush1.bf16.msra.mxu1 %v6664_v13  ;;  %v6744_v13 = vld [vmem:[#allocation10 + $0x2a4] ss:$8 sps:$4 sm:$0xff]  }
 0xc4b   :  { %5116 = vmatprep.subr.bf16.mxu0 %v6618_v10  ;;  %5373 = vmatprep.subr.bf16.mxu1 %v6669_v57  ;;  %v6747_v57 = vld [vmem:[#allocation10 + $0x2b4] ss:$8 sps:$4 sm:$0xff]  }
 0xc4d   :  { %6490 = vmatmul.mubr.msk.bf16.vlgmr.msra.gmra.mrb[12].mxu0 %vm866_vm9, %v6615_v7 }
 0xc4e   :  { %5117 = vmatpush1.bf16.msra.mxu0 %v6616_v35  ;;  %5374 = vmatpush1.bf16.msra.mxu1 %v6667_v18  ;;  %v6745_v18 = vld [vmem:[#allocation10 + $0x2b0] ss:$8 sps:$4 sm:$0xff]  }
 0xc4f   :  { %5118 = vmatprep.subr.bf16.mxu0 %v6621_v5  ;;  %5375 = vmatprep.subr.bf16.mxu1 %v6672_v27  ;;  %v6750_v27 = vld [vmem:[#allocation10 + $0x2c4] ss:$8 sps:$4 sm:$0xff]  }
 0xc52   :  { %5119 = vmatpush1.bf16.msra.mxu0 %v6619_v47  ;;  %5376 = vmatpush1.bf16.msra.mxu1 %v6670_v63  ;;  %v6748_v63 = vld [vmem:[#allocation10 + $0x2c0] ss:$8 sps:$4 sm:$0xff]  }
 0xc53   :  { %5120 = vmatprep.subr.bf16.mxu0 %v6624_v19  ;;  %5377 = vmatprep.subr.bf16.mxu1 %v6675_v2  ;;  %v6753_v2 = vld [vmem:[#allocation10 + $0x2d4] ss:$8 sps:$4 sm:$0xff]  }
 0xc56   :  { %5121 = vmatpush1.bf16.msra.mxu0 %v6622_v45  ;;  %5378 = vmatpush1.bf16.msra.mxu1 %v6673_v50  ;;  %v6751_v50 = vld [vmem:[#allocation10 + $0x2d0] ss:$8 sps:$4 sm:$0xff]  }
 0xc57   :  { %5122 = vmatprep.subr.bf16.mxu0 %v6627_v46  ;;  %5379 = vmatprep.subr.bf16.mxu1 %v6678_v30  ;;  %v4942_v30 = vld [vmem:[%s9272_s10] ss:$8 sm:$0x3] }
 0xc5a   :  { %5123 = vmatpush1.bf16.msra.mxu0 %v6625_v61  ;;  %5380 = vmatpush1.bf16.msra.mxu1 %v6676_v40  ;;  %v4949_v40 = vrot.slane %v4942_v30, %v7288_v15 }
 0xc5b   :  { %5124 = vmatprep.subr.bf16.mxu0 %v6630_v4  ;;  %5381 = vmatprep.subr.bf16.mxu1 %v6681_v38  ;;  %v6706_v4 = vld [vmem:[#allocation10 + $0x1e0] ss:$8 sps:$4 sm:$0xff]   ;;  %v4953_v38 = vrot.slane %v4942_v30, %v7291_v17 }
 0xc5e   :  { %5125 = vmatpush1.bf16.msra.mxu0 %v6628_v55  ;;  %5382 = vmatpush1.bf16.msra.mxu1 %v6679_v12  ;;  %v6708_v55 = vld [vmem:[#allocation10 + $0x1e4] ss:$8 sps:$4 sm:$0xff]  }
 0xc5f   :  { %5126 = vmatprep.subr.bf16.mxu0 %v6633_v49  ;;  %5383 = vmatprep.subr.bf16.mxu1 %v6684_v23  ;;  %v6711_v49 = vld [vmem:[#allocation10 + $0x1f4] ss:$8 sps:$4 sm:$0xff]  }
 0xc62   :  { %5127 = vmatpush1.bf16.msra.mxu0 %v6631_v20  ;;  %5384 = vmatpush1.bf16.msra.mxu1 %v6682_v25  ;;  %v6709_v20 = vld [vmem:[#allocation10 + $0x1f0] ss:$8 sps:$4 sm:$0xff]  }
 0xc63   :  { %5128 = vmatprep.subr.bf16.mxu0 %v6636_v24  ;;  %5385 = vmatprep.subr.bf16.mxu1 %v6687_v54  ;;  %v6712_v24 = vld [vmem:[#allocation10 + $0x200] ss:$8 sps:$4 sm:$0xff]  }
 0xc66   :  { %5129 = vmatpush1.bf16.msra.mxu0 %v6634_v39  ;;  %5386 = vmatpush1.bf16.msra.mxu1 %v6685_v1  ;;  %v6714_v39 = vld [vmem:[#allocation10 + $0x204] ss:$8 sps:$4 sm:$0xff]  }
 0xc67   :  { %5130 = vmatprep.subr.bf16.mxu0 %v6639_v41  ;;  %5387 = vmatprep.subr.bf16.mxu1 %v6690_v28  ;;  %v6717_v41 = vld [vmem:[#allocation10 + $0x214] ss:$8 sps:$4 sm:$0xff]  }
 0xc6a   :  { %5131 = vmatpush1.bf16.msra.mxu0 %v6637_v14  ;;  %5388 = vmatpush1.bf16.msra.mxu1 %v6688_v29  ;;  %v6715_v14 = vld [vmem:[#allocation10 + $0x210] ss:$8 sps:$4 sm:$0xff]  }
 0xc6b   :  { %5132 = vmatprep.subr.bf16.mxu0 %v6642_v53  ;;  %5389 = vmatprep.subr.bf16.mxu1 %v6693_v22  ;;  %v6720_v53 = vld [vmem:[#allocation10 + $0x224] ss:$8 sps:$4 sm:$0xff]  }
 0xc6e   :  { %5133 = vmatpush1.bf16.msra.mxu0 %v6640_v43  ;;  %5390 = vmatpush1.bf16.msra.mxu1 %v6691_v6  ;;  %v6718_v43 = vld [vmem:[#allocation10 + $0x220] ss:$8 sps:$4 sm:$0xff]  }
 0xc6f   :  { %5134 = vmatprep.subr.bf16.mxu0 %v6645_v21  ;;  %5391 = vmatprep.subr.bf16.mxu1 %v6696_v11  ;;  %v6723_v21 = vld [vmem:[#allocation10 + $0x234] ss:$8 sps:$4 sm:$0xff]  }
 0xc72   :  { %5135 = vmatpush1.bf16.msra.mxu0 %v6643_v56  ;;  %5392 = vmatpush1.bf16.msra.mxu1 %v6694_v0  ;;  %v6721_v56 = vld [vmem:[#allocation10 + $0x230] ss:$8 sps:$4 sm:$0xff]  }
 0xc73   :  { %5136 = vmatprep.subr.bf16.mxu0 %v6648_v8  ;;  %5393 = vmatprep.subr.bf16.mxu1 %v6699_v58  ;;  %v6726_v8 = vld [vmem:[#allocation10 + $0x244] ss:$8 sps:$4 sm:$0xff]  }
 0xc76   :  { %5137 = vmatpush1.bf16.msra.mxu0 %v6646_v33  ;;  %5394 = vmatpush1.bf16.msra.mxu1 %v6697_v34  ;;  %v6724_v33 = vld [vmem:[#allocation10 + $0x240] ss:$8 sps:$4 sm:$0xff]  }
 0xc77   :  { %5138 = vmatprep.subr.bf16.mxu0 %v6651_v26  ;;  %5395 = vmatprep.subr.bf16.mxu1 %v6702_v44  ;;  %v6729_v26 = vld [vmem:[#allocation10 + $0x254] ss:$8 sps:$4 sm:$0xff]  }
 0xc7a   :  { %5139 = vmatpush1.bf16.msra.mxu0 %v6649_v52  ;;  %5396 = vmatpush1.bf16.msra.mxu1 %v6700_v32  ;;  %v6727_v52 = vld [vmem:[#allocation10 + $0x250] ss:$8 sps:$4 sm:$0xff]   ;;  %v6754_v32 = vld [vmem:[#allocation10 + $0x2e0] ss:$8 sps:$4 sm:$0xff]  }
 0xc7b   :  { %5140 = vmatprep.subr.bf16.mxu0 %v6654_v31  ;;  %5397 = vmatprep.subr.bf16.mxu1 %v6705_v51  ;;  %v6732_v31 = vld [vmem:[#allocation10 + $0x264] ss:$8 sps:$4 sm:$0xff]  }
 0xc7c   :  { %v6756_v51 = vld [vmem:[#allocation10 + $0x2e4] ss:$8 sps:$4 sm:$0xff]  }
 0xc7e   :  { %5141 = vmatpush1.bf16.msra.mxu0 %v6652_v59  ;;  %5398 = vmatpush1.bf16.msra.mxu1 %v6703_v36  ;;  %v6730_v59 = vld [vmem:[#allocation10 + $0x260] ss:$8 sps:$4 sm:$0xff]   ;;  %v6759_v36 = vld [vmem:[#allocation10 + $0x2f4] ss:$8 sps:$4 sm:$0xff]  }
 0xc7f   :  { %5142 = vmatprep.subr.bf16.mxu0 %v6657_v16  ;;  %5399 = vmatprep.subr.bf16.mxu1 %v6708_v55  ;;  %v6735_v16 = vld [vmem:[#allocation10 + $0x274] ss:$8 sps:$4 sm:$0xff]  }
 0xc80   :  { %v6777_v55 = vld [vmem:[#allocation10 + $0x354] ss:$8 sps:$4 sm:$0xff]  }
 0xc82   :  { %5143 = vmatpush1.bf16.msra.mxu0 %v6655_v48  ;;  %5400 = vmatpush1.bf16.msra.mxu1 %v6706_v4  ;;  %v6733_v48 = vld [vmem:[#allocation10 + $0x270] ss:$8 sps:$4 sm:$0xff]   ;;  %v6772_v4 = vld [vmem:[#allocation10 + $0x340] ss:$8 sps:$4 sm:$0xff]  }
 0xc83   :  { %5144 = vmatprep.subr.bf16.mxu0 %v6660_v60  ;;  %5401 = vmatprep.subr.bf16.mxu1 %v6711_v49  ;;  %v6738_v60 = vld [vmem:[#allocation10 + $0x284] ss:$8 sps:$4 sm:$0xff]   ;;  %v6775_v49 = vld [vmem:[#allocation10 + $0x350] ss:$8 sps:$4 sm:$0xff]  }
 0xc86   :  { %5145 = vmatpush1.bf16.msra.mxu0 %v6658_v62  ;;  %5402 = vmatpush1.bf16.msra.mxu1 %v6709_v20  ;;  %v6736_v62 = vld [vmem:[#allocation10 + $0x280] ss:$8 sps:$4 sm:$0xff]   ;;  %v6780_v20 = vld [vmem:[#allocation10 + $0x364] ss:$8 sps:$4 sm:$0xff]  }
 0xc87   :  { %5146 = vmatprep.subr.bf16.mxu0 %v6663_v37  ;;  %v6739_v37 = vld [vmem:[#allocation10 + $0x290] ss:$8 sps:$4 sm:$0xff]  }
 0xc8a   :  { %5147 = vmatpush1.bf16.msra.mxu0 %v6661_v9  ;;  %v6741_v9 = vld [vmem:[#allocation10 + $0x294] ss:$8 sps:$4 sm:$0xff]  }
 0xc8b   :  { %5626 = vmatprep.subr.bf16.mxu0 %v6714_v39  ;;  %v6783_v39 = vld [vmem:[#allocation10 + $0x374] ss:$8 sps:$4 sm:$0xff]  }
 0xd1c   :  { %v4903_v10 = vpop.f32.mrb[20].mxu1 }
 0xd1d   :  { %v6497_v3 = vpop.f32.mrb[21].mxu1 }
 0xd1e   :  { %v4906_v7 = vpop.f32.mrb[22].mxu1  ;;  %v6760_v3 = vld [vmem:[#allocation10 + $0x300] ss:$8 sps:$4 sm:$0xff]  }
 0xd1f   :  { %v4944_v35 = vpack.c.bf16 %v4906_v7, %v4903_v10  ;;  %v6498_v5 = vpop.f32.mrb[23].mxu1  ;;  %v6757_v10 = vld [vmem:[#allocation10 + $0x2f0] ss:$8 sps:$4 sm:$0xff]   ;;  %v6762_v7 = vld [vmem:[#allocation10 + $0x304] ss:$8 sps:$4 sm:$0xff]  }
 0xd20   :  { %v4849_v47 = vpop.f32.mrb[12].mxu0  ;;  %5881 = vmatprep.subr.bf16.mxu1 %v6762_v7  ;;  %v6763_v5 = vld [vmem:[#allocation10 + $0x310] ss:$8 sps:$4 sm:$0xff]   ;;  %v6831_v7 = vld [vmem:[#allocation10 + $0x474] ss:$8 sps:$4 sm:$0xff]  }
 0xd21   :  { %v6491_v19 = vpop.f32.mrb[13].mxu0  ;;  %5148 = vmatprep.mubr.bf16.mxu0 %v4944_v35  ;;  %v6765_v35 = vld [vmem:[#allocation10 + $0x314] ss:$8 sps:$4 sm:$0xff]  }
 0xd22   :  { %v4852_v45 = vpop.f32.mrb[14].mxu0  ;;  %v6766_v19 = vld [vmem:[#allocation10 + $0x320] ss:$8 sps:$4 sm:$0xff]  }
 0xd23   :  { %v4943_v46 = vpack.c.bf16 %v4852_v45, %v4849_v47  ;;  %v6492_v61 = vpop.f32.mrb[15].mxu0  ;;  %v6768_v47 = vld [vmem:[#allocation10 + $0x324] ss:$8 sps:$4 sm:$0xff]   ;;  %v6771_v45 = vld [vmem:[#allocation10 + $0x334] ss:$8 sps:$4 sm:$0xff]  }
 0xd24   :  { %v6774_v61 = vld [vmem:[#allocation10 + $0x344] ss:$8 sps:$4 sm:$0xff]  }
 0xd25   :  { %5149 = vmatmul.mubr.bf16.vlgmr.msra.gmra.mrb[16].mxu0 %v4943_v46  ;;  %v6769_v46 = vld [vmem:[#allocation10 + $0x330] ss:$8 sps:$4 sm:$0xff]  }
 0xd26   :  { %5627 = vmatpush1.bf16.msra.mxu0 %v6712_v24  ;;  %v6778_v24 = vld [vmem:[#allocation10 + $0x360] ss:$8 sps:$4 sm:$0xff]  }
 0xd27   :  { %5628 = vmatprep.subr.bf16.mxu0 %v6717_v41  ;;  %v6781_v41 = vld [vmem:[#allocation10 + $0x370] ss:$8 sps:$4 sm:$0xff]  }
 0xd2a   :  { %5629 = vmatpush1.bf16.msra.mxu0 %v6715_v14  ;;  %v6786_v14 = vld [vmem:[#allocation10 + $0x384] ss:$8 sps:$4 sm:$0xff]  }
 0xd2b   :  { %5630 = vmatprep.subr.bf16.mxu0 %v6720_v53  ;;  %v6784_v53 = vld [vmem:[#allocation10 + $0x380] ss:$8 sps:$4 sm:$0xff]  }
 0xd2e   :  { %5631 = vmatpush1.bf16.msra.mxu0 %v6718_v43  ;;  %v6789_v43 = vld [vmem:[#allocation10 + $0x394] ss:$8 sps:$4 sm:$0xff]  }
 0xd2f   :  { %5632 = vmatprep.subr.bf16.mxu0 %v6723_v21  ;;  %v6787_v21 = vld [vmem:[#allocation10 + $0x390] ss:$8 sps:$4 sm:$0xff]  }
 0xd32   :  { %5633 = vmatpush1.bf16.msra.mxu0 %v6721_v56  ;;  %v6792_v56 = vld [vmem:[#allocation10 + $0x3a4] ss:$8 sps:$4 sm:$0xff]  }
 0xd33   :  { %5634 = vmatprep.subr.bf16.mxu0 %v6726_v8  ;;  %v6790_v8 = vld [vmem:[#allocation10 + $0x3a0] ss:$8 sps:$4 sm:$0xff]  }
 0xd36   :  { %5635 = vmatpush1.bf16.msra.mxu0 %v6724_v33  ;;  %v6795_v33 = vld [vmem:[#allocation10 + $0x3b4] ss:$8 sps:$4 sm:$0xff]  }
 0xd37   :  { %5636 = vmatprep.subr.bf16.mxu0 %v6729_v26  ;;  %v6793_v26 = vld [vmem:[#allocation10 + $0x3b0] ss:$8 sps:$4 sm:$0xff]  }
 0xd3a   :  { %5637 = vmatpush1.bf16.msra.mxu0 %v6727_v52  ;;  %v6798_v52 = vld [vmem:[#allocation10 + $0x3c4] ss:$8 sps:$4 sm:$0xff]  }
 0xd3b   :  { %5638 = vmatprep.subr.bf16.mxu0 %v6732_v31  ;;  %v6796_v31 = vld [vmem:[#allocation10 + $0x3c0] ss:$8 sps:$4 sm:$0xff]  }
 0xd3e   :  { %5639 = vmatpush1.bf16.msra.mxu0 %v6730_v59  ;;  %v6801_v59 = vld [vmem:[#allocation10 + $0x3d4] ss:$8 sps:$4 sm:$0xff]  }
 0xd3f   :  { %5640 = vmatprep.subr.bf16.mxu0 %v6735_v16  ;;  %v6799_v16 = vld [vmem:[#allocation10 + $0x3d0] ss:$8 sps:$4 sm:$0xff]  }
 0xd42   :  { %5641 = vmatpush1.bf16.msra.mxu0 %v6733_v48  ;;  %v6319_v48 = vld [vmem:[%s9272_s10 + $0x1] ss:$8 sm:$0x3] }
 0xd43   :  { %5642 = vmatprep.subr.bf16.mxu0 %v6738_v60  ;;  %v5204_v60 = vrot.slane %v6319_v48, %v7288_v15 }
 0xd46   :  { %5643 = vmatpush1.bf16.msra.mxu0 %v6736_v62  ;;  %v5208_v62 = vrot.slane %v6319_v48, %v7291_v17 }
 0xd47   :  { %5644 = vmatprep.subr.bf16.mxu0 %v6741_v9 }
 0xd4a   :  { %5645 = vmatpush1.bf16.msra.mxu0 %v6739_v37 }
 0xd4b   :  { %5646 = vmatprep.subr.bf16.mxu0 %v6744_v13 }
 0xd4e   :  { %5647 = vmatpush1.bf16.msra.mxu0 %v6742_v42 }
 0xd4f   :  { %5648 = vmatprep.subr.bf16.mxu0 %v6747_v57 }
 0xd52   :  { %5649 = vmatpush1.bf16.msra.mxu0 %v6745_v18 }
 0xd53   :  { %5650 = vmatprep.subr.bf16.mxu0 %v6750_v27 }
 0xd56   :  { %5651 = vmatpush1.bf16.msra.mxu0 %v6748_v63 }
 0xd57   :  { %5652 = vmatprep.subr.bf16.mxu0 %v6753_v2 }
 0xd5a   :  { %5653 = vmatpush1.bf16.msra.mxu0 %v6751_v50 }
 0xd5b   :  { %5654 = vmatprep.subr.bf16.mxu0 %v6756_v51  ;;  %v6825_v51 = vld [vmem:[#allocation10 + $0x454] ss:$8 sps:$4 sm:$0xff]  }
 0xd5e   :  { %5655 = vmatpush1.bf16.msra.mxu0 %v6754_v32  ;;  %v6820_v32 = vld [vmem:[#allocation10 + $0x440] ss:$8 sps:$4 sm:$0xff]  }
 0xd5f   :  { %5656 = vmatprep.subr.bf16.mxu0 %v6759_v36  ;;  %v6823_v36 = vld [vmem:[#allocation10 + $0x450] ss:$8 sps:$4 sm:$0xff]  }
 0xd62   :  { %5657 = vmatpush1.bf16.msra.mxu0 %v6757_v10  ;;  %v6828_v10 = vld [vmem:[#allocation10 + $0x464] ss:$8 sps:$4 sm:$0xff]  }
 0xdf8   :  { %v5150_v12 = vpop.f32.mrb[16].mxu0 }
 0xdf9   :  { %v5151_v23 = vadd.f32 %v5150_v12, %v4949_v40  ;;  %v5152_v25 = vpop.f32.mrb[17].mxu0 }
 0xdfa   :  { %v5153_v54 = vadd.f32 %v5152_v25, %v4953_v38  ;;  %v5154_v1 = vpop.f32.mrb[18].mxu0  ;;  %v6804_v25 = vld [vmem:[#allocation10 + $0x3e4] ss:$8 sps:$4 sm:$0xff]  }
 0xdfb   :  { %v5155_v28 = vadd.f32 %v5154_v1, %v4949_v40  ;;  %v5156_v29 = vpop.f32.mrb[19].mxu0  ;;  %v5159_v6 = vmax.f32 %v5151_v23, 0.0  ;;  %v6802_v23 = vld [vmem:[#allocation10 + $0x3e0] ss:$8 sps:$4 sm:$0xff]   ;;  %v6805_v1 = vld [vmem:[#allocation10 + $0x3f0] ss:$8 sps:$4 sm:$0xff]  }
 0xdfc   :  { %v5157_v22 = vadd.f32 %v5156_v29, %v4953_v38  ;;  %v5160_v0 = vmax.f32 %v5153_v54, 0.0  ;;  %v6807_v54 = vld [vmem:[#allocation10 + $0x3f4] ss:$8 sps:$4 sm:$0xff]   ;;  %v6810_v29 = vld [vmem:[#allocation10 + $0x404] ss:$8 sps:$4 sm:$0xff]  }
 0xdfd   :  { %v5161_v11 = vmax.f32 %v5155_v28, 0.0  ;;  %v6808_v28 = vld [vmem:[#allocation10 + $0x400] ss:$8 sps:$4 sm:$0xff]   ;;  %6136 = vmatprep.subr.bf16.mxu0 %v6810_v29 }
 0xdfe   :  { %v5162_v58 = vmax.f32 %v5157_v22, 0.0  ;;  %v6813_v22 = vld [vmem:[#allocation10 + $0x414] ss:$8 sps:$4 sm:$0xff]  }
 0xdff   :  { %v5198_v34 = vpack.c.bf16 %v5161_v11, %v5159_v6  ;;  %v6811_v6 = vld [vmem:[#allocation10 + $0x410] ss:$8 sps:$4 sm:$0xff]   ;;  %v6816_v11 = vld [vmem:[#allocation10 + $0x424] ss:$8 sps:$4 sm:$0xff]  }
 0xe00   :  { %v5199_v44 = vpack.c.bf16 %v5162_v58, %v5160_v0  ;;  %v6814_v0 = vld [vmem:[#allocation10 + $0x420] ss:$8 sps:$4 sm:$0xff]   ;;  %v6819_v58 = vld [vmem:[#allocation10 + $0x434] ss:$8 sps:$4 sm:$0xff]  }
 0xe02   :  { %5403 = vmatprep.mubr.bf16.mxu1 %v5199_v44  ;;  %v6822_v44 = vld [vmem:[#allocation10 + $0x444] ss:$8 sps:$4 sm:$0xff]  }
 0xe03   :  { %5404 = vmatmul.mubr.bf16.vlgmr.msra.gmra.mrb[24].mxu1 %v5198_v34  ;;  %v6817_v34 = vld [vmem:[#allocation10 + $0x430] ss:$8 sps:$4 sm:$0xff]  }
 0xe04   :  { %5882 = vmatpush1.bf16.msra.mxu1 %v6760_v3  ;;  %v6826_v3 = vld [vmem:[#allocation10 + $0x460] ss:$8 sps:$4 sm:$0xff]  }
 0xe05   :  { %5883 = vmatprep.subr.bf16.mxu1 %v6765_v35  ;;  %v6829_v35 = vld [vmem:[#allocation10 + $0x470] ss:$8 sps:$4 sm:$0xff]  }
 0xe08   :  { %5884 = vmatpush1.bf16.msra.mxu1 %v6763_v5  ;;  %v6834_v5 = vld [vmem:[#allocation10 + $0x484] ss:$8 sps:$4 sm:$0xff]  }
 0xe09   :  { %5885 = vmatprep.subr.bf16.mxu1 %v6768_v47  ;;  %v6832_v47 = vld [vmem:[#allocation10 + $0x480] ss:$8 sps:$4 sm:$0xff]  }
 0xe0c   :  { %5886 = vmatpush1.bf16.msra.mxu1 %v6766_v19  ;;  %v6837_v19 = vld [vmem:[#allocation10 + $0x494] ss:$8 sps:$4 sm:$0xff]  }
 0xe0d   :  { %5887 = vmatprep.subr.bf16.mxu1 %v6771_v45  ;;  %v6835_v45 = vld [vmem:[#allocation10 + $0x490] ss:$8 sps:$4 sm:$0xff]  }
 0xe10   :  { %5888 = vmatpush1.bf16.msra.mxu1 %v6769_v46  ;;  %v6840_v46 = vld [vmem:[#allocation10 + $0x4a4] ss:$8 sps:$4 sm:$0xff]  }
 0xe11   :  { %5889 = vmatprep.subr.bf16.mxu1 %v6774_v61  ;;  %v6838_v61 = vld [vmem:[#allocation10 + $0x4a0] ss:$8 sps:$4 sm:$0xff]  }
 0xe14   :  { %5890 = vmatpush1.bf16.msra.mxu1 %v6772_v4  ;;  %v6843_v4 = vld [vmem:[#allocation10 + $0x4b4] ss:$8 sps:$4 sm:$0xff]  }
 0xe15   :  { %5891 = vmatprep.subr.bf16.mxu1 %v6777_v55  ;;  %v6841_v55 = vld [vmem:[#allocation10 + $0x4b0] ss:$8 sps:$4 sm:$0xff]  }
 0xe18   :  { %5892 = vmatpush1.bf16.msra.mxu1 %v6775_v49  ;;  %v6846_v49 = vld [vmem:[#allocation10 + $0x4c4] ss:$8 sps:$4 sm:$0xff]  }
 0xe19   :  { %5893 = vmatprep.subr.bf16.mxu1 %v6780_v20  ;;  %v6844_v20 = vld [vmem:[#allocation10 + $0x4c0] ss:$8 sps:$4 sm:$0xff]  }
 0xe1c   :  { %5894 = vmatpush1.bf16.msra.mxu1 %v6778_v24  ;;  %v6849_v24 = vld [vmem:[#allocation10 + $0x4d4] ss:$8 sps:$4 sm:$0xff]  }
 0xe1d   :  { %5895 = vmatprep.subr.bf16.mxu1 %v6783_v39  ;;  %v6847_v39 = vld [vmem:[#allocation10 + $0x4d0] ss:$8 sps:$4 sm:$0xff]  }
 0xe20   :  { %5896 = vmatpush1.bf16.msra.mxu1 %v6781_v41  ;;  %v6352_v41 = vld [vmem:[%s9272_s10 + $0x2] ss:$8 sm:$0x3] }
 0xe21   :  { %5897 = vmatprep.subr.bf16.mxu1 %v6786_v14  ;;  %v5459_v14 = vrot.slane %v6352_v41, %v7288_v15 }
 0xe24   :  { %5898 = vmatpush1.bf16.msra.mxu1 %v6784_v53  ;;  %v5463_v53 = vrot.slane %v6352_v41, %v7291_v17 }
 0xe25   :  { %5899 = vmatprep.subr.bf16.mxu1 %v6789_v43 }
 0xe28   :  { %5900 = vmatpush1.bf16.msra.mxu1 %v6787_v21 }
 0xe29   :  { %5901 = vmatprep.subr.bf16.mxu1 %v6792_v56 }
 0xe2c   :  { %5902 = vmatpush1.bf16.msra.mxu1 %v6790_v8 }
 0xe2d   :  { %5903 = vmatprep.subr.bf16.mxu1 %v6795_v33 }
 0xe30   :  { %5904 = vmatpush1.bf16.msra.mxu1 %v6793_v26 }
 0xe31   :  { %5905 = vmatprep.subr.bf16.mxu1 %v6798_v52 }
 0xe34   :  { %5906 = vmatpush1.bf16.msra.mxu1 %v6796_v31 }
 0xe35   :  { %5907 = vmatprep.subr.bf16.mxu1 %v6801_v59 }
 0xe38   :  { %5908 = vmatpush1.bf16.msra.mxu1 %v6799_v16 }
 0xe39   :  { %5909 = vmatprep.subr.bf16.mxu1 %v6804_v25 }
 0xe3c   :  { %5910 = vmatpush1.bf16.msra.mxu1 %v6802_v23 }
 0xe3d   :  { %5911 = vmatprep.subr.bf16.mxu1 %v6807_v54 }
 0xe40   :  { %5912 = vmatpush1.bf16.msra.mxu1 %v6805_v1 }
 0xed6   :  { %v5405_v9 = vpop.f32.mrb[24].mxu1 }
 0xed7   :  { %v5406_v37 = vadd.f32 %v5405_v9, %v5204_v60  ;;  %v5407_v13 = vpop.f32.mrb[25].mxu1 }
 0xed8   :  { %v5408_v42 = vadd.f32 %v5407_v13, %v5208_v62  ;;  %v5409_v57 = vpop.f32.mrb[26].mxu1  ;;  %v6852_v13 = vld [vmem:[#allocation10 + $0x4e4] ss:$8 sps:$4 sm:$0xff]  }
 0xed9   :  { %v5410_v18 = vadd.f32 %v5409_v57, %v5204_v60  ;;  %v5411_v27 = vpop.f32.mrb[27].mxu1  ;;  %v5414_v2 = vmax.f32 %v5406_v37, 0.0  ;;  %v6850_v37 = vld [vmem:[#allocation10 + $0x4e0] ss:$8 sps:$4 sm:$0xff]   ;;  %v6853_v57 = vld [vmem:[#allocation10 + $0x4f0] ss:$8 sps:$4 sm:$0xff]  }
 0xeda   :  { %v5412_v63 = vadd.f32 %v5411_v27, %v5208_v62  ;;  %v5415_v30 = vmax.f32 %v5408_v42, 0.0  ;;  %v6855_v42 = vld [vmem:[#allocation10 + $0x4f4] ss:$8 sps:$4 sm:$0xff]  }
 0xedb   :  { %v5416_v50 = vmax.f32 %v5410_v18, 0.0  ;;  %v6385_v18 = vld [vmem:[%s9272_s10 + $0x3] ss:$8 sm:$0x3] }
 0xedc   :  { %v5417_v40 = vmax.f32 %v5412_v63, 0.0  ;;  %v5714_v27 = vrot.slane %v6385_v18, %v7288_v15  ;;  %v5718_v63 = vrot.slane %v6385_v18, %v7291_v17 }
 0xedd   :  { %v5453_v38 = vpack.c.bf16 %v5416_v50, %v5414_v2 }
 0xede   :  { %v5454_v12 = vpack.c.bf16 %v5417_v40, %v5415_v30 }
 0xee0   :  { %5658 = vmatprep.mubr.bf16.mxu0 %v5454_v12 }
 0xee1   :  { %5659 = vmatmul.mubr.bf16.vlgmr.msra.gmra.mrb[20].mxu0 %v5453_v38 }
 0xee2   :  { %6137 = vmatpush1.bf16.msra.mxu0 %v6808_v28 }
 0xee3   :  { %6138 = vmatprep.subr.bf16.mxu0 %v6813_v22 }
 0xee6   :  { %6139 = vmatpush1.bf16.msra.mxu0 %v6811_v6 }
 0xee7   :  { %6140 = vmatprep.subr.bf16.mxu0 %v6816_v11  ;;  %v6418_v11 = vld [vmem:[%s9272_s10 + $0x4] ss:$8 sm:$0x3]  ;;  %s7106_s10 = scalar_lea.vmem %s6189_s14, 512 }
 0xee8   :  { %p7107_p12 = scmp.ne.s32.totalorder %s6189_s14, %s7106_s10  ;;  %p7112_p0 = scmp.lt.s32.totalorder %s7106_s10, %s7106_s10 }
 0xeea   :  { %6141 = vmatpush1.bf16.msra.mxu0 %v6814_v0  ;;  %v5969_v0 = vrot.slane %v6418_v11, %v7288_v15  ;;  %p7113_p1 = por %p7112_p0, %p7111_p13 }
 0xeeb   :  { %6142 = vmatprep.subr.bf16.mxu0 %v6819_v58  ;;  %v5973_v58 = vrot.slane %v6418_v11, %v7291_v17 }
 0xeec   :  { %p7114_p2 = pnand %p7113_p1, %p7107_p12 }
 0xeee   :  { %6143 = vmatpush1.bf16.msra.mxu0 %v6817_v34 }
 0xeef   :  { %6144 = vmatprep.subr.bf16.mxu0 %v6822_v44 }
 0xef2   :  { %6145 = vmatpush1.bf16.msra.mxu0 %v6820_v32 }
 0xef3   :  { %6146 = vmatprep.subr.bf16.mxu0 %v6825_v51 }
 0xef6   :  { %6147 = vmatpush1.bf16.msra.mxu0 %v6823_v36 }
 0xef7   :  { %6148 = vmatprep.subr.bf16.mxu0 %v6828_v10 }
 0xefa   :  { %6149 = vmatpush1.bf16.msra.mxu0 %v6826_v3 }
 0xefb   :  { %6150 = vmatprep.subr.bf16.mxu0 %v6831_v7 }
 0xefe   :  { %6151 = vmatpush1.bf16.msra.mxu0 %v6829_v35 }
 0xeff   :  { %6152 = vmatprep.subr.bf16.mxu0 %v6834_v5 }
 0xf02   :  { %6153 = vmatpush1.bf16.msra.mxu0 %v6832_v47 }
 0xf03   :  { %6154 = vmatprep.subr.bf16.mxu0 %v6837_v19 }
 0xf06   :  { %6155 = vmatpush1.bf16.msra.mxu0 %v6835_v45 }
 0xf07   :  { %6156 = vmatprep.subr.bf16.mxu0 %v6840_v46 }
 0xf0a   :  { %6157 = vmatpush1.bf16.msra.mxu0 %v6838_v61 }
 0xf0b   :  { %6158 = vmatprep.subr.bf16.mxu0 %v6843_v4 }
 0xf0e   :  { %6159 = vmatpush1.bf16.msra.mxu0 %v6841_v55 }
 0xf0f   :  { %6160 = vmatprep.subr.bf16.mxu0 %v6846_v49 }
 0xf12   :  { %6161 = vmatpush1.bf16.msra.mxu0 %v6844_v20 }
 0xf13   :  { %6162 = vmatprep.subr.bf16.mxu0 %v6849_v24 }
 0xf16   :  { %6163 = vmatpush1.bf16.msra.mxu0 %v6847_v39 }
 0xf17   :  { %6164 = vmatprep.subr.bf16.mxu0 %v6852_v13 }
 0xf1a   :  { %6165 = vmatpush1.bf16.msra.mxu0 %v6850_v37 }
 0xf1b   :  { %6166 = vmatprep.subr.bf16.mxu0 %v6855_v42 }
 0xf1e   :  { %6167 = vmatpush1.bf16.msra.mxu0 %v6853_v57 }
 0xfb4   :  { %v5660_v43 = vpop.f32.mrb[20].mxu0 }
 0xfb5   :  { %v5661_v21 = vadd.f32 %v5660_v43, %v5459_v14  ;;  %v5662_v56 = vpop.f32.mrb[21].mxu0 }
 0xfb6   :  { %v5663_v8 = vadd.f32 %v5662_v56, %v5463_v53  ;;  %v5664_v33 = vpop.f32.mrb[22].mxu0 }
 0xfb7   :  { %v5665_v26 = vadd.f32 %v5664_v33, %v5459_v14  ;;  %v5666_v52 = vpop.f32.mrb[23].mxu0  ;;  %v5669_v59 = vmax.f32 %v5661_v21, 0.0 }
 0xfb8   :  { %v5667_v31 = vadd.f32 %v5666_v52, %v5463_v53  ;;  %v5670_v48 = vmax.f32 %v5663_v8, 0.0 }
 0xfb9   :  { %v5671_v16 = vmax.f32 %v5665_v26, 0.0 }
 0xfba   :  { %v5672_v60 = vmax.f32 %v5667_v31, 0.0 }
 0xfbb   :  { %v5708_v62 = vpack.c.bf16 %v5671_v16, %v5669_v59 }
 0xfbc   :  { %v5709_v9 = vpack.c.bf16 %v5672_v60, %v5670_v48 }
 0xfbe   :  { %5913 = vmatprep.mubr.bf16.mxu1 %v5709_v9 }
 0xfbf   :  { %5914 = vmatmul.mubr.bf16.vlgmr.msra.gmra.mrb[28].mxu1 %v5708_v62 }
0x1092   :  { %v5915_v2 = vpop.f32.mrb[28].mxu1 }
0x1093   :  { %v5916_v50 = vadd.f32 %v5915_v2, %v5714_v27  ;;  %v5917_v30 = vpop.f32.mrb[29].mxu1 }
0x1094   :  { %v5918_v40 = vadd.f32 %v5917_v30, %v5718_v63  ;;  %v5919_v38 = vpop.f32.mrb[30].mxu1 }
0x1095   :  { %v5920_v12 = vadd.f32 %v5919_v38, %v5714_v27  ;;  %v5921_v23 = vpop.f32.mrb[31].mxu1  ;;  %v5924_v54 = vmax.f32 %v5916_v50, 0.0 }
0x1096   :  { %v5922_v25 = vadd.f32 %v5921_v23, %v5718_v63  ;;  %v5925_v28 = vmax.f32 %v5918_v40, 0.0 }
0x1097   :  { %v5926_v1 = vmax.f32 %v5920_v12, 0.0 }
0x1098   :  { %v5927_v29 = vmax.f32 %v5922_v25, 0.0 }
0x1099   :  { %v5963_v22 = vpack.c.bf16 %v5926_v1, %v5924_v54 }
0x109a   :  { %v5964_v6 = vpack.c.bf16 %v5927_v29, %v5925_v28 }
0x109c   :  { %6168 = vmatprep.mubr.bf16.mxu0 %v5964_v6 }
0x109d   :  { %6169 = vmatmul.mubr.bf16.vlgmr.msra.gmra.mrb[24].mxu0 %v5963_v22 }
0x1170   :  { %v6170_v34 = vpop.f32.mrb[24].mxu0 }
0x1171   :  { %v6171_v44 = vadd.f32 %v6170_v34, %v5969_v0  ;;  %v6172_v32 = vpop.f32.mrb[25].mxu0 }
0x1172   :  { %v6173_v51 = vadd.f32 %v6172_v32, %v5973_v58  ;;  %v6174_v36 = vpop.f32.mrb[26].mxu0 }
0x1173   :  { %6179 = vst [vmem:[#allocation11] sm:$0xff] %v6171_v44  ;;  %v6175_v10 = vadd.f32 %v6174_v36, %v5969_v0  ;;  %v6176_v3 = vpop.f32.mrb[27].mxu0 }
0x1174   :  { %6180 = vst [vmem:[#allocation11 + $0x8] sm:$0xff] %v6173_v51  ;;  %v6177_v7 = vadd.f32 %v6176_v3, %v5973_v58 }
0x1175   :  { %6181 = vst [vmem:[#allocation11 + $0x10] sm:$0xff] %v6175_v10 }
0x1176   :  { %6182 = vst [vmem:[#allocation11 + $0x18] sm:$0xff] %v6177_v7 }
0x1177   :  { %7117 = shalt.err (!%p7114_p2)
}
0x1178   :  { %s7118_s30 = scalar_lea.hbm %s9273_s11, 512 }
0x1179   :  { %p7119_p3 = scmp.ne.s32.totalorder %s9273_s11, %s7118_s30  ;;  %p7122_p4 = scmp.lt.u32.totalorder %s7118_s30, %s9273_s11 }
0x117b   :  { %p7124_p5 = pnand %p7122_p4, %p7119_p3 }
0x117d   :  { %7127 = shalt.err (!%p7124_p5)
}
0x117e   :  { %s7150_s6 = smov 256   ;;  %s7151_s20 = smov 16  }
0x117f   :  { %6194 = dma.vmem_to_hbm [thread:$0]  %s6189_s14, 512, %s9273_s11, [#allocation4], %s7150_s6, %s7150_s6, %s7151_s20  }
0x1180   :  { %7134 = dma.done.wait [#allocation4], 512  }
0x1181   :  { %7135 = vsyncadd [#allocation4], 4294966784 }
0x1182   :  { %6198 = vsyncpa [#allocation3], 1 }
0x1183   :  { %6199 = vsyncpa [#allocation6], 1 }
0x1184   :  { %6200 = vsyncpa [#allocation9], 1 }
0x1185   :  { %6201 = vsyncpa [#allocation4], 1 }

</bundles_post_ra>
